<compile_context>
chip_gen: v6e
topology: v6e:2x2x1
jax: 0.10.0
libtpu: 0.0.40
codegen_flags: <defaults>
</compile_context>

<pallas_src>
import functools
import math

import jax
import jax.numpy as jnp
from jax.experimental import pallas as pl
from jax.experimental.pallas import tpu as pltpu

MATMUL_DTYPE = jnp.bfloat16   # weights fed to the MXU; accumulate in f32

LAYER_NAMES = ('ln1_g', 'ln1_b', 'wq', 'bq', 'wk', 'bk', 'wv', 'bv',
               'wo', 'bo', 'ln2_g', 'ln2_b', 'wm1', 'bm1', 'wm2', 'bm2')


# ----------------------------------------------------------------------------
# In-kernel helpers
# ----------------------------------------------------------------------------

def _silu(x):
    return x * jax.nn.sigmoid(x)


def _dot(x, w):
    # Cast the activation to the (possibly bf16) weight dtype; accumulate f32.
    return jnp.dot(x.astype(w.dtype), w, preferred_element_type=jnp.float32)


def _softmax_last(x):
    m = jnp.max(x, axis=-1, keepdims=True)
    e = jnp.exp(x - m)
    return e * pl.reciprocal(jnp.sum(e, axis=-1, keepdims=True), approx=True)


def _layernorm(h, g, b):
    mu = jnp.mean(h, axis=-1, keepdims=True)
    var = jnp.mean(jnp.square(h - mu), axis=-1, keepdims=True)
    return (h - mu) * jax.lax.rsqrt(var + 1e-5) * g + b


# ----------------------------------------------------------------------------
# Pallas kernels
# ----------------------------------------------------------------------------

def _patch_mlp_kernel(x_ref, w1_ref, b1_ref, w2_ref, b2_ref, o_ref):
    # y = silu(x @ W1 + b1) @ W2 + b2 on the concatenated source+target patches.
    h = _silu(_dot(x_ref[...], w1_ref[...]) + b1_ref[...])
    o_ref[...] = _dot(h, w2_ref[...]) + b2_ref[...]


def _mlp4_kernel(x_ref, w1_ref, b1_ref, w2_ref, b2_ref, w3_ref, b3_ref,
                 w4_ref, b4_ref, o_ref):
    # Linear(2,H) -> SiLU -> Linear -> SiLU -> Linear -> SiLU -> Linear.
    # First layer (K=2) as VPU broadcast-FMAs instead of a degenerate MXU pass.
    x = x_ref[...]
    w1 = w1_ref[...]
    h = _silu(x[:, 0:1] * w1[0:1, :] + x[:, 1:2] * w1[1:2, :] + b1_ref[...])
    h = _silu(_dot(h, w2_ref[...]) + b2_ref[...])
    h = _silu(_dot(h, w3_ref[...]) + b3_ref[...])
    o_ref[...] = _dot(h, w4_ref[...]) + b4_ref[...]


def _dual_mlp4_kernel(coord_ref, w1_ref, b1_ref, w2_ref, b2_ref, w3_ref, b3_ref,
                      w4_ref, b4_ref, o_ref):
    # Source and target coordinate embeddings in one launch (weights stacked
    # on a leading axis of 2).  o_ref: (2, N, C).
    coord = coord_ref[...]                       # (N, 2)
    for e in range(2):                           # static unroll
        w1 = w1_ref[e]                           # (2, H) f32
        h = coord[:, 0:1] * w1[0:1, :] + coord[:, 1:2] * w1[1:2, :] + b1_ref[e]
        h = _silu(h)
        h = _silu(_dot(h, w2_ref[e]) + b2_ref[e])
        h = _silu(_dot(h, w3_ref[e]) + b3_ref[e])
        o_ref[e] = _dot(h, w4_ref[e]) + b4_ref[e]


def _attn_stack_kernel(x_ref, g1_ref, bb1_ref, wq_ref, bq_ref, wk_ref, bk_ref,
                       wv_ref, bv_ref, wo_ref, bo_ref, g2_ref, bb2_ref,
                       wm1_ref, bm1_ref, wm2_ref, bm2_ref, o_ref):
    # TODO(synk): AttentionLayer definition was not provided; implemented as a
    # standard pre-LN single-head transformer block (attn + MLP residuals).
    # Grid axis 0 iterates over layers; the token state lives in o_ref (VMEM
    # resident, same block index every step).
    @pl.when(pl.program_id(0) == 0)
    def _():
        o_ref[...] = x_ref[...]

    x = o_ref[...]                               # (B, T, C)
    B, T, C = x.shape

    h = _layernorm(x, g1_ref[...], bb1_ref[...])
    hf = h.reshape(B * T, C)                     # flatten batch for the MXU
    q = (_dot(hf, wq_ref[...]) + bq_ref[...]).reshape(B, T, C)   # scale pre-folded
    k = (_dot(hf, wk_ref[...]) + bk_ref[...]).reshape(B, T, C)
    v = (_dot(hf, wv_ref[...]) + bv_ref[...]).reshape(B, T, C)

    s = jnp.einsum('bnd,bmd->bnm', q, k, preferred_element_type=jnp.float32)
    p = _softmax_last(s)
    a = jnp.einsum('bnm,bmd->bnd', p, v, preferred_element_type=jnp.float32)
    a = (_dot(a.reshape(B * T, C), wo_ref[...]) + bo_ref[...]).reshape(B, T, C)
    x = x + a

    h2 = _layernorm(x, g2_ref[...], bb2_ref[...]).reshape(B * T, C)
    hh = _silu(_dot(h2, wm1_ref[...]) + bm1_ref[...])
    y = (_dot(hh, wm2_ref[...]) + bm2_ref[...]).reshape(B, T, C)
    o_ref[...] = x + y


def _context_kernel(x_ref, skip_ref, we1_ref, be1_ref, we2_ref, be2_ref,
                    aw_ref, ab_ref, wp1_ref, bp1_ref, wp2_ref, bp2_ref, o_ref):
    # Fused ContextEncoding (binarize=False): skip + expand, AttentionSum,
    # x + process(x).
    B, T, C = x_ref.shape
    ctx = skip_ref.shape[-1]
    xf = x_ref[...].reshape(B * T, C)
    h = _silu(_dot(xf, we1_ref[...]) + be1_ref[...])
    y = (_dot(h, we2_ref[...]) + be2_ref[...]).reshape(B, T, ctx)
    y = skip_ref[...] + y
    # TODO(synk): AttentionSum definition was not provided; implemented as
    # Linear(ctx, 1) scores, softmax over tokens, weighted sum over tokens.
    s = jnp.sum(y * aw_ref[...], axis=-1) + ab_ref[...]       # (B, T)
    p = _softmax_last(s)                                      # (B, T)
    agg = jnp.sum(p[:, :, None] * y, axis=1)                  # (B, ctx)
    hp = _silu(_dot(agg, wp1_ref[...]) + bp1_ref[...])
    o_ref[...] = agg + _dot(hp, wp2_ref[...]) + bp2_ref[...]


# ----------------------------------------------------------------------------
# pallas_call wrappers
# ----------------------------------------------------------------------------

def _vmem_call(kernel, out_shape, *args):
    return pl.pallas_call(
        kernel,
        out_shape=out_shape,
        in_specs=[pl.BlockSpec(memory_space=pltpu.MemorySpace.VMEM)
                  for _ in args],
        out_specs=pl.BlockSpec(memory_space=pltpu.MemorySpace.VMEM),
    )(*args)


def patch_mlp(x, params4):
    out_dim = params4[-1].shape[-1]
    return _vmem_call(_patch_mlp_kernel,
                      jax.ShapeDtypeStruct((x.shape[0], out_dim), jnp.float32),
                      x, *params4)


def mlp4(x, params8):
    out_dim = params8[-1].shape[-1]
    return _vmem_call(_mlp4_kernel,
                      jax.ShapeDtypeStruct((x.shape[0], out_dim), jnp.float32),
                      x, *params8)


def dual_mlp4(coord, stacked8):
    n = coord.shape[0]
    out_dim = stacked8[-1].shape[-1]
    return _vmem_call(_dual_mlp4_kernel,
                      jax.ShapeDtypeStruct((2, n, out_dim), jnp.float32),
                      coord, *stacked8)


def attn_stack(x, stacked):
    B, T, C = x.shape
    L = stacked['ln1_g'].shape[0]
    weights = [stacked[n] for n in LAYER_NAMES]
    w_specs = [pl.BlockSpec((None,) + w.shape[1:], lambda l: (l, 0, 0))
               for w in weights]
    full_spec = pl.BlockSpec((B, T, C), lambda l: (0, 0, 0))
    return pl.pallas_call(
        _attn_stack_kernel,
        out_shape=jax.ShapeDtypeStruct((B, T, C), jnp.float32),
        grid=(L,),
        in_specs=[full_spec] + w_specs,
        out_specs=full_spec,
        compiler_params=pltpu.CompilerParams(
            dimension_semantics=("arbitrary",)),
    )(x, *weights)


def context_encoding(x, skip, ctx_params):
    B = x.shape[0]
    ctx = skip.shape[-1]
    we1, be1, we2, be2 = ctx_params['expand']
    wp1, bp1, wp2, bp2 = ctx_params['process']
    return _vmem_call(_context_kernel,
                      jax.ShapeDtypeStruct((B, ctx), jnp.float32),
                      x, skip, we1, be1, we2, be2,
                      ctx_params['agg_w'], ctx_params['agg_b'],
                      wp1, bp1, wp2, bp2)


# ----------------------------------------------------------------------------
# Parameter initialization (deterministic, PyTorch-Linear-style uniform)
# ----------------------------------------------------------------------------

def init_params(key, in_channels, latent_channels, context_size, num_layers):
    C = latent_channels
    ctx = context_size
    hid = 2 * latent_channels            # embedd_hidden
    key_iter = iter(jax.random.split(key, 256))

    def lin(fi, fo, wdtype=jnp.float32):
        kw, kb = jax.random.split(next(key_iter))
        bound = 1.0 / math.sqrt(fi)
        w = jax.random.uniform(kw, (fi, fo), jnp.float32, -bound, bound)
        b = jax.random.uniform(kb, (1, fo), jnp.float32, -bound, bound)
        return w.astype(wdtype), b

    def mlp4_params(out_dim):
        # First layer kept f32 (used as VPU FMAs), the rest feed the MXU.
        return (lin(2, hid)
                + lin(hid, hid, MATMUL_DTYPE)
                + lin(hid, hid, MATMUL_DTYPE)
                + lin(hid, out_dim, MATMUL_DTYPE))

    params = {}
    # TODO(synk): MemoryEfficientPatchDownScale not provided; implemented as
    # pixel-unshuffle(16) + per-patch bottleneck MLP (expand_ratio=4).
    params['to_patches'] = (lin(in_channels * 256, 4 * C, MATMUL_DTYPE)
                            + lin(4 * C, C, MATMUL_DTYPE))

    src_emb = mlp4_params(C)
    tgt_emb = mlp4_params(C)
    params['coord_embedding'] = tuple(jnp.stack([s, t], axis=0)
                                      for s, t in zip(src_emb, tgt_emb))
    params['motion_embedding'] = mlp4_params(ctx)

    # Attention stack, stacked along a leading layer axis.
    scale = 1.0 / math.sqrt(C)           # folded into the q projection
    acc = {n: [] for n in LAYER_NAMES}
    for _ in range(num_layers):
        wq, bq = lin(C, C)
        wk, bk = lin(C, C)
        wv, bv = lin(C, C)
        wo, bo = lin(C, C)
        wm1, bm1 = lin(C, 4 * C)
        wm2, bm2 = lin(4 * C, C)
        acc['ln1_g'].append(jnp.ones((1, C), jnp.float32))
        acc['ln1_b'].append(jnp.zeros((1, C), jnp.float32))
        acc['wq'].append((wq * scale).astype(MATMUL_DTYPE))
        acc['bq'].append(bq * scale)
        acc['wk'].append(wk.astype(MATMUL_DTYPE)); acc['bk'].append(bk)
        acc['wv'].append(wv.astype(MATMUL_DTYPE)); acc['bv'].append(bv)
        acc['wo'].append(wo.astype(MATMUL_DTYPE)); acc['bo'].append(bo)
        acc['ln2_g'].append(jnp.ones((1, C), jnp.float32))
        acc['ln2_b'].append(jnp.zeros((1, C), jnp.float32))
        acc['wm1'].append(wm1.astype(MATMUL_DTYPE)); acc['bm1'].append(bm1)
        acc['wm2'].append(wm2.astype(MATMUL_DTYPE)); acc['bm2'].append(bm2)
    params['layers'] = {n: jnp.stack(v, axis=0) for n, v in acc.items()}

    # ContextEncoding(latent_channels, context_size, binarize=False)
    aw, ab = lin(ctx, 1)
    params['ctx'] = {
        'expand': lin(C, 4 * ctx, MATMUL_DTYPE) + lin(4 * ctx, ctx, MATMUL_DTYPE),
        'agg_w': aw.reshape(1, ctx),
        'agg_b': ab,                                  # (1, 1)
        'process': lin(ctx, 4 * ctx, MATMUL_DTYPE) + lin(4 * ctx, ctx, MATMUL_DTYPE),
    }
    params['final'] = lin(ctx, 6)                     # tiny: stays in plain JAX
    return params


# ----------------------------------------------------------------------------
# Plain-JAX glue
# ----------------------------------------------------------------------------

def _pixel_unshuffle(x, r=16):
    # (B, C, H, W) -> (B, Hp*Wp, C*r*r)
    B, C, H, W = x.shape
    Hp, Wp = H // r, W // r
    x = x.reshape(B, C, Hp, r, Wp, r).transpose(0, 2, 4, 1, 3, 5)
    return x.reshape(B, Hp * Wp, C * r * r)


def _affine_grid(params6, B, Hp, Wp):
    # F.affine_grid with align_corners=False, flattened '(b h w) c'
    ident = jnp.array([[1.0, 0.0, 0.0], [0.0, 1.0, 0.0]], jnp.float32)
    theta = ident[None] + params6.reshape(B, 2, 3)
    xs = (2.0 * jnp.arange(Wp, dtype=jnp.float32) + 1.0) / Wp - 1.0
    ys = (2.0 * jnp.arange(Hp, dtype=jnp.float32) + 1.0) / Hp - 1.0
    gy, gx = jnp.meshgrid(ys, xs, indexing='ij')
    base = jnp.stack([gx, gy, jnp.ones_like(gx)], axis=-1)      # (Hp, Wp, 3)
    grid = jnp.einsum('hwk,bck->bhwc', base, theta)             # (B, Hp, Wp, 2)
    return grid.reshape(B * Hp * Wp, 2)


# ----------------------------------------------------------------------------
# Forward pass
# ----------------------------------------------------------------------------

def motion_context_encoder_forward(params, source, target, source_uncertainty,
                                    target_uncertainty, delta_t, *,
                                    latent_channels, context_size,
                                    uncertainty_threshold):
    B, Cin, H, W = source.shape
    Hp, Wp = H // 16, W // 16
    N = Hp * Wp

    def full_branch():
        # coordinate grid (N, 2), channel order (x, y) as in compute_embedding
        gy, gx = jnp.meshgrid(jnp.linspace(-1.0, 1.0, Hp),
                              jnp.linspace(-1.0, 1.0, Wp), indexing='ij')
        coord = jnp.stack([gx.reshape(-1), gy.reshape(-1)],
                          axis=-1).astype(jnp.float32)

        embs = dual_mlp4(coord, params['coord_embedding'])      # (2, N, C)
        src_emb, tgt_emb = embs[0], embs[1]

        thr = uncertainty_threshold
        src = source * (source_uncertainty < thr).astype(jnp.float32)
        tgt = target * (target_uncertainty < thr).astype(jnp.float32)

        # one patch-MLP launch on the concatenated source+target patch matrix
        ps = _pixel_unshuffle(src)                              # (B, N, Cin*256)
        pt = _pixel_unshuffle(tgt)
        patches = jnp.concatenate([ps[None], pt[None]],
                                  axis=0).reshape(2 * B * N, Cin * 256)
        tok = patch_mlp(patches, params['to_patches'])          # (2*B*N, C)
        tok = tok.reshape(2, B, N, latent_channels)
        src_tok = tok[0] + src_emb[None]
        tgt_tok = tok[1] + tgt_emb[None]
        x = jnp.concatenate([src_tok, tgt_tok], axis=1)         # (B, 2N, C)

        x = attn_stack(x, params['layers'])                     # (B, 2N, C)

        c2 = context_size // latent_channels
        skip = jnp.repeat(x, c2, axis=-1)                       # 'b n c -> b n (c c2)'
        ctx_out = context_encoding(x, skip, params['ctx'])      # (B, context)

        t_mask = (jnp.abs(delta_t) > 0.5).astype(jnp.float32)   # (B, 1)
        wf, bf = params['final']
        return (ctx_out @ wf + bf) * t_mask                     # (B, 6)

    motion_context = jax.lax.cond(
        jnp.max(jnp.abs(delta_t)) < 0.5,
        lambda: jnp.zeros((B, 6), jnp.float32),
        full_branch)

    grid_pts = _affine_grid(motion_context, B, Hp, Wp)          # (B*Hp*Wp, 2)
    me = mlp4(grid_pts, params['motion_embedding'])             # (B*Hp*Wp, context)
    motion_embedding = me.reshape(B, Hp, Wp, context_size).transpose(0, 3, 1, 2)
    return motion_embedding, motion_context


# ----------------------------------------------------------------------------
# Demo
# ----------------------------------------------------------------------------

if __name__ == "__main__":
    B, Cin, H, W = 2, 4, 32, 32
    latent_channels, context_size, num_layers = 32, 64, 2
    uncertainty_threshold = 0.5

    root = jax.random.PRNGKey(0)
    kp, k1, k2, k3, k4 = jax.random.split(root, 5)
    params = init_params(kp, Cin, latent_channels, context_size, num_layers)

    source = jax.random.normal(k1, (B, Cin, H, W), jnp.float32)
    target = jax.random.normal(k2, (B, Cin, H, W), jnp.float32)
    source_uncertainty = jax.random.uniform(k3, (B, 1, H, W), jnp.float32)
    target_uncertainty = jax.random.uniform(k4, (B, 1, H, W), jnp.float32)
    delta_t = jnp.array([[1.0], [0.7]], jnp.float32)      # > 0.5 -> full path
    delta_t_small = jnp.array([[0.1], [0.2]], jnp.float32)  # < 0.5 -> zero path

    forward = jax.jit(functools.partial(
        motion_context_encoder_forward,
        latent_channels=latent_channels, context_size=context_size,
        uncertainty_threshold=uncertainty_threshold))

    motion_embedding, motion_context = forward(
        params, source, target, source_uncertainty, target_uncertainty, delta_t)
    jax.block_until_ready((motion_embedding, motion_context))
    assert motion_embedding.shape == (B, context_size, H // 16, W // 16)
    assert motion_context.shape == (B, 6)

    # exercise the lax.cond zero branch as well
    me0, mc0 = forward(params, source, target, source_uncertainty,
                       target_uncertainty, delta_t_small)
    jax.block_until_ready((me0, mc0))
    assert me0.shape == (B, context_size, H // 16, W // 16)
    assert float(jnp.max(jnp.abs(mc0))) == 0.0

    print("KERNEL_OK")
</pallas_src>

<mosaic_0001>
module attributes {stable_mosaic.version = 11 : i64} {
  func.func @_patch_mlp_kernel(%arg0: memref<16x1024xf32, #tpu.memory_space<vmem>>, %arg1: memref<1024x128xbf16, #tpu.memory_space<vmem>>, %arg2: memref<1x128xf32, #tpu.memory_space<vmem>>, %arg3: memref<128x32xbf16, #tpu.memory_space<vmem>>, %arg4: memref<1x32xf32, #tpu.memory_space<vmem>>, %arg5: memref<16x32xf32, #tpu.memory_space<vmem>>) attributes {dimension_semantics = [], scalar_prefetch = 0 : i64, scratch_operands = 0 : i64, tpu.core_type = #tpu.core_type<tc>} {
    %c0 = arith.constant 0 : index
    %c0_0 = arith.constant 0 : index
    %0 = vector.load %arg0[%c0, %c0_0] : memref<16x1024xf32, #tpu.memory_space<vmem>>, vector<16x1024xf32>
    %c0_1 = arith.constant 0 : index
    %c0_2 = arith.constant 0 : index
    %1 = vector.load %arg1[%c0_1, %c0_2] : memref<1024x128xbf16, #tpu.memory_space<vmem>>, vector<1024x128xbf16>
    %2 = arith.truncf %0 : vector<16x1024xf32> to vector<16x1024xbf16>
    %cst = arith.constant dense<0.000000e+00> : vector<16x128xf32>
    %3 = tpu.matmul %2, %1, %cst {dimension_numbers = #tpu.dot_dimension_numbers<[1], [0], [0], [1], [0, 0, 1, 1], [], []>} : vector<16x1024xbf16>, vector<1024x128xbf16>, vector<16x128xf32> -> vector<16x128xf32>
    %c0_3 = arith.constant 0 : index
    %c0_4 = arith.constant 0 : index
    %4 = vector.load %arg2[%c0_3, %c0_4] : memref<1x128xf32, #tpu.memory_space<vmem>>, vector<1x128xf32>
    %5 = vector.broadcast %4 : vector<1x128xf32> to vector<16x128xf32>
    %6 = arith.addf %3, %5 : vector<16x128xf32>
    %7 = arith.negf %6 : vector<16x128xf32>
    %8 = math.exp %7 : vector<16x128xf32>
    %cst_5 = arith.constant 1.000000e+00 : f32
    %9 = vector.broadcast %cst_5 : f32 to vector<16x128xf32>
    %10 = arith.addf %9, %8 : vector<16x128xf32>
    %11 = arith.divf %9, %10 : vector<16x128xf32>
    %12 = arith.mulf %6, %11 : vector<16x128xf32>
    %c0_6 = arith.constant 0 : index
    %c0_7 = arith.constant 0 : index
    %13 = vector.load %arg3[%c0_6, %c0_7] : memref<128x32xbf16, #tpu.memory_space<vmem>>, vector<128x32xbf16>
    %14 = arith.truncf %12 : vector<16x128xf32> to vector<16x128xbf16>
    %cst_8 = arith.constant dense<0.000000e+00> : vector<16x32xf32>
    %15 = tpu.matmul %14, %13, %cst_8 {dimension_numbers = #tpu.dot_dimension_numbers<[1], [0], [0], [1], [0, 0, 1, 1], [], []>} : vector<16x128xbf16>, vector<128x32xbf16>, vector<16x32xf32> -> vector<16x32xf32>
    %c0_9 = arith.constant 0 : index
    %c0_10 = arith.constant 0 : index
    %16 = vector.load %arg4[%c0_9, %c0_10] : memref<1x32xf32, #tpu.memory_space<vmem>>, vector<1x32xf32>
    %17 = vector.broadcast %16 : vector<1x32xf32> to vector<16x32xf32>
    %18 = arith.addf %15, %17 : vector<16x32xf32>
    %c0_11 = arith.constant 0 : index
    %c0_12 = arith.constant 0 : index
    %19 = vector.load %arg5[%c0_11, %c0_12] : memref<16x32xf32, #tpu.memory_space<vmem>>, vector<16x32xf32>
    tpu.vector_store %arg5[%c0_11, %c0_12], %18 {strides = array<i32>} : memref<16x32xf32, #tpu.memory_space<vmem>>, vector<16x32xf32>,
    return
  }
}

module attributes {stable_mosaic.version = 11 : i64} {
  func.func @_dual_mlp4_kernel(%arg0: memref<4x2xf32, #tpu.memory_space<vmem>>, %arg1: memref<2x2x64xf32, #tpu.memory_space<vmem>>, %arg2: memref<2x1x64xf32, #tpu.memory_space<vmem>>, %arg3: memref<2x64x64xbf16, #tpu.memory_space<vmem>>, %arg4: memref<2x1x64xf32, #tpu.memory_space<vmem>>, %arg5: memref<2x64x64xbf16, #tpu.memory_space<vmem>>, %arg6: memref<2x1x64xf32, #tpu.memory_space<vmem>>, %arg7: memref<2x64x32xbf16, #tpu.memory_space<vmem>>, %arg8: memref<2x1x32xf32, #tpu.memory_space<vmem>>, %arg9: memref<2x4x32xf32, #tpu.memory_space<vmem>>) attributes {dimension_semantics = [], scalar_prefetch = 0 : i64, scratch_operands = 0 : i64, tpu.core_type = #tpu.core_type<tc>} {
    %c0 = arith.constant 0 : index
    %c0_0 = arith.constant 0 : index
    %0 = vector.load %arg0[%c0, %c0_0] : memref<4x2xf32, #tpu.memory_space<vmem>>, vector<4x2xf32>
    %c0_1 = arith.constant 0 : index
    %c0_2 = arith.constant 0 : index
    %c0_3 = arith.constant 0 : index
    %1 = vector.load %arg1[%c0_1, %c0_2, %c0_3] : memref<2x2x64xf32, #tpu.memory_space<vmem>>, vector<1x2x64xf32>
    %2 = vector.shape_cast %1 : vector<1x2x64xf32> to vector<2x64xf32>
    %3 = vector.extract_strided_slice %0 {offsets = [0, 0], sizes = [4, 1], strides = [1, 1]} : vector<4x2xf32> to vector<4x1xf32>
    %4 = vector.extract_strided_slice %2 {offsets = [0, 0], sizes = [1, 64], strides = [1, 1]} : vector<2x64xf32> to vector<1x64xf32>
    %5 = vector.broadcast %3 : vector<4x1xf32> to vector<4x64xf32>
    %6 = vector.broadcast %4 : vector<1x64xf32> to vector<4x64xf32>
    %7 = arith.mulf %5, %6 : vector<4x64xf32>
    %8 = vector.extract_strided_slice %0 {offsets = [0, 1], sizes = [4, 1], strides = [1, 1]} : vector<4x2xf32> to vector<4x1xf32>
    %9 = vector.extract_strided_slice %2 {offsets = [1, 0], sizes = [1, 64], strides = [1, 1]} : vector<2x64xf32> to vector<1x64xf32>
    %10 = vector.broadcast %8 : vector<4x1xf32> to vector<4x64xf32>
    %11 = vector.broadcast %9 : vector<1x64xf32> to vector<4x64xf32>
    %12 = arith.mulf %10, %11 : vector<4x64xf32>
    %13 = arith.addf %7, %12 : vector<4x64xf32>
    %c0_4 = arith.constant 0 : index
    %c0_5 = arith.constant 0 : index
    %c0_6 = arith.constant 0 : index
    %14 = vector.load %arg2[%c0_4, %c0_5, %c0_6] : memref<2x1x64xf32, #tpu.memory_space<vmem>>, vector<1x1x64xf32>
    %15 = vector.shape_cast %14 : vector<1x1x64xf32> to vector<1x64xf32>
    %16 = vector.broadcast %15 : vector<1x64xf32> to vector<4x64xf32>
    %17 = arith.addf %13, %16 : vector<4x64xf32>
    %18 = arith.negf %17 : vector<4x64xf32>
    %19 = math.exp %18 : vector<4x64xf32>
    %cst = arith.constant 1.000000e+00 : f32
    %20 = vector.broadcast %cst : f32 to vector<4x64xf32>
    %21 = arith.addf %20, %19 : vector<4x64xf32>
    %22 = arith.divf %20, %21 : vector<4x64xf32>
    %23 = arith.mulf %17, %22 : vector<4x64xf32>
    %c0_7 = arith.constant 0 : index
    %c0_8 = arith.constant 0 : index
    %c0_9 = arith.constant 0 : index
    %24 = vector.load %arg3[%c0_7, %c0_8, %c0_9] : memref<2x64x64xbf16, #tpu.memory_space<vmem>>, vector<1x64x64xbf16>
    %25 = vector.shape_cast %24 : vector<1x64x64xbf16> to vector<64x64xbf16>
    %26 = arith.truncf %23 : vector<4x64xf32> to vector<4x64xbf16>
    %cst_10 = arith.constant dense<0.000000e+00> : vector<4x64xf32>
    %27 = tpu.matmul %26, %25, %cst_10 {dimension_numbers = #tpu.dot_dimension_numbers<[1], [0], [0], [1], [0, 0, 1, 1], [], []>} : vector<4x64xbf16>, vector<64x64xbf16>, vector<4x64xf32> -> vector<4x64xf32>
    %c0_11 = arith.constant 0 : index
    %c0_12 = arith.constant 0 : index
    %c0_13 = arith.constant 0 : index
    %28 = vector.load %arg4[%c0_11, %c0_12, %c0_13] : memref<2x1x64xf32, #tpu.memory_space<vmem>>, vector<1x1x64xf32>
    %29 = vector.shape_cast %28 : vector<1x1x64xf32> to vector<1x64xf32>
    %30 = vector.broadcast %29 : vector<1x64xf32> to vector<4x64xf32>
    %31 = arith.addf %27, %30 : vector<4x64xf32>
    %32 = arith.negf %31 : vector<4x64xf32>
    %33 = math.exp %32 : vector<4x64xf32>
    %cst_14 = arith.constant 1.000000e+00 : f32
    %34 = vector.broadcast %cst_14 : f32 to vector<4x64xf32>
    %35 = arith.addf %34, %33 : vector<4x64xf32>
    %36 = arith.divf %34, %35 : vector<4x64xf32>
    %37 = arith.mulf %31, %36 : vector<4x64xf32>
    %c0_15 = arith.constant 0 : index
    %c0_16 = arith.constant 0 : index
    %c0_17 = arith.constant 0 : index
    %38 = vector.load %arg5[%c0_15, %c0_16, %c0_17] : memref<2x64x64xbf16, #tpu.memory_space<vmem>>, vector<1x64x64xbf16>
    %39 = vector.shape_cast %38 : vector<1x64x64xbf16> to vector<64x64xbf16>
    %40 = arith.truncf %37 : vector<4x64xf32> to vector<4x64xbf16>
    %cst_18 = arith.constant dense<0.000000e+00> : vector<4x64xf32>
    %41 = tpu.matmul %40, %39, %cst_18 {dimension_numbers = #tpu.dot_dimension_numbers<[1], [0], [0], [1], [0, 0, 1, 1], [], []>} : vector<4x64xbf16>, vector<64x64xbf16>, vector<4x64xf32> -> vector<4x64xf32>
    %c0_19 = arith.constant 0 : index
    %c0_20 = arith.constant 0 : index
    %c0_21 = arith.constant 0 : index
    %42 = vector.load %arg6[%c0_19, %c0_20, %c0_21] : memref<2x1x64xf32, #tpu.memory_space<vmem>>, vector<1x1x64xf32>
    %43 = vector.shape_cast %42 : vector<1x1x64xf32> to vector<1x64xf32>
    %44 = vector.broadcast %43 : vector<1x64xf32> to vector<4x64xf32>
    %45 = arith.addf %41, %44 : vector<4x64xf32>
    %46 = arith.negf %45 : vector<4x64xf32>
    %47 = math.exp %46 : vector<4x64xf32>
    %cst_22 = arith.constant 1.000000e+00 : f32
    %48 = vector.broadcast %cst_22 : f32 to vector<4x64xf32>
    %49 = arith.addf %48, %47 : vector<4x64xf32>
    %50 = arith.divf %48, %49 : vector<4x64xf32>
    %51 = arith.mulf %45, %50 : vector<4x64xf32>
    %c0_23 = arith.constant 0 : index
    %c0_24 = arith.constant 0 : index
    %c0_25 = arith.constant 0 : index
    %52 = vector.load %arg7[%c0_23, %c0_24, %c0_25] : memref<2x64x32xbf16, #tpu.memory_space<vmem>>, vector<1x64x32xbf16>
    %53 = vector.shape_cast %52 : vector<1x64x32xbf16> to vector<64x32xbf16>
    %54 = arith.truncf %51 : vector<4x64xf32> to vector<4x64xbf16>
    %cst_26 = arith.constant dense<0.000000e+00> : vector<4x32xf32>
    %55 = tpu.matmul %54, %53, %cst_26 {dimension_numbers = #tpu.dot_dimension_numbers<[1], [0], [0], [1], [0, 0, 1, 1], [], []>} : vector<4x64xbf16>, vector<64x32xbf16>, vector<4x32xf32> -> vector<4x32xf32>
    %c0_27 = arith.constant 0 : index
    %c0_28 = arith.constant 0 : index
    %c0_29 = arith.constant 0 : index
    %56 = vector.load %arg8[%c0_27, %c0_28, %c0_29] : memref<2x1x32xf32, #tpu.memory_space<vmem>>, vector<1x1x32xf32>
    %57 = vector.shape_cast %56 : vector<1x1x32xf32> to vector<1x32xf32>
    %58 = vector.broadcast %57 : vector<1x32xf32> to vector<4x32xf32>
    %59 = arith.addf %55, %58 : vector<4x32xf32>
    %c0_30 = arith.constant 0 : index
    %c0_31 = arith.constant 0 : index
    %c0_32 = arith.constant 0 : index
    %60 = vector.load %arg9[%c0_30, %c0_31, %c0_32] : memref<2x4x32xf32, #tpu.memory_space<vmem>>, vector<1x4x32xf32>
    %61 = vector.shape_cast %60 : vector<1x4x32xf32> to vector<4x32xf32>
    %62 = vector.shape_cast %59 : vector<4x32xf32> to vector<1x4x32xf32>
    tpu.vector_store %arg9[%c0_30, %c0_31, %c0_32], %62 {strides = array<i32>} : memref<2x4x32xf32, #tpu.memory_space<vmem>>, vector<1x4x32xf32>,
    %c1 = arith.constant 1 : index
    %c0_33 = arith.constant 0 : index
    %c0_34 = arith.constant 0 : index
    %63 = vector.load %arg1[%c1, %c0_33, %c0_34] : memref<2x2x64xf32, #tpu.memory_space<vmem>>, vector<1x2x64xf32>
    %64 = vector.shape_cast %63 : vector<1x2x64xf32> to vector<2x64xf32>
    %65 = vector.extract_strided_slice %0 {offsets = [0, 0], sizes = [4, 1], strides = [1, 1]} : vector<4x2xf32> to vector<4x1xf32>
    %66 = vector.extract_strided_slice %64 {offsets = [0, 0], sizes = [1, 64], strides = [1, 1]} : vector<2x64xf32> to vector<1x64xf32>
    %67 = vector.broadcast %65 : vector<4x1xf32> to vector<4x64xf32>
    %68 = vector.broadcast %66 : vector<1x64xf32> to vector<4x64xf32>
    %69 = arith.mulf %67, %68 : vector<4x64xf32>
    %70 = vector.extract_strided_slice %0 {offsets = [0, 1], sizes = [4, 1], strides = [1, 1]} : vector<4x2xf32> to vector<4x1xf32>
    %71 = vector.extract_strided_slice %64 {offsets = [1, 0], sizes = [1, 64], strides = [1, 1]} : vector<2x64xf32> to vector<1x64xf32>
    %72 = vector.broadcast %70 : vector<4x1xf32> to vector<4x64xf32>
    %73 = vector.broadcast %71 : vector<1x64xf32> to vector<4x64xf32>
    %74 = arith.mulf %72, %73 : vector<4x64xf32>
    %75 = arith.addf %69, %74 : vector<4x64xf32>
    %c1_35 = arith.constant 1 : index
    %c0_36 = arith.constant 0 : index
    %c0_37 = arith.constant 0 : index
    %76 = vector.load %arg2[%c1_35, %c0_36, %c0_37] : memref<2x1x64xf32, #tpu.memory_space<vmem>>, vector<1x1x64xf32>
    %77 = vector.shape_cast %76 : vector<1x1x64xf32> to vector<1x64xf32>
    %78 = vector.broadcast %77 : vector<1x64xf32> to vector<4x64xf32>
    %79 = arith.addf %75, %78 : vector<4x64xf32>
    %80 = arith.negf %79 : vector<4x64xf32>
    %81 = math.exp %80 : vector<4x64xf32>
    %cst_38 = arith.constant 1.000000e+00 : f32
    %82 = vector.broadcast %cst_38 : f32 to vector<4x64xf32>
    %83 = arith.addf %82, %81 : vector<4x64xf32>
    %84 = arith.divf %82, %83 : vector<4x64xf32>
    %85 = arith.mulf %79, %84 : vector<4x64xf32>
    %c1_39 = arith.constant 1 : index
    %c0_40 = arith.constant 0 : index
    %c0_41 = arith.constant 0 : index
    %86 = vector.load %arg3[%c1_39, %c0_40, %c0_41] : memref<2x64x64xbf16, #tpu.memory_space<vmem>>, vector<1x64x64xbf16>
    %87 = vector.shape_cast %86 : vector<1x64x64xbf16> to vector<64x64xbf16>
    %88 = arith.truncf %85 : vector<4x64xf32> to vector<4x64xbf16>
    %cst_42 = arith.constant dense<0.000000e+00> : vector<4x64xf32>
    %89 = tpu.matmul %88, %87, %cst_42 {dimension_numbers = #tpu.dot_dimension_numbers<[1], [0], [0], [1], [0, 0, 1, 1], [], []>} : vector<4x64xbf16>, vector<64x64xbf16>, vector<4x64xf32> -> vector<4x64xf32>
    %c1_43 = arith.constant 1 : index
    %c0_44 = arith.constant 0 : index
    %c0_45 = arith.constant 0 : index
    %90 = vector.load %arg4[%c1_43, %c0_44, %c0_45] : memref<2x1x64xf32, #tpu.memory_space<vmem>>, vector<1x1x64xf32>
    %91 = vector.shape_cast %90 : vector<1x1x64xf32> to vector<1x64xf32>
    %92 = vector.broadcast %91 : vector<1x64xf32> to vector<4x64xf32>
    %93 = arith.addf %89, %92 : vector<4x64xf32>
    %94 = arith.negf %93 : vector<4x64xf32>
    %95 = math.exp %94 : vector<4x64xf32>
    %cst_46 = arith.constant 1.000000e+00 : f32
    %96 = vector.broadcast %cst_46 : f32 to vector<4x64xf32>
    %97 = arith.addf %96, %95 : vector<4x64xf32>
    %98 = arith.divf %96, %97 : vector<4x64xf32>
    %99 = arith.mulf %93, %98 : vector<4x64xf32>
    %c1_47 = arith.constant 1 : index
    %c0_48 = arith.constant 0 : index
    %c0_49 = arith.constant 0 : index
    %100 = vector.load %arg5[%c1_47, %c0_48, %c0_49] : memref<2x64x64xbf16, #tpu.memory_space<vmem>>, vector<1x64x64xbf16>
    %101 = vector.shape_cast %100 : vector<1x64x64xbf16> to vector<64x64xbf16>
    %102 = arith.truncf %99 : vector<4x64xf32> to vector<4x64xbf16>
    %cst_50 = arith.constant dense<0.000000e+00> : vector<4x64xf32>
    %103 = tpu.matmul %102, %101, %cst_50 {dimension_numbers = #tpu.dot_dimension_numbers<[1], [0], [0], [1], [0, 0, 1, 1], [], []>} : vector<4x64xbf16>, vector<64x64xbf16>, vector<4x64xf32> -> vector<4x64xf32>
    %c1_51 = arith.constant 1 : index
    %c0_52 = arith.constant 0 : index
    %c0_53 = arith.constant 0 : index
    %104 = vector.load %arg6[%c1_51, %c0_52, %c0_53] : memref<2x1x64xf32, #tpu.memory_space<vmem>>, vector<1x1x64xf32>
    %105 = vector.shape_cast %104 : vector<1x1x64xf32> to vector<1x64xf32>
    %106 = vector.broadcast %105 : vector<1x64xf32> to vector<4x64xf32>
    %107 = arith.addf %103, %106 : vector<4x64xf32>
    %108 = arith.negf %107 : vector<4x64xf32>
    %109 = math.exp %108 : vector<4x64xf32>
    %cst_54 = arith.constant 1.000000e+00 : f32
    %110 = vector.broadcast %cst_54 : f32 to vector<4x64xf32>
    %111 = arith.addf %110, %109 : vector<4x64xf32>
    %112 = arith.divf %110, %111 : vector<4x64xf32>
    %113 = arith.mulf %107, %112 : vector<4x64xf32>
    %c1_55 = arith.constant 1 : index
    %c0_56 = arith.constant 0 : index
    %c0_57 = arith.constant 0 : index
    %114 = vector.load %arg7[%c1_55, %c0_56, %c0_57] : memref<2x64x32xbf16, #tpu.memory_space<vmem>>, vector<1x64x32xbf16>
    %115 = vector.shape_cast %114 : vector<1x64x32xbf16> to vector<64x32xbf16>
    %116 = arith.truncf %113 : vector<4x64xf32> to vector<4x64xbf16>
    %cst_58 = arith.constant dense<0.000000e+00> : vector<4x32xf32>
    %117 = tpu.matmul %116, %115, %cst_58 {dimension_numbers = #tpu.dot_dimension_numbers<[1], [0], [0], [1], [0, 0, 1, 1], [], []>} : vector<4x64xbf16>, vector<64x32xbf16>, vector<4x32xf32> -> vector<4x32xf32>
    %c1_59 = arith.constant 1 : index
    %c0_60 = arith.constant 0 : index
    %c0_61 = arith.constant 0 : index
    %118 = vector.load %arg8[%c1_59, %c0_60, %c0_61] : memref<2x1x32xf32, #tpu.memory_space<vmem>>, vector<1x1x32xf32>
    %119 = vector.shape_cast %118 : vector<1x1x32xf32> to vector<1x32xf32>
    %120 = vector.broadcast %119 : vector<1x32xf32> to vector<4x32xf32>
    %121 = arith.addf %117, %120 : vector<4x32xf32>
    %c1_62 = arith.constant 1 : index
    %c0_63 = arith.constant 0 : index
    %c0_64 = arith.constant 0 : index
    %122 = vector.load %arg9[%c1_62, %c0_63, %c0_64] : memref<2x4x32xf32, #tpu.memory_space<vmem>>, vector<1x4x32xf32>
    %123 = vector.shape_cast %122 : vector<1x4x32xf32> to vector<4x32xf32>
    %124 = vector.shape_cast %121 : vector<4x32xf32> to vector<1x4x32xf32>
    tpu.vector_store %arg9[%c1_62, %c0_63, %c0_64], %124 {strides = array<i32>} : memref<2x4x32xf32, #tpu.memory_space<vmem>>, vector<1x4x32xf32>,
    return
  }
}

module attributes {stable_mosaic.version = 11 : i64} {
  func.func @_attn_stack_kernel(%arg0: i32, %arg1: memref<2x8x32xf32, #tpu.memory_space<vmem>>, %arg2: memref<1x1x32xf32, #tpu.memory_space<vmem>>, %arg3: memref<1x1x32xf32, #tpu.memory_space<vmem>>, %arg4: memref<1x32x32xbf16, #tpu.memory_space<vmem>>, %arg5: memref<1x1x32xf32, #tpu.memory_space<vmem>>, %arg6: memref<1x32x32xbf16, #tpu.memory_space<vmem>>, %arg7: memref<1x1x32xf32, #tpu.memory_space<vmem>>, %arg8: memref<1x32x32xbf16, #tpu.memory_space<vmem>>, %arg9: memref<1x1x32xf32, #tpu.memory_space<vmem>>, %arg10: memref<1x32x32xbf16, #tpu.memory_space<vmem>>, %arg11: memref<1x1x32xf32, #tpu.memory_space<vmem>>, %arg12: memref<1x1x32xf32, #tpu.memory_space<vmem>>, %arg13: memref<1x1x32xf32, #tpu.memory_space<vmem>>, %arg14: memref<1x32x128xbf16, #tpu.memory_space<vmem>>, %arg15: memref<1x1x128xf32, #tpu.memory_space<vmem>>, %arg16: memref<1x128x32xbf16, #tpu.memory_space<vmem>>, %arg17: memref<1x1x32xf32, #tpu.memory_space<vmem>>, %arg18: memref<2x8x32xf32, #tpu.memory_space<vmem>>) attributes {dimension_semantics = [#tpu.dimension_semantics<arbitrary>], iteration_bounds = array<i64: 2>, scalar_prefetch = 0 : i64, scratch_operands = 0 : i64, tpu.core_type = #tpu.core_type<tc>, window_params = [{pipeline_mode = #tpu.pipeline_mode<synchronous>, transform_indices = @transform_0, window_bounds = array<i64: 2, 8, 32>}, {transform_indices = @transform_1, window_bounds = array<i64: 1, 1, 32>}, {transform_indices = @transform_2, window_bounds = array<i64: 1, 1, 32>}, {transform_indices = @transform_3, window_bounds = array<i64: 1, 32, 32>}, {transform_indices = @transform_4, window_bounds = array<i64: 1, 1, 32>}, {transform_indices = @transform_5, window_bounds = array<i64: 1, 32, 32>}, {transform_indices = @transform_6, window_bounds = array<i64: 1, 1, 32>}, {transform_indices = @transform_7, window_bounds = array<i64: 1, 32, 32>}, {transform_indices = @transform_8, window_bounds = array<i64: 1, 1, 32>}, {transform_indices = @transform_9, window_bounds = array<i64: 1, 32, 32>}, {transform_indices = @transform_10, window_bounds = array<i64: 1, 1, 32>}, {transform_indices = @transform_11, window_bounds = array<i64: 1, 1, 32>}, {transform_indices = @transform_12, window_bounds = array<i64: 1, 1, 32>}, {transform_indices = @transform_13, window_bounds = array<i64: 1, 32, 128>}, {transform_indices = @transform_14, window_bounds = array<i64: 1, 1, 128>}, {transform_indices = @transform_15, window_bounds = array<i64: 1, 128, 32>}, {transform_indices = @transform_16, window_bounds = array<i64: 1, 1, 32>}, {pipeline_mode = #tpu.pipeline_mode<synchronous>, transform_indices = @transform_17, window_bounds = array<i64: 2, 8, 32>}]} {
    %c0_i32 = arith.constant 0 : i32
    %0 = arith.cmpi eq, %arg0, %c0_i32 : i32
    %1 = arith.extui %0 : i1 to i32
    %c0_i32_0 = arith.constant 0 : i32
    %2 = arith.cmpi ne, %1, %c0_i32_0 : i32
    scf.if %2 {
      %c0_74 = arith.constant 0 : index
      %c0_75 = arith.constant 0 : index
      %c0_76 = arith.constant 0 : index
      %137 = vector.load %arg1[%c0_74, %c0_75, %c0_76] : memref<2x8x32xf32, #tpu.memory_space<vmem>>, vector<2x8x32xf32>
      %c0_77 = arith.constant 0 : index
      %c0_78 = arith.constant 0 : index
      %c0_79 = arith.constant 0 : index
      %138 = vector.load %arg18[%c0_77, %c0_78, %c0_79] : memref<2x8x32xf32, #tpu.memory_space<vmem>>, vector<2x8x32xf32>
      tpu.vector_store %arg18[%c0_77, %c0_78, %c0_79], %137 {strides = array<i32>} : memref<2x8x32xf32, #tpu.memory_space<vmem>>, vector<2x8x32xf32>,
    } else {
    }
    %c0 = arith.constant 0 : index
    %c0_1 = arith.constant 0 : index
    %c0_2 = arith.constant 0 : index
    %3 = vector.load %arg18[%c0, %c0_1, %c0_2] : memref<2x8x32xf32, #tpu.memory_space<vmem>>, vector<2x8x32xf32>
    %c0_3 = arith.constant 0 : index
    %c0_4 = arith.constant 0 : index
    %c0_5 = arith.constant 0 : index
    %4 = vector.load %arg2[%c0_3, %c0_4, %c0_5] : memref<1x1x32xf32, #tpu.memory_space<vmem>>, vector<1x1x32xf32>
    %5 = vector.shape_cast %4 : vector<1x1x32xf32> to vector<1x32xf32>
    %c0_6 = arith.constant 0 : index
    %c0_7 = arith.constant 0 : index
    %c0_8 = arith.constant 0 : index
    %6 = vector.load %arg3[%c0_6, %c0_7, %c0_8] : memref<1x1x32xf32, #tpu.memory_space<vmem>>, vector<1x1x32xf32>
    %7 = vector.shape_cast %6 : vector<1x1x32xf32> to vector<1x32xf32>
    %cst = arith.constant dense<0.000000e+00> : vector<2x8xf32>
    %8 = vector.multi_reduction <add>, %3, %cst [2] : vector<2x8x32xf32> to vector<2x8xf32>
    %9 = vector.shape_cast %8 : vector<2x8xf32> to vector<2x8x1xf32>
    %cst_9 = arith.constant 3.200000e+01 : f32
    %10 = vector.broadcast %cst_9 : f32 to vector<2x8x1xf32>
    %11 = arith.divf %9, %10 : vector<2x8x1xf32>
    %12 = vector.broadcast %11 : vector<2x8x1xf32> to vector<2x8x32xf32>
    %13 = arith.subf %3, %12 : vector<2x8x32xf32>
    %14 = arith.mulf %13, %13 : vector<2x8x32xf32>
    %cst_10 = arith.constant dense<0.000000e+00> : vector<2x8xf32>
    %15 = vector.multi_reduction <add>, %14, %cst_10 [2] : vector<2x8x32xf32> to vector<2x8xf32>
    %16 = vector.shape_cast %15 : vector<2x8xf32> to vector<2x8x1xf32>
    %cst_11 = arith.constant 3.200000e+01 : f32
    %17 = vector.broadcast %cst_11 : f32 to vector<2x8x1xf32>
    %18 = arith.divf %16, %17 : vector<2x8x1xf32>
    %19 = vector.broadcast %11 : vector<2x8x1xf32> to vector<2x8x32xf32>
    %20 = arith.subf %3, %19 : vector<2x8x32xf32>
    %cst_12 = arith.constant 9.99999974E-6 : f32
    %21 = vector.broadcast %cst_12 : f32 to vector<2x8x1xf32>
    %22 = arith.addf %18, %21 : vector<2x8x1xf32>
    %23 = math.rsqrt %22 : vector<2x8x1xf32>
    %24 = vector.broadcast %23 : vector<2x8x1xf32> to vector<2x8x32xf32>
    %25 = arith.mulf %20, %24 : vector<2x8x32xf32>
    %26 = vector.shape_cast %5 : vector<1x32xf32> to vector<1x1x32xf32>
    %27 = vector.broadcast %26 : vector<1x1x32xf32> to vector<2x8x32xf32>
    %28 = arith.mulf %25, %27 : vector<2x8x32xf32>
    %29 = vector.shape_cast %7 : vector<1x32xf32> to vector<1x1x32xf32>
    %30 = vector.broadcast %29 : vector<1x1x32xf32> to vector<2x8x32xf32>
    %31 = arith.addf %28, %30 : vector<2x8x32xf32>
    %32 = vector.shape_cast %31 : vector<2x8x32xf32> to vector<16x32xf32>
    %c0_13 = arith.constant 0 : index
    %c0_14 = arith.constant 0 : index
    %c0_15 = arith.constant 0 : index
    %33 = vector.load %arg4[%c0_13, %c0_14, %c0_15] : memref<1x32x32xbf16, #tpu.memory_space<vmem>>, vector<1x32x32xbf16>
    %34 = vector.shape_cast %33 : vector<1x32x32xbf16> to vector<32x32xbf16>
    %35 = arith.truncf %32 : vector<16x32xf32> to vector<16x32xbf16>
    %cst_16 = arith.constant dense<0.000000e+00> : vector<16x32xf32>
    %36 = tpu.matmul %35, %34, %cst_16 {dimension_numbers = #tpu.dot_dimension_numbers<[1], [0], [0], [1], [0, 0, 1, 1], [], []>} : vector<16x32xbf16>, vector<32x32xbf16>, vector<16x32xf32> -> vector<16x32xf32>
    %c0_17 = arith.constant 0 : index
    %c0_18 = arith.constant 0 : index
    %c0_19 = arith.constant 0 : index
    %37 = vector.load %arg5[%c0_17, %c0_18, %c0_19] : memref<1x1x32xf32, #tpu.memory_space<vmem>>, vector<1x1x32xf32>
    %38 = vector.shape_cast %37 : vector<1x1x32xf32> to vector<1x32xf32>
    %39 = vector.broadcast %38 : vector<1x32xf32> to vector<16x32xf32>
    %40 = arith.addf %36, %39 : vector<16x32xf32>
    %41 = vector.shape_cast %40 : vector<16x32xf32> to vector<2x8x32xf32>
    %c0_20 = arith.constant 0 : index
    %c0_21 = arith.constant 0 : index
    %c0_22 = arith.constant 0 : index
    %42 = vector.load %arg6[%c0_20, %c0_21, %c0_22] : memref<1x32x32xbf16, #tpu.memory_space<vmem>>, vector<1x32x32xbf16>
    %43 = vector.shape_cast %42 : vector<1x32x32xbf16> to vector<32x32xbf16>
    %44 = arith.truncf %32 : vector<16x32xf32> to vector<16x32xbf16>
    %cst_23 = arith.constant dense<0.000000e+00> : vector<16x32xf32>
    %45 = tpu.matmul %44, %43, %cst_23 {dimension_numbers = #tpu.dot_dimension_numbers<[1], [0], [0], [1], [0, 0, 1, 1], [], []>} : vector<16x32xbf16>, vector<32x32xbf16>, vector<16x32xf32> -> vector<16x32xf32>
    %c0_24 = arith.constant 0 : index
    %c0_25 = arith.constant 0 : index
    %c0_26 = arith.constant 0 : index
    %46 = vector.load %arg7[%c0_24, %c0_25, %c0_26] : memref<1x1x32xf32, #tpu.memory_space<vmem>>, vector<1x1x32xf32>
    %47 = vector.shape_cast %46 : vector<1x1x32xf32> to vector<1x32xf32>
    %48 = vector.broadcast %47 : vector<1x32xf32> to vector<16x32xf32>
    %49 = arith.addf %45, %48 : vector<16x32xf32>
    %50 = vector.shape_cast %49 : vector<16x32xf32> to vector<2x8x32xf32>
    %c0_27 = arith.constant 0 : index
    %c0_28 = arith.constant 0 : index
    %c0_29 = arith.constant 0 : index
    %51 = vector.load %arg8[%c0_27, %c0_28, %c0_29] : memref<1x32x32xbf16, #tpu.memory_space<vmem>>, vector<1x32x32xbf16>
    %52 = vector.shape_cast %51 : vector<1x32x32xbf16> to vector<32x32xbf16>
    %53 = arith.truncf %32 : vector<16x32xf32> to vector<16x32xbf16>
    %cst_30 = arith.constant dense<0.000000e+00> : vector<16x32xf32>
    %54 = tpu.matmul %53, %52, %cst_30 {dimension_numbers = #tpu.dot_dimension_numbers<[1], [0], [0], [1], [0, 0, 1, 1], [], []>} : vector<16x32xbf16>, vector<32x32xbf16>, vector<16x32xf32> -> vector<16x32xf32>
    %c0_31 = arith.constant 0 : index
    %c0_32 = arith.constant 0 : index
    %c0_33 = arith.constant 0 : index
    %55 = vector.load %arg9[%c0_31, %c0_32, %c0_33] : memref<1x1x32xf32, #tpu.memory_space<vmem>>, vector<1x1x32xf32>
    %56 = vector.shape_cast %55 : vector<1x1x32xf32> to vector<1x32xf32>
    %57 = vector.broadcast %56 : vector<1x32xf32> to vector<16x32xf32>
    %58 = arith.addf %54, %57 : vector<16x32xf32>
    %59 = vector.shape_cast %58 : vector<16x32xf32> to vector<2x8x32xf32>
    "tpu.trace_start"() <{level = 10 : i32, message = "bnd,bmd->bnm"}> : () -> ()
    %cst_34 = arith.constant dense<0.000000e+00> : vector<2x8x8xf32>
    %60 = tpu.matmul %41, %50, %cst_34 {dimension_numbers = #tpu.dot_dimension_numbers<[2], [2], [1], [1], [0, 0, 0, 1, 1, 1], [0], [0]>} : vector<2x8x32xf32>, vector<2x8x32xf32>, vector<2x8x8xf32> -> vector<2x8x8xf32>
    "tpu.trace_stop"() : () -> ()
    %cst_35 = arith.constant dense<0xFF800000> : vector<2x8xf32>
    %61 = vector.multi_reduction <maximumf>, %60, %cst_35 [2] : vector<2x8x8xf32> to vector<2x8xf32>
    %62 = vector.shape_cast %61 : vector<2x8xf32> to vector<2x8x1xf32>
    %63 = vector.broadcast %62 : vector<2x8x1xf32> to vector<2x8x8xf32>
    %64 = arith.subf %60, %63 : vector<2x8x8xf32>
    %65 = math.exp %64 : vector<2x8x8xf32>
    %cst_36 = arith.constant dense<0.000000e+00> : vector<2x8xf32>
    %66 = vector.multi_reduction <add>, %65, %cst_36 [2] : vector<2x8x8xf32> to vector<2x8xf32>
    %67 = vector.shape_cast %66 : vector<2x8xf32> to vector<2x8x1xf32>
    %68 = tpu.reciprocal %67 {approx = true} : vector<2x8x1xf32> -> vector<2x8x1xf32>
    %69 = vector.broadcast %68 : vector<2x8x1xf32> to vector<2x8x8xf32>
    %70 = arith.mulf %65, %69 : vector<2x8x8xf32>
    "tpu.trace_start"() <{level = 10 : i32, message = "bnm,bmd->bnd"}> : () -> ()
    %cst_37 = arith.constant dense<0.000000e+00> : vector<2x8x32xf32>
    %71 = tpu.matmul %70, %59, %cst_37 {dimension_numbers = #tpu.dot_dimension_numbers<[2], [1], [1], [2], [0, 0, 0, 1, 1, 2], [0], [0]>} : vector<2x8x8xf32>, vector<2x8x32xf32>, vector<2x8x32xf32> -> vector<2x8x32xf32>
    "tpu.trace_stop"() : () -> ()
    %72 = vector.shape_cast %71 : vector<2x8x32xf32> to vector<16x32xf32>
    %c0_38 = arith.constant 0 : index
    %c0_39 = arith.constant 0 : index
    %c0_40 = arith.constant 0 : index
    %73 = vector.load %arg10[%c0_38, %c0_39, %c0_40] : memref<1x32x32xbf16, #tpu.memory_space<vmem>>, vector<1x32x32xbf16>
    %74 = vector.shape_cast %73 : vector<1x32x32xbf16> to vector<32x32xbf16>
    %75 = arith.truncf %72 : vector<16x32xf32> to vector<16x32xbf16>
    %cst_41 = arith.constant dense<0.000000e+00> : vector<16x32xf32>
    %76 = tpu.matmul %75, %74, %cst_41 {dimension_numbers = #tpu.dot_dimension_numbers<[1], [0], [0], [1], [0, 0, 1, 1], [], []>} : vector<16x32xbf16>, vector<32x32xbf16>, vector<16x32xf32> -> vector<16x32xf32>
    %c0_42 = arith.constant 0 : index
    %c0_43 = arith.constant 0 : index
    %c0_44 = arith.constant 0 : index
    %77 = vector.load %arg11[%c0_42, %c0_43, %c0_44] : memref<1x1x32xf32, #tpu.memory_space<vmem>>, vector<1x1x32xf32>
    %78 = vector.shape_cast %77 : vector<1x1x32xf32> to vector<1x32xf32>
    %79 = vector.broadcast %78 : vector<1x32xf32> to vector<16x32xf32>
    %80 = arith.addf %76, %79 : vector<16x32xf32>
    %81 = vector.shape_cast %80 : vector<16x32xf32> to vector<2x8x32xf32>
    %82 = arith.addf %3, %81 : vector<2x8x32xf32>
    %c0_45 = arith.constant 0 : index
    %c0_46 = arith.constant 0 : index
    %c0_47 = arith.constant 0 : index
    %83 = vector.load %arg12[%c0_45, %c0_46, %c0_47] : memref<1x1x32xf32, #tpu.memory_space<vmem>>, vector<1x1x32xf32>
    %84 = vector.shape_cast %83 : vector<1x1x32xf32> to vector<1x32xf32>
    %c0_48 = arith.constant 0 : index
    %c0_49 = arith.constant 0 : index
    %c0_50 = arith.constant 0 : index
    %85 = vector.load %arg13[%c0_48, %c0_49, %c0_50] : memref<1x1x32xf32, #tpu.memory_space<vmem>>, vector<1x1x32xf32>
    %86 = vector.shape_cast %85 : vector<1x1x32xf32> to vector<1x32xf32>
    %cst_51 = arith.constant dense<0.000000e+00> : vector<2x8xf32>
    %87 = vector.multi_reduction <add>, %82, %cst_51 [2] : vector<2x8x32xf32> to vector<2x8xf32>
    %88 = vector.shape_cast %87 : vector<2x8xf32> to vector<2x8x1xf32>
    %cst_52 = arith.constant 3.200000e+01 : f32
    %89 = vector.broadcast %cst_52 : f32 to vector<2x8x1xf32>
    %90 = arith.divf %88, %89 : vector<2x8x1xf32>
    %91 = vector.broadcast %90 : vector<2x8x1xf32> to vector<2x8x32xf32>
    %92 = arith.subf %82, %91 : vector<2x8x32xf32>
    %93 = arith.mulf %92, %92 : vector<2x8x32xf32>
    %cst_53 = arith.constant dense<0.000000e+00> : vector<2x8xf32>
    %94 = vector.multi_reduction <add>, %93, %cst_53 [2] : vector<2x8x32xf32> to vector<2x8xf32>
    %95 = vector.shape_cast %94 : vector<2x8xf32> to vector<2x8x1xf32>
    %cst_54 = arith.constant 3.200000e+01 : f32
    %96 = vector.broadcast %cst_54 : f32 to vector<2x8x1xf32>
    %97 = arith.divf %95, %96 : vector<2x8x1xf32>
    %98 = vector.broadcast %90 : vector<2x8x1xf32> to vector<2x8x32xf32>
    %99 = arith.subf %82, %98 : vector<2x8x32xf32>
    %cst_55 = arith.constant 9.99999974E-6 : f32
    %100 = vector.broadcast %cst_55 : f32 to vector<2x8x1xf32>
    %101 = arith.addf %97, %100 : vector<2x8x1xf32>
    %102 = math.rsqrt %101 : vector<2x8x1xf32>
    %103 = vector.broadcast %102 : vector<2x8x1xf32> to vector<2x8x32xf32>
    %104 = arith.mulf %99, %103 : vector<2x8x32xf32>
    %105 = vector.shape_cast %84 : vector<1x32xf32> to vector<1x1x32xf32>
    %106 = vector.broadcast %105 : vector<1x1x32xf32> to vector<2x8x32xf32>
    %107 = arith.mulf %104, %106 : vector<2x8x32xf32>
    %108 = vector.shape_cast %86 : vector<1x32xf32> to vector<1x1x32xf32>
    %109 = vector.broadcast %108 : vector<1x1x32xf32> to vector<2x8x32xf32>
    %110 = arith.addf %107, %109 : vector<2x8x32xf32>
    %111 = vector.shape_cast %110 : vector<2x8x32xf32> to vector<16x32xf32>
    %c0_56 = arith.constant 0 : index
    %c0_57 = arith.constant 0 : index
    %c0_58 = arith.constant 0 : index
    %112 = vector.load %arg14[%c0_56, %c0_57, %c0_58] : memref<1x32x128xbf16, #tpu.memory_space<vmem>>, vector<1x32x128xbf16>
    %113 = vector.shape_cast %112 : vector<1x32x128xbf16> to vector<32x128xbf16>
    %114 = arith.truncf %111 : vector<16x32xf32> to vector<16x32xbf16>
    %cst_59 = arith.constant dense<0.000000e+00> : vector<16x128xf32>
    %115 = tpu.matmul %114, %113, %cst_59 {dimension_numbers = #tpu.dot_dimension_numbers<[1], [0], [0], [1], [0, 0, 1, 1], [], []>} : vector<16x32xbf16>, vector<32x128xbf16>, vector<16x128xf32> -> vector<16x128xf32>
    %c0_60 = arith.constant 0 : index
    %c0_61 = arith.constant 0 : index
    %c0_62 = arith.constant 0 : index
    %116 = vector.load %arg15[%c0_60, %c0_61, %c0_62] : memref<1x1x128xf32, #tpu.memory_space<vmem>>, vector<1x1x128xf32>
    %117 = vector.shape_cast %116 : vector<1x1x128xf32> to vector<1x128xf32>
    %118 = vector.broadcast %117 : vector<1x128xf32> to vector<16x128xf32>
    %119 = arith.addf %115, %118 : vector<16x128xf32>
    %120 = arith.negf %119 : vector<16x128xf32>
    %121 = math.exp %120 : vector<16x128xf32>
    %cst_63 = arith.constant 1.000000e+00 : f32
    %122 = vector.broadcast %cst_63 : f32 to vector<16x128xf32>
    %123 = arith.addf %122, %121 : vector<16x128xf32>
    %124 = arith.divf %122, %123 : vector<16x128xf32>
    %125 = arith.mulf %119, %124 : vector<16x128xf32>
    %c0_64 = arith.constant 0 : index
    %c0_65 = arith.constant 0 : index
    %c0_66 = arith.constant 0 : index
    %126 = vector.load %arg16[%c0_64, %c0_65, %c0_66] : memref<1x128x32xbf16, #tpu.memory_space<vmem>>, vector<1x128x32xbf16>
    %127 = vector.shape_cast %126 : vector<1x128x32xbf16> to vector<128x32xbf16>
    %128 = arith.truncf %125 : vector<16x128xf32> to vector<16x128xbf16>
    %cst_67 = arith.constant dense<0.000000e+00> : vector<16x32xf32>
    %129 = tpu.matmul %128, %127, %cst_67 {dimension_numbers = #tpu.dot_dimension_numbers<[1], [0], [0], [1], [0, 0, 1, 1], [], []>} : vector<16x128xbf16>, vector<128x32xbf16>, vector<16x32xf32> -> vector<16x32xf32>
    %c0_68 = arith.constant 0 : index
    %c0_69 = arith.constant 0 : index
    %c0_70 = arith.constant 0 : index
    %130 = vector.load %arg17[%c0_68, %c0_69, %c0_70] : memref<1x1x32xf32, #tpu.memory_space<vmem>>, vector<1x1x32xf32>
    %131 = vector.shape_cast %130 : vector<1x1x32xf32> to vector<1x32xf32>
    %132 = vector.broadcast %131 : vector<1x32xf32> to vector<16x32xf32>
    %133 = arith.addf %129, %132 : vector<16x32xf32>
    %134 = vector.shape_cast %133 : vector<16x32xf32> to vector<2x8x32xf32>
    %135 = arith.addf %82, %134 : vector<2x8x32xf32>
    %c0_71 = arith.constant 0 : index
    %c0_72 = arith.constant 0 : index
    %c0_73 = arith.constant 0 : index
    %136 = vector.load %arg18[%c0_71, %c0_72, %c0_73] : memref<2x8x32xf32, #tpu.memory_space<vmem>>, vector<2x8x32xf32>
    tpu.vector_store %arg18[%c0_71, %c0_72, %c0_73], %135 {strides = array<i32>} : memref<2x8x32xf32, #tpu.memory_space<vmem>>, vector<2x8x32xf32>,
    return
  }
  func.func @transform_0(%arg0: i32) -> (i32, i32, i32) {
    %c0_i32 = arith.constant 0 : i32
    %c0_i32_0 = arith.constant 0 : i32
    %c0_i32_1 = arith.constant 0 : i32
    %c0_i32_2 = arith.constant 0 : i32
    return %c0_i32, %c0_i32_0, %c0_i32_1 : i32, i32, i32
  }
  func.func @transform_1(%arg0: i32) -> (i32, i32, i32) {
    %c0_i32 = arith.constant 0 : i32
    %c0_i32_0 = arith.constant 0 : i32
    %c0_i32_1 = arith.constant 0 : i32
    return %arg0, %c0_i32, %c0_i32_0 : i32, i32, i32
  }
  func.func @transform_2(%arg0: i32) -> (i32, i32, i32) {
    %c0_i32 = arith.constant 0 : i32
    %c0_i32_0 = arith.constant 0 : i32
    %c0_i32_1 = arith.constant 0 : i32
    return %arg0, %c0_i32, %c0_i32_0 : i32, i32, i32
  }
  func.func @transform_3(%arg0: i32) -> (i32, i32, i32) {
    %c0_i32 = arith.constant 0 : i32
    %c0_i32_0 = arith.constant 0 : i32
    %c0_i32_1 = arith.constant 0 : i32
    return %arg0, %c0_i32, %c0_i32_0 : i32, i32, i32
  }
  func.func @transform_4(%arg0: i32) -> (i32, i32, i32) {
    %c0_i32 = arith.constant 0 : i32
    %c0_i32_0 = arith.constant 0 : i32
    %c0_i32_1 = arith.constant 0 : i32
    return %arg0, %c0_i32, %c0_i32_0 : i32, i32, i32
  }
  func.func @transform_5(%arg0: i32) -> (i32, i32, i32) {
    %c0_i32 = arith.constant 0 : i32
    %c0_i32_0 = arith.constant 0 : i32
    %c0_i32_1 = arith.constant 0 : i32
    return %arg0, %c0_i32, %c0_i32_0 : i32, i32, i32
  }
  func.func @transform_6(%arg0: i32) -> (i32, i32, i32) {
    %c0_i32 = arith.constant 0 : i32
    %c0_i32_0 = arith.constant 0 : i32
    %c0_i32_1 = arith.constant 0 : i32
    return %arg0, %c0_i32, %c0_i32_0 : i32, i32, i32
  }
  func.func @transform_7(%arg0: i32) -> (i32, i32, i32) {
    %c0_i32 = arith.constant 0 : i32
    %c0_i32_0 = arith.constant 0 : i32
    %c0_i32_1 = arith.constant 0 : i32
    return %arg0, %c0_i32, %c0_i32_0 : i32, i32, i32
  }
  func.func @transform_8(%arg0: i32) -> (i32, i32, i32) {
    %c0_i32 = arith.constant 0 : i32
    %c0_i32_0 = arith.constant 0 : i32
    %c0_i32_1 = arith.constant 0 : i32
    return %arg0, %c0_i32, %c0_i32_0 : i32, i32, i32
  }
  func.func @transform_9(%arg0: i32) -> (i32, i32, i32) {
    %c0_i32 = arith.constant 0 : i32
    %c0_i32_0 = arith.constant 0 : i32
    %c0_i32_1 = arith.constant 0 : i32
    return %arg0, %c0_i32, %c0_i32_0 : i32, i32, i32
  }
  func.func @transform_10(%arg0: i32) -> (i32, i32, i32) {
    %c0_i32 = arith.constant 0 : i32
    %c0_i32_0 = arith.constant 0 : i32
    %c0_i32_1 = arith.constant 0 : i32
    return %arg0, %c0_i32, %c0_i32_0 : i32, i32, i32
  }
  func.func @transform_11(%arg0: i32) -> (i32, i32, i32) {
    %c0_i32 = arith.constant 0 : i32
    %c0_i32_0 = arith.constant 0 : i32
    %c0_i32_1 = arith.constant 0 : i32
    return %arg0, %c0_i32, %c0_i32_0 : i32, i32, i32
  }
  func.func @transform_12(%arg0: i32) -> (i32, i32, i32) {
    %c0_i32 = arith.constant 0 : i32
    %c0_i32_0 = arith.constant 0 : i32
    %c0_i32_1 = arith.constant 0 : i32
    return %arg0, %c0_i32, %c0_i32_0 : i32, i32, i32
  }
  func.func @transform_13(%arg0: i32) -> (i32, i32, i32) {
    %c0_i32 = arith.constant 0 : i32
    %c0_i32_0 = arith.constant 0 : i32
    %c0_i32_1 = arith.constant 0 : i32
    return %arg0, %c0_i32, %c0_i32_0 : i32, i32, i32
  }
  func.func @transform_14(%arg0: i32) -> (i32, i32, i32) {
    %c0_i32 = arith.constant 0 : i32
    %c0_i32_0 = arith.constant 0 : i32
    %c0_i32_1 = arith.constant 0 : i32
    return %arg0, %c0_i32, %c0_i32_0 : i32, i32, i32
  }
  func.func @transform_15(%arg0: i32) -> (i32, i32, i32) {
    %c0_i32 = arith.constant 0 : i32
    %c0_i32_0 = arith.constant 0 : i32
    %c0_i32_1 = arith.constant 0 : i32
    return %arg0, %c0_i32, %c0_i32_0 : i32, i32, i32
  }
  func.func @transform_16(%arg0: i32) -> (i32, i32, i32) {
    %c0_i32 = arith.constant 0 : i32
    %c0_i32_0 = arith.constant 0 : i32
    %c0_i32_1 = arith.constant 0 : i32
    return %arg0, %c0_i32, %c0_i32_0 : i32, i32, i32
  }
  func.func @transform_17(%arg0: i32) -> (i32, i32, i32) {
    %c0_i32 = arith.constant 0 : i32
    %c0_i32_0 = arith.constant 0 : i32
    %c0_i32_1 = arith.constant 0 : i32
    %c0_i32_2 = arith.constant 0 : i32
    return %c0_i32, %c0_i32_0, %c0_i32_1 : i32, i32, i32
  }
}

module attributes {stable_mosaic.version = 11 : i64} {
  func.func @_context_kernel(%arg0: memref<2x8x32xf32, #tpu.memory_space<vmem>>, %arg1: memref<2x8x64xf32, #tpu.memory_space<vmem>>, %arg2: memref<32x256xbf16, #tpu.memory_space<vmem>>, %arg3: memref<1x256xf32, #tpu.memory_space<vmem>>, %arg4: memref<256x64xbf16, #tpu.memory_space<vmem>>, %arg5: memref<1x64xf32, #tpu.memory_space<vmem>>, %arg6: memref<1x64xf32, #tpu.memory_space<vmem>>, %arg7: memref<1x1xf32, #tpu.memory_space<vmem>>, %arg8: memref<64x256xbf16, #tpu.memory_space<vmem>>, %arg9: memref<1x256xf32, #tpu.memory_space<vmem>>, %arg10: memref<256x64xbf16, #tpu.memory_space<vmem>>, %arg11: memref<1x64xf32, #tpu.memory_space<vmem>>, %arg12: memref<2x64xf32, #tpu.memory_space<vmem>>) attributes {dimension_semantics = [], scalar_prefetch = 0 : i64, scratch_operands = 0 : i64, tpu.core_type = #tpu.core_type<tc>} {
    %c0 = arith.constant 0 : index
    %c0_0 = arith.constant 0 : index
    %c0_1 = arith.constant 0 : index
    %0 = vector.load %arg0[%c0, %c0_0, %c0_1] : memref<2x8x32xf32, #tpu.memory_space<vmem>>, vector<2x8x32xf32>
    %1 = vector.shape_cast %0 : vector<2x8x32xf32> to vector<16x32xf32>
    %c0_2 = arith.constant 0 : index
    %c0_3 = arith.constant 0 : index
    %2 = vector.load %arg2[%c0_2, %c0_3] : memref<32x256xbf16, #tpu.memory_space<vmem>>, vector<32x256xbf16>
    %3 = arith.truncf %1 : vector<16x32xf32> to vector<16x32xbf16>
    %cst = arith.constant dense<0.000000e+00> : vector<16x256xf32>
    %4 = tpu.matmul %3, %2, %cst {dimension_numbers = #tpu.dot_dimension_numbers<[1], [0], [0], [1], [0, 0, 1, 1], [], []>} : vector<16x32xbf16>, vector<32x256xbf16>, vector<16x256xf32> -> vector<16x256xf32>
    %c0_4 = arith.constant 0 : index
    %c0_5 = arith.constant 0 : index
    %5 = vector.load %arg3[%c0_4, %c0_5] : memref<1x256xf32, #tpu.memory_space<vmem>>, vector<1x256xf32>
    %6 = vector.broadcast %5 : vector<1x256xf32> to vector<16x256xf32>
    %7 = arith.addf %4, %6 : vector<16x256xf32>
    %8 = arith.negf %7 : vector<16x256xf32>
    %9 = math.exp %8 : vector<16x256xf32>
    %cst_6 = arith.constant 1.000000e+00 : f32
    %10 = vector.broadcast %cst_6 : f32 to vector<16x256xf32>
    %11 = arith.addf %10, %9 : vector<16x256xf32>
    %12 = arith.divf %10, %11 : vector<16x256xf32>
    %13 = arith.mulf %7, %12 : vector<16x256xf32>
    %c0_7 = arith.constant 0 : index
    %c0_8 = arith.constant 0 : index
    %14 = vector.load %arg4[%c0_7, %c0_8] : memref<256x64xbf16, #tpu.memory_space<vmem>>, vector<256x64xbf16>
    %15 = arith.truncf %13 : vector<16x256xf32> to vector<16x256xbf16>
    %cst_9 = arith.constant dense<0.000000e+00> : vector<16x64xf32>
    %16 = tpu.matmul %15, %14, %cst_9 {dimension_numbers = #tpu.dot_dimension_numbers<[1], [0], [0], [1], [0, 0, 1, 1], [], []>} : vector<16x256xbf16>, vector<256x64xbf16>, vector<16x64xf32> -> vector<16x64xf32>
    %c0_10 = arith.constant 0 : index
    %c0_11 = arith.constant 0 : index
    %17 = vector.load %arg5[%c0_10, %c0_11] : memref<1x64xf32, #tpu.memory_space<vmem>>, vector<1x64xf32>
    %18 = vector.broadcast %17 : vector<1x64xf32> to vector<16x64xf32>
    %19 = arith.addf %16, %18 : vector<16x64xf32>
    %20 = vector.shape_cast %19 : vector<16x64xf32> to vector<2x8x64xf32>
    %c0_12 = arith.constant 0 : index
    %c0_13 = arith.constant 0 : index
    %c0_14 = arith.constant 0 : index
    %21 = vector.load %arg1[%c0_12, %c0_13, %c0_14] : memref<2x8x64xf32, #tpu.memory_space<vmem>>, vector<2x8x64xf32>
    %22 = arith.addf %21, %20 : vector<2x8x64xf32>
    %c0_15 = arith.constant 0 : index
    %c0_16 = arith.constant 0 : index
    %23 = vector.load %arg6[%c0_15, %c0_16] : memref<1x64xf32, #tpu.memory_space<vmem>>, vector<1x64xf32>
    %24 = vector.shape_cast %23 : vector<1x64xf32> to vector<1x1x64xf32>
    %25 = vector.broadcast %24 : vector<1x1x64xf32> to vector<2x8x64xf32>
    %26 = arith.mulf %22, %25 : vector<2x8x64xf32>
    %cst_17 = arith.constant dense<0.000000e+00> : vector<2x8xf32>
    %27 = vector.multi_reduction <add>, %26, %cst_17 [2] : vector<2x8x64xf32> to vector<2x8xf32>
    %c0_18 = arith.constant 0 : index
    %c0_19 = arith.constant 0 : index
    %28 = vector.load %arg7[%c0_18, %c0_19] : memref<1x1xf32, #tpu.memory_space<vmem>>, vector<1x1xf32>
    %29 = vector.broadcast %28 : vector<1x1xf32> to vector<2x8xf32>
    %30 = arith.addf %27, %29 : vector<2x8xf32>
    %cst_20 = arith.constant dense<0xFF800000> : vector<2xf32>
    %31 = vector.multi_reduction <maximumf>, %30, %cst_20 [1] : vector<2x8xf32> to vector<2xf32>
    %32 = vector.shape_cast %31 : vector<2xf32> to vector<2x1xf32>
    %33 = vector.broadcast %32 : vector<2x1xf32> to vector<2x8xf32>
    %34 = arith.subf %30, %33 : vector<2x8xf32>
    %35 = math.exp %34 : vector<2x8xf32>
    %cst_21 = arith.constant dense<0.000000e+00> : vector<2xf32>
    %36 = vector.multi_reduction <add>, %35, %cst_21 [1] : vector<2x8xf32> to vector<2xf32>
    %37 = vector.shape_cast %36 : vector<2xf32> to vector<2x1xf32>
    %38 = tpu.reciprocal %37 {approx = true} : vector<2x1xf32> -> vector<2x1xf32>
    %39 = vector.broadcast %38 : vector<2x1xf32> to vector<2x8xf32>
    %40 = arith.mulf %35, %39 : vector<2x8xf32>
    %41 = vector.shape_cast %40 : vector<2x8xf32> to vector<2x8x1xf32>
    %42 = vector.broadcast %41 : vector<2x8x1xf32> to vector<2x8x64xf32>
    %43 = arith.mulf %42, %22 : vector<2x8x64xf32>
    %cst_22 = arith.constant dense<0.000000e+00> : vector<2x64xf32>
    %44 = vector.multi_reduction <add>, %43, %cst_22 [1] : vector<2x8x64xf32> to vector<2x64xf32>
    %c0_23 = arith.constant 0 : index
    %c0_24 = arith.constant 0 : index
    %45 = vector.load %arg8[%c0_23, %c0_24] : memref<64x256xbf16, #tpu.memory_space<vmem>>, vector<64x256xbf16>
    %46 = arith.truncf %44 : vector<2x64xf32> to vector<2x64xbf16>
    %cst_25 = arith.constant dense<0.000000e+00> : vector<2x256xf32>
    %47 = tpu.matmul %46, %45, %cst_25 {dimension_numbers = #tpu.dot_dimension_numbers<[1], [0], [0], [1], [0, 0, 1, 1], [], []>} : vector<2x64xbf16>, vector<64x256xbf16>, vector<2x256xf32> -> vector<2x256xf32>
    %c0_26 = arith.constant 0 : index
    %c0_27 = arith.constant 0 : index
    %48 = vector.load %arg9[%c0_26, %c0_27] : memref<1x256xf32, #tpu.memory_space<vmem>>, vector<1x256xf32>
    %49 = vector.broadcast %48 : vector<1x256xf32> to vector<2x256xf32>
    %50 = arith.addf %47, %49 : vector<2x256xf32>
    %51 = arith.negf %50 : vector<2x256xf32>
    %52 = math.exp %51 : vector<2x256xf32>
    %cst_28 = arith.constant 1.000000e+00 : f32
    %53 = vector.broadcast %cst_28 : f32 to vector<2x256xf32>
    %54 = arith.addf %53, %52 : vector<2x256xf32>
    %55 = arith.divf %53, %54 : vector<2x256xf32>
    %56 = arith.mulf %50, %55 : vector<2x256xf32>
    %c0_29 = arith.constant 0 : index
    %c0_30 = arith.constant 0 : index
    %57 = vector.load %arg10[%c0_29, %c0_30] : memref<256x64xbf16, #tpu.memory_space<vmem>>, vector<256x64xbf16>
    %58 = arith.truncf %56 : vector<2x256xf32> to vector<2x256xbf16>
    %cst_31 = arith.constant dense<0.000000e+00> : vector<2x64xf32>
    %59 = tpu.matmul %58, %57, %cst_31 {dimension_numbers = #tpu.dot_dimension_numbers<[1], [0], [0], [1], [0, 0, 1, 1], [], []>} : vector<2x256xbf16>, vector<256x64xbf16>, vector<2x64xf32> -> vector<2x64xf32>
    %60 = arith.addf %44, %59 : vector<2x64xf32>
    %c0_32 = arith.constant 0 : index
    %c0_33 = arith.constant 0 : index
    %61 = vector.load %arg11[%c0_32, %c0_33] : memref<1x64xf32, #tpu.memory_space<vmem>>, vector<1x64xf32>
    %62 = vector.broadcast %61 : vector<1x64xf32> to vector<2x64xf32>
    %63 = arith.addf %60, %62 : vector<2x64xf32>
    %c0_34 = arith.constant 0 : index
    %c0_35 = arith.constant 0 : index
    %64 = vector.load %arg12[%c0_34, %c0_35] : memref<2x64xf32, #tpu.memory_space<vmem>>, vector<2x64xf32>
    tpu.vector_store %arg12[%c0_34, %c0_35], %63 {strides = array<i32>} : memref<2x64xf32, #tpu.memory_space<vmem>>, vector<2x64xf32>,
    return
  }
}

module attributes {stable_mosaic.version = 11 : i64} {
  func.func @_mlp4_kernel(%arg0: memref<8x2xf32, #tpu.memory_space<vmem>>, %arg1: memref<2x64xf32, #tpu.memory_space<vmem>>, %arg2: memref<1x64xf32, #tpu.memory_space<vmem>>, %arg3: memref<64x64xbf16, #tpu.memory_space<vmem>>, %arg4: memref<1x64xf32, #tpu.memory_space<vmem>>, %arg5: memref<64x64xbf16, #tpu.memory_space<vmem>>, %arg6: memref<1x64xf32, #tpu.memory_space<vmem>>, %arg7: memref<64x64xbf16, #tpu.memory_space<vmem>>, %arg8: memref<1x64xf32, #tpu.memory_space<vmem>>, %arg9: memref<8x64xf32, #tpu.memory_space<vmem>>) attributes {dimension_semantics = [], scalar_prefetch = 0 : i64, scratch_operands = 0 : i64, tpu.core_type = #tpu.core_type<tc>} {
    %c0 = arith.constant 0 : index
    %c0_0 = arith.constant 0 : index
    %0 = vector.load %arg0[%c0, %c0_0] : memref<8x2xf32, #tpu.memory_space<vmem>>, vector<8x2xf32>
    %c0_1 = arith.constant 0 : index
    %c0_2 = arith.constant 0 : index
    %1 = vector.load %arg1[%c0_1, %c0_2] : memref<2x64xf32, #tpu.memory_space<vmem>>, vector<2x64xf32>
    %2 = vector.extract_strided_slice %0 {offsets = [0, 0], sizes = [8, 1], strides = [1, 1]} : vector<8x2xf32> to vector<8x1xf32>
    %3 = vector.extract_strided_slice %1 {offsets = [0, 0], sizes = [1, 64], strides = [1, 1]} : vector<2x64xf32> to vector<1x64xf32>
    %4 = vector.broadcast %2 : vector<8x1xf32> to vector<8x64xf32>
    %5 = vector.broadcast %3 : vector<1x64xf32> to vector<8x64xf32>
    %6 = arith.mulf %4, %5 : vector<8x64xf32>
    %7 = vector.extract_strided_slice %0 {offsets = [0, 1], sizes = [8, 1], strides = [1, 1]} : vector<8x2xf32> to vector<8x1xf32>
    %8 = vector.extract_strided_slice %1 {offsets = [1, 0], sizes = [1, 64], strides = [1, 1]} : vector<2x64xf32> to vector<1x64xf32>
    %9 = vector.broadcast %7 : vector<8x1xf32> to vector<8x64xf32>
    %10 = vector.broadcast %8 : vector<1x64xf32> to vector<8x64xf32>
    %11 = arith.mulf %9, %10 : vector<8x64xf32>
    %12 = arith.addf %6, %11 : vector<8x64xf32>
    %c0_3 = arith.constant 0 : index
    %c0_4 = arith.constant 0 : index
    %13 = vector.load %arg2[%c0_3, %c0_4] : memref<1x64xf32, #tpu.memory_space<vmem>>, vector<1x64xf32>
    %14 = vector.broadcast %13 : vector<1x64xf32> to vector<8x64xf32>
    %15 = arith.addf %12, %14 : vector<8x64xf32>
    %16 = arith.negf %15 : vector<8x64xf32>
    %17 = math.exp %16 : vector<8x64xf32>
    %cst = arith.constant 1.000000e+00 : f32
    %18 = vector.broadcast %cst : f32 to vector<8x64xf32>
    %19 = arith.addf %18, %17 : vector<8x64xf32>
    %20 = arith.divf %18, %19 : vector<8x64xf32>
    %21 = arith.mulf %15, %20 : vector<8x64xf32>
    %c0_5 = arith.constant 0 : index
    %c0_6 = arith.constant 0 : index
    %22 = vector.load %arg3[%c0_5, %c0_6] : memref<64x64xbf16, #tpu.memory_space<vmem>>, vector<64x64xbf16>
    %23 = arith.truncf %21 : vector<8x64xf32> to vector<8x64xbf16>
    %cst_7 = arith.constant dense<0.000000e+00> : vector<8x64xf32>
    %24 = tpu.matmul %23, %22, %cst_7 {dimension_numbers = #tpu.dot_dimension_numbers<[1], [0], [0], [1], [0, 0, 1, 1], [], []>} : vector<8x64xbf16>, vector<64x64xbf16>, vector<8x64xf32> -> vector<8x64xf32>
    %c0_8 = arith.constant 0 : index
    %c0_9 = arith.constant 0 : index
    %25 = vector.load %arg4[%c0_8, %c0_9] : memref<1x64xf32, #tpu.memory_space<vmem>>, vector<1x64xf32>
    %26 = vector.broadcast %25 : vector<1x64xf32> to vector<8x64xf32>
    %27 = arith.addf %24, %26 : vector<8x64xf32>
    %28 = arith.negf %27 : vector<8x64xf32>
    %29 = math.exp %28 : vector<8x64xf32>
    %cst_10 = arith.constant 1.000000e+00 : f32
    %30 = vector.broadcast %cst_10 : f32 to vector<8x64xf32>
    %31 = arith.addf %30, %29 : vector<8x64xf32>
    %32 = arith.divf %30, %31 : vector<8x64xf32>
    %33 = arith.mulf %27, %32 : vector<8x64xf32>
    %c0_11 = arith.constant 0 : index
    %c0_12 = arith.constant 0 : index
    %34 = vector.load %arg5[%c0_11, %c0_12] : memref<64x64xbf16, #tpu.memory_space<vmem>>, vector<64x64xbf16>
    %35 = arith.truncf %33 : vector<8x64xf32> to vector<8x64xbf16>
    %cst_13 = arith.constant dense<0.000000e+00> : vector<8x64xf32>
    %36 = tpu.matmul %35, %34, %cst_13 {dimension_numbers = #tpu.dot_dimension_numbers<[1], [0], [0], [1], [0, 0, 1, 1], [], []>} : vector<8x64xbf16>, vector<64x64xbf16>, vector<8x64xf32> -> vector<8x64xf32>
    %c0_14 = arith.constant 0 : index
    %c0_15 = arith.constant 0 : index
    %37 = vector.load %arg6[%c0_14, %c0_15] : memref<1x64xf32, #tpu.memory_space<vmem>>, vector<1x64xf32>
    %38 = vector.broadcast %37 : vector<1x64xf32> to vector<8x64xf32>
    %39 = arith.addf %36, %38 : vector<8x64xf32>
    %40 = arith.negf %39 : vector<8x64xf32>
    %41 = math.exp %40 : vector<8x64xf32>
    %cst_16 = arith.constant 1.000000e+00 : f32
    %42 = vector.broadcast %cst_16 : f32 to vector<8x64xf32>
    %43 = arith.addf %42, %41 : vector<8x64xf32>
    %44 = arith.divf %42, %43 : vector<8x64xf32>
    %45 = arith.mulf %39, %44 : vector<8x64xf32>
    %c0_17 = arith.constant 0 : index
    %c0_18 = arith.constant 0 : index
    %46 = vector.load %arg7[%c0_17, %c0_18] : memref<64x64xbf16, #tpu.memory_space<vmem>>, vector<64x64xbf16>
    %47 = arith.truncf %45 : vector<8x64xf32> to vector<8x64xbf16>
    %cst_19 = arith.constant dense<0.000000e+00> : vector<8x64xf32>
    %48 = tpu.matmul %47, %46, %cst_19 {dimension_numbers = #tpu.dot_dimension_numbers<[1], [0], [0], [1], [0, 0, 1, 1], [], []>} : vector<8x64xbf16>, vector<64x64xbf16>, vector<8x64xf32> -> vector<8x64xf32>
    %c0_20 = arith.constant 0 : index
    %c0_21 = arith.constant 0 : index
    %49 = vector.load %arg8[%c0_20, %c0_21] : memref<1x64xf32, #tpu.memory_space<vmem>>, vector<1x64xf32>
    %50 = vector.broadcast %49 : vector<1x64xf32> to vector<8x64xf32>
    %51 = arith.addf %48, %50 : vector<8x64xf32>
    %c0_22 = arith.constant 0 : index
    %c0_23 = arith.constant 0 : index
    %52 = vector.load %arg9[%c0_22, %c0_23] : memref<8x64xf32, #tpu.memory_space<vmem>>, vector<8x64xf32>
    tpu.vector_store %arg9[%c0_22, %c0_23], %51 {strides = array<i32>} : memref<8x64xf32, #tpu.memory_space<vmem>>, vector<8x64xf32>,
    return
  }
}

</mosaic_0001>

<bundles_post_ra>
// kernel: branch_0_fun.4
= control target key start
LH: loop header
LB: loop body
LE: loop exit
PB: predicated region body
PF: predicated region fallthrough
CT: control target
= control target key end

     0   :  { %v40_v0 = vlaneseq  ;;  %v870_v1 = vmov 0   ;;  %v871_v7 = vmov 1   ;;  %v872_v11 = vmov 0.0   ;;  %s1079_s0 = inlined_call_operand.vmem [shape: f32[4,2], index: 0, kind: input, shape index: {}]   ;;  %s1080_s1 = inlined_call_operand.vmem [shape: f32[2,2,64], index: 1, kind: input, shape index: {}]   ;;  %s1081_s3 = inlined_call_operand.vmem [shape: bf16[2,64,64], index: 3, kind: input, shape index: {}]   ;;  %s1082_s2 = inlined_call_operand.vmem [shape: f32[2,1,64], index: 2, kind: input, shape index: {}]   ;;  %s1083_s5 = inlined_call_operand.vmem [shape: bf16[2,64,64], index: 5, kind: input, shape index: {}]   ;;  %s1084_s4 = inlined_call_operand.vmem [shape: f32[2,1,64], index: 4, kind: input, shape index: {}]   ;;  %s1085_s7 = inlined_call_operand.vmem [shape: bf16[2,64,32], index: 7, kind: input, shape index: {}]   ;;  %s1086_s6 = inlined_call_operand.vmem [shape: f32[2,1,64], index: 6, kind: input, shape index: {}]   ;;  %s1087_s8 = inlined_call_operand.vmem [shape: f32[2,1,32], index: 8, kind: input, shape index: {}]   ;;  %s1088_s9 = inlined_call_operand.vmem [shape: f32[2,4,32], index: 9, kind: output, shape index: {}]  }
   0x1   :  { %820 = vset.pattern.permute.xlu0 %v870_v1  ;;  %v33_v2 = vld [vmem:[%s1079_s0] sm:$0xf]  ;;  %v822_v10 = vld [vmem:[%s1081_s3 + $0x18] sm:$0xff]   ;;  %744 = vmatprep.subr.bf16.mxu0 %v872_v11  ;;  %v823_v12 = vld [vmem:[%s1081_s3 + $0x10] sm:$0xff]   ;;  %vm873_vm0 = vmmov 0   ;;  %vm110_vm1 = vcmask 523264  }
   0x2   :  { %37 = vperm.xlu0 %820, %v33_v2   ;;  %v41_v3 = vshrl.u32 %v40_v0, 7  ;;  %v662_v4 = vld [vmem:[%s1080_s1 + $0x2] sm:$0x3]  ;;  %756 = vmatprep.subr.bf16.mxu1 %v872_v11  ;;  %v824_v13 = vld [vmem:[%s1081_s3 + $0x8] sm:$0xff]   ;;  %v34_v15 = vld [vmem:[%s1080_s1] sm:$0x3] }
   0x3   :  { %745 = vmatpush3.bf16.msra.mxu0 %v822_v10  ;;  %v825_v14 = vld [vmem:[%s1081_s3] sm:$0xff]   ;;  %752 = vmatprep.mubr.msk.bf16.mxu0 %vm873_vm0, %v872_v11  ;;  %v826_v36 = vld [vmem:[%s1083_s5 + $0x18] sm:$0xff]   ;;  %v827_v37 = vld [vmem:[%s1083_s5 + $0x10] sm:$0xff]   ;;  %vm334_vm2 = vcmask 257024  }
   0x4   :  { %v42_v5 = vsub.s32 0, %v41_v3  ;;  %v51_v6 = vsub.s32 1, %v41_v3  ;;  %746 = vmatprep.subr.bf16.mxu0 %v872_v11  ;;  %764 = vmatprep.mubr.msk.bf16.mxu1 %vm873_vm0, %v872_v11  ;;  %v640_v24 = vld [vmem:[%s1082_s2] ss:$0 sm:$0xff]  ;;  %v664_v25 = vld [vmem:[%s1082_s2 + $0x1] ss:$0 sm:$0xff] }
   0x5   :  { %757 = vmatpush3.bf16.msra.mxu1 %v826_v36  ;;  %v828_v38 = vld [vmem:[%s1083_s5 + $0x8] sm:$0xff]   ;;  %v829_v39 = vld [vmem:[%s1083_s5] sm:$0xff]   ;;  %v830_v54 = vld [vmem:[%s1081_s3 + $0x38] sm:$0xff]  }
   0x6   :  { %821 = vset.pattern.permute.xlu0 %v871_v7  ;;  %v341_v8 = vrot.slane %v662_v4, %v42_v5  ;;  %v346_v9 = vrot.slane %v662_v4, %v51_v6  ;;  %v43_v18 = vrot.slane %v34_v15, %v42_v5  ;;  %v52_v19 = vrot.slane %v34_v15, %v51_v6  ;;  %v642_v40 = vld [vmem:[%s1084_s4] ss:$0 sm:$0xff]  ;;  %v831_v56 = vld [vmem:[%s1081_s3 + $0x30] sm:$0xff]   ;;  %v832_v57 = vld [vmem:[%s1081_s3 + $0x28] sm:$0xff]  }
   0x7   :  { %46 = vperm.xlu0 %821, %v33_v2   ;;  %747 = vmatpush3.bf16.msra.mxu0 %v823_v12  ;;  %v833_v59 = vld [vmem:[%s1081_s3 + $0x20] sm:$0xff]   ;;  %v834_v62 = vld [vmem:[%s1085_s7 + $0x18] sm:$0xff]   ;;  %v835_v63 = vld [vmem:[%s1085_s7 + $0x10] sm:$0xff]  }
   0x8   :  { %748 = vmatprep.subr.bf16.mxu0 %v872_v11  ;;  %758 = vmatprep.subr.bf16.mxu1 %v872_v11  ;;  %v836_v0 = vld [vmem:[%s1085_s7 + $0x8] sm:$0xff]   ;;  %v837_v1 = vld [vmem:[%s1085_s7] sm:$0xff]  }
   0x9   :  { %759 = vmatpush3.bf16.msra.mxu1 %v827_v37  ;;  %v649_v2 = vld [vmem:[%s1086_s6] ss:$0 sm:$0xff] }
   0xa   :  { %760 = vmatprep.subr.bf16.mxu1 %v872_v11 }
   0xb   :  { %749 = vmatpush3.bf16.msra.mxu0 %v824_v13 }
   0xc   :  { %750 = vmatprep.subr.bf16.mxu0 %v872_v11 }
   0xd   :  { %761 = vmatpush3.bf16.msra.mxu1 %v828_v38 }
   0xe   :  { %762 = vmatprep.subr.bf16.mxu1 %v872_v11 }
   0xf   :  { %751 = vmatpush3.bf16.msra.mxu0 %v825_v14 }
  0x10   :  { %768 = vmatprep.subr.bf16.mxu0 %v872_v11 }
  0x11   :  { %763 = vmatpush3.bf16.msra.mxu1 %v829_v39 }
  0x12   :  { %780 = vmatprep.subr.bf16.mxu1 %v872_v11 }
  0x7d   :  { %v38_v16 = vpop.permute.xlu0 %37 }
  0x7e   :  { %v342_v17 = vmul.f32 %v341_v8, %v38_v16  ;;  %v44_v21 = vmul.f32 %v43_v18, %v38_v16 }
  0x82   :  { %v47_v20 = vpop.permute.xlu0 %46 }
  0x83   :  { %v53_v22 = vmul.f32 %v52_v19, %v47_v20  ;;  %v347_v23 = vmul.f32 %v346_v9, %v47_v20  ;;  %v675_v9 = vld [vmem:[%s1084_s4 + $0x1] ss:$0 sm:$0xff] }
  0x85   :  { %v54_v26 = vadd.f32 %v53_v22, %v44_v21  ;;  %v348_v27 = vadd.f32 %v347_v23, %v342_v17  ;;  %v838_v23 = vld [vmem:[%s1083_s5 + $0x38] sm:$0xff]  }
  0x87   :  { %v62_v28 = vadd.f32 %v640_v24, %v54_v26  ;;  %v357_v29 = vadd.f32 %v664_v25, %v348_v27  ;;  %v839_v25 = vld [vmem:[%s1083_s5 + $0x30] sm:$0xff]   ;;  %v840_v26 = vld [vmem:[%s1083_s5 + $0x28] sm:$0xff]   ;;  %v841_v27 = vld [vmem:[%s1083_s5 + $0x20] sm:$0xff]  }
  0x89   :  { %v641_v30 = vmul.f32 -1.442695, %v62_v28  ;;  %v665_v47 = vmul.f32 -1.442695, %v357_v29 }
  0x8b   :  { %846 = vpow2.f32 %v641_v30 }
  0x98   :  { %v847_v31 = vpop.eup %846 }
  0x99   :  { %v66_v32 = vadd.f32 1.0, %v847_v31  ;;  %v842_v31 = vld [vmem:[%s1085_s7 + $0x38] sm:$0xff]  }
  0x9b   :  { %848 = vrcp.f32 %v66_v32  ;;  %v843_v32 = vld [vmem:[%s1085_s7 + $0x30] sm:$0xff]  }
  0xa8   :  { %v849_v33 = vpop.eup %848 }
  0xa9   :  { %v69_v34 = vmul.f32 %v849_v33, %v62_v28  ;;  %v844_v33 = vld [vmem:[%s1085_s7 + $0x28] sm:$0xff]  }
  0xab   :  { %v78_v35 = vpack.c.bf16 %v69_v34, %v69_v34  ;;  %v845_v34 = vld [vmem:[%s1085_s7 + $0x20] sm:$0xff]  }
  0xad   :  { %753 = vmatmul.mubr.msk.bf16.vlgmr.msra.gmra.mxu0 %vm110_vm1, %v78_v35  ;;  %v656_v35 = vld [vmem:[%s1087_s8] ss:$0 sm:$0xff] }
  0xae   :  { %776 = vmatprep.mubr.msk.bf16.mxu0 %vm873_vm0, %v872_v11  ;;  %769 = vmatpush3.bf16.msra.mxu0 %v834_v62 }
  0xaf   :  { %770 = vmatprep.subr.bf16.mxu0 %v872_v11 }
  0xb2   :  { %771 = vmatpush3.bf16.msra.mxu0 %v835_v63 }
  0xb3   :  { %772 = vmatprep.subr.bf16.mxu0 %v872_v11 }
  0xb6   :  { %773 = vmatpush3.bf16.msra.mxu0 %v836_v0 }
  0xb7   :  { %774 = vmatprep.subr.bf16.mxu0 %v872_v11 }
  0xba   :  { %775 = vmatpush3.bf16.msra.mxu0 %v837_v1 }
  0xbb   :  { %792 = vmatprep.subr.bf16.mxu0 %v872_v11 }
 0x16d   :  { %v148_v41 = vpop.f32.mrf.mxu0 }
 0x16e   :  { %v149_v42 = vadd.f32 %v642_v40, %v148_v41  ;;  %v691_v40 = vld [vmem:[%s1086_s6 + $0x1] ss:$0 sm:$0xff] }
 0x16f   :  { %v754_v43 = vpop.f32.mrf.mxu0 }
 0x170   :  { %v648_v44 = vmul.f32 -1.442695, %v149_v42 }
 0x171   :  { %v151_v45 = vpop.f32.mrf.mxu0 }
 0x172   :  { %850 = vpow2.f32 %v648_v44 }
 0x173   :  { %v755_v46 = vpop.f32.mrf.mxu0  ;;  %852 = vpow2.f32 %v665_v47 }
 0x17f   :  { %v851_v48 = vpop.eup %850 }
 0x180   :  { %v157_v49 = vadd.f32 1.0, %v851_v48  ;;  %v853_v50 = vpop.eup %852 }
 0x181   :  { %v361_v51 = vadd.f32 1.0, %v853_v50 }
 0x182   :  { %854 = vrcp.f32 %v157_v49 }
 0x183   :  { %856 = vrcp.f32 %v361_v51 }
 0x18f   :  { %v855_v52 = vpop.eup %854 }
 0x190   :  { %v160_v53 = vmul.f32 %v855_v52, %v149_v42  ;;  %v857_v58 = vpop.eup %856  ;;  %v707_v52 = vld [vmem:[%s1087_s8 + $0x1] ss:$0 sm:$0xff] }
 0x191   :  { %v364_v60 = vmul.f32 %v857_v58, %v357_v29 }
 0x192   :  { %v169_v55 = vpack.c.bf16 %v160_v53, %v160_v53 }
 0x193   :  { %v374_v61 = vpack.c.bf16 %v364_v60, %v364_v60 }
 0x194   :  { %765 = vmatmul.mubr.msk.bf16.vlgmr.msra.gmra.mxu1 %vm110_vm1, %v169_v55 }
 0x195   :  { %781 = vmatpush3.bf16.msra.mxu1 %v830_v54  ;;  %788 = vmatprep.mubr.msk.bf16.mxu1 %vm873_vm0, %v872_v11 }
 0x196   :  { %782 = vmatprep.subr.bf16.mxu1 %v872_v11 }
 0x199   :  { %783 = vmatpush3.bf16.msra.mxu1 %v831_v56 }
 0x19a   :  { %784 = vmatprep.subr.bf16.mxu1 %v872_v11 }
 0x19d   :  { %785 = vmatpush3.bf16.msra.mxu1 %v832_v57 }
 0x19e   :  { %786 = vmatprep.subr.bf16.mxu1 %v872_v11 }
 0x1a1   :  { %787 = vmatpush3.bf16.msra.mxu1 %v833_v59 }
 0x1a2   :  { %804 = vmatprep.subr.bf16.mxu1 %v872_v11 }
 0x1a4   :  { %789 = vmatmul.mubr.msk.bf16.vlgmr.msra.gmra.mxu1 %vm110_vm1, %v374_v61 }
 0x1a5   :  { %812 = vmatprep.mubr.msk.bf16.mxu1 %vm873_vm0, %v872_v11  ;;  %805 = vmatpush3.bf16.msra.mxu1 %v842_v31 }
 0x1a6   :  { %806 = vmatprep.subr.bf16.mxu1 %v872_v11 }
 0x1a9   :  { %807 = vmatpush3.bf16.msra.mxu1 %v843_v32 }
 0x1aa   :  { %808 = vmatprep.subr.bf16.mxu1 %v872_v11 }
 0x1ad   :  { %809 = vmatpush3.bf16.msra.mxu1 %v844_v33 }
 0x1ae   :  { %810 = vmatprep.subr.bf16.mxu1 %v872_v11 }
 0x1b1   :  { %811 = vmatpush3.bf16.msra.mxu1 %v845_v34 }
 0x254   :  { %v238_v3 = vpop.f32.mrf.mxu1 }
 0x255   :  { %v239_v4 = vadd.f32 %v649_v2, %v238_v3 }
 0x256   :  { %v766_v5 = vpop.f32.mrf.mxu1 }
 0x257   :  { %v655_v6 = vmul.f32 -1.442695, %v239_v4 }
 0x258   :  { %v241_v7 = vpop.f32.mrf.mxu1 }
 0x259   :  { %858 = vpow2.f32 %v655_v6 }
 0x25a   :  { %v767_v8 = vpop.f32.mrf.mxu1 }
 0x264   :  { %v444_v10 = vpop.f32.mrf.mxu1 }
 0x265   :  { %v445_v12 = vadd.f32 %v675_v9, %v444_v10 }
 0x266   :  { %v859_v13 = vpop.eup %858  ;;  %v790_v14 = vpop.f32.mrf.mxu1 }
 0x267   :  { %v247_v15 = vadd.f32 1.0, %v859_v13  ;;  %v681_v16 = vmul.f32 -1.442695, %v445_v12 }
 0x268   :  { %v447_v17 = vpop.f32.mrf.mxu1 }
 0x269   :  { %860 = vrcp.f32 %v247_v15 }
 0x26a   :  { %862 = vpow2.f32 %v681_v16  ;;  %v791_v18 = vpop.f32.mrf.mxu1 }
 0x276   :  { %v861_v19 = vpop.eup %860 }
 0x277   :  { %v863_v20 = vpop.eup %862  ;;  %v250_v21 = vmul.f32 %v861_v19, %v239_v4 }
 0x278   :  { %v453_v22 = vadd.f32 1.0, %v863_v20 }
 0x279   :  { %v259_v24 = vpack.c.bf16 %v250_v21, %v250_v21 }
 0x27a   :  { %864 = vrcp.f32 %v453_v22 }
 0x27b   :  { %777 = vmatmul.mubr.msk.bf16.vlgmr.msra.gmra.mxu0 %vm110_vm1, %v259_v24 }
 0x27c   :  { %793 = vmatpush3.bf16.msra.mxu0 %v838_v23  ;;  %800 = vmatprep.mubr.msk.bf16.mxu0 %vm873_vm0, %v872_v11 }
 0x27d   :  { %794 = vmatprep.subr.bf16.mxu0 %v872_v11 }
 0x280   :  { %795 = vmatpush3.bf16.msra.mxu0 %v839_v25 }
 0x281   :  { %796 = vmatprep.subr.bf16.mxu0 %v872_v11 }
 0x284   :  { %797 = vmatpush3.bf16.msra.mxu0 %v840_v26 }
 0x285   :  { %798 = vmatprep.subr.bf16.mxu0 %v872_v11 }
 0x287   :  { %v865_v28 = vpop.eup %864 }
 0x288   :  { %v456_v29 = vmul.f32 %v865_v28, %v445_v12  ;;  %799 = vmatpush3.bf16.msra.mxu0 %v841_v27 }
 0x28a   :  { %v466_v30 = vpack.c.bf16 %v456_v29, %v456_v29 }
 0x28c   :  { %801 = vmatmul.mubr.msk.bf16.vlgmr.msra.gmra.mxu0 %vm110_vm1, %v466_v30 }
 0x33b   :  { %v328_v36 = vpop.f32.mrf.mxu0 }
 0x33c   :  { %v329_v37 = vadd.f32 %v656_v35, %v328_v36 }
 0x33d   :  { %v778_v38 = vpop.f32.mrf.mxu0 }
 0x33e   :  { %335 = vst.msk [vmem:[%s1088_s9] sm:$0xf] %vm334_vm2, %v329_v37 }
 0x33f   :  { %v331_v39 = vpop.f32.mrf.mxu0 }
 0x341   :  { %v779_v11 = vpop.f32.mrf.mxu0 }
 0x34c   :  { %v536_v41 = vpop.f32.mrf.mxu0 }
 0x34d   :  { %v537_v42 = vadd.f32 %v691_v40, %v536_v41 }
 0x34e   :  { %v802_v43 = vpop.f32.mrf.mxu0 }
 0x34f   :  { %v697_v44 = vmul.f32 -1.442695, %v537_v42 }
 0x350   :  { %v539_v45 = vpop.f32.mrf.mxu0 }
 0x351   :  { %866 = vpow2.f32 %v697_v44 }
 0x352   :  { %v803_v46 = vpop.f32.mrf.mxu0 }
 0x35e   :  { %v867_v47 = vpop.eup %866 }
 0x35f   :  { %v545_v48 = vadd.f32 1.0, %v867_v47 }
 0x361   :  { %868 = vrcp.f32 %v545_v48 }
 0x36e   :  { %v869_v49 = vpop.eup %868 }
 0x36f   :  { %v548_v50 = vmul.f32 %v869_v49, %v537_v42 }
 0x371   :  { %v558_v51 = vpack.c.bf16 %v548_v50, %v548_v50 }
 0x373   :  { %813 = vmatmul.mubr.msk.bf16.vlgmr.msra.gmra.mxu1 %vm110_vm1, %v558_v51 }
 0x433   :  { %v628_v53 = vpop.f32.mrf.mxu1 }
 0x434   :  { %v629_v54 = vadd.f32 %v707_v52, %v628_v53 }
 0x435   :  { %v814_v55 = vpop.f32.mrf.mxu1 }
 0x436   :  { %713 = vst.msk [vmem:[%s1088_s9 + $0x4] sm:$0xf] %vm334_vm2, %v629_v54 }
 0x437   :  { %v631_v56 = vpop.f32.mrf.mxu1 }
 0x439   :  { %v815_v57 = vpop.f32.mrf.mxu1 }

// kernel: branch_0_fun.5
= control target key start
LH: loop header
LB: loop body
LE: loop exit
PB: predicated region body
PF: predicated region fallthrough
CT: control target
= control target key end

     0   :  { %vm1138_vm0 = vmmov 0   ;;  %vm855_vm1 = vcmask 261120   ;;  %s1445_s1 = inlined_call_operand.vmem [shape: bf16[1024,128], index: 1, kind: input, shape index: {}]   ;;  %s1446_s0 = inlined_call_operand.vmem [shape: f32[16,1024], index: 0, kind: input, shape index: {}]   ;;  %s1447_s3 = inlined_call_operand.vmem [shape: bf16[128,32], index: 3, kind: input, shape index: {}]   ;;  %s1448_s2 = inlined_call_operand.vmem [shape: f32[1,128], index: 2, kind: input, shape index: {}]   ;;  %s1449_s4 = inlined_call_operand.vmem [shape: f32[1,32], index: 4, kind: input, shape index: {}]   ;;  %s1450_s5 = inlined_call_operand.vmem [shape: f32[16,32], index: 5, kind: output, shape index: {}]  }
   0x1   :  { %v1057_v0 = vld [vmem:[%s1445_s1 + $0x78] sm:$0xff]   ;;  %v1061_v4 = vld [vmem:[%s1445_s1 + $0x70] sm:$0xff]   ;;  %v1065_v8 = vld [vmem:[%s1445_s1 + $0x68] sm:$0xff]  }
   0x2   :  { %v1058_v1 = vld [vmem:[%s1445_s1 + $0xf8] sm:$0xff]   ;;  %938 = vmatprep.subr.bf16.mxu0 %v1057_v0  ;;  %v1062_v5 = vld [vmem:[%s1445_s1 + $0xf0] sm:$0xff]   ;;  %v1066_v9 = vld [vmem:[%s1445_s1 + $0xe8] sm:$0xff]  }
   0x3   :  { %v1059_v2 = vld [vmem:[%s1445_s1 + $0x38] sm:$0xff]   ;;  %960 = vmatprep.subr.bf16.mxu1 %v1058_v1  ;;  %v1063_v6 = vld [vmem:[%s1445_s1 + $0x30] sm:$0xff]   ;;  %v1067_v10 = vld [vmem:[%s1445_s1 + $0x28] sm:$0xff]  }
   0x4   :  { %v1060_v3 = vld [vmem:[%s1445_s1 + $0xb8] sm:$0xff]   ;;  %939 = vmatpush3.bf16.msra.mxu0 %v1059_v2  ;;  %v1064_v7 = vld [vmem:[%s1445_s1 + $0xb0] sm:$0xff]   ;;  %v1068_v11 = vld [vmem:[%s1445_s1 + $0xa8] sm:$0xff]  }
   0x5   :  { %961 = vmatpush3.bf16.msra.mxu1 %v1060_v3  ;;  %940 = vmatprep.subr.bf16.mxu0 %v1061_v4  ;;  %v1069_v12 = vld [vmem:[%s1445_s1 + $0x60] sm:$0xff]   ;;  %v1073_v16 = vld [vmem:[%s1445_s1 + $0x58] sm:$0xff]   ;;  %v1077_v20 = vld [vmem:[%s1445_s1 + $0x50] sm:$0xff]  }
   0x6   :  { %962 = vmatprep.subr.bf16.mxu1 %v1062_v5  ;;  %v1070_v13 = vld [vmem:[%s1445_s1 + $0xe0] sm:$0xff]   ;;  %v1074_v17 = vld [vmem:[%s1445_s1 + $0xd8] sm:$0xff]   ;;  %v1078_v21 = vld [vmem:[%s1445_s1 + $0xd0] sm:$0xff]  }
   0x7   :  { %v1071_v14 = vld [vmem:[%s1445_s1 + $0x20] sm:$0xff]   ;;  %v1075_v18 = vld [vmem:[%s1445_s1 + $0x18] sm:$0xff]   ;;  %v1079_v22 = vld [vmem:[%s1445_s1 + $0x10] sm:$0xff]  }
   0x8   :  { %941 = vmatpush3.bf16.msra.mxu0 %v1063_v6  ;;  %v1072_v15 = vld [vmem:[%s1445_s1 + $0xa0] sm:$0xff]   ;;  %v1076_v19 = vld [vmem:[%s1445_s1 + $0x98] sm:$0xff]   ;;  %v1080_v23 = vld [vmem:[%s1445_s1 + $0x90] sm:$0xff]  }
   0x9   :  { %963 = vmatpush3.bf16.msra.mxu1 %v1064_v7  ;;  %942 = vmatprep.subr.bf16.mxu0 %v1065_v8  ;;  %v1081_v24 = vld [vmem:[%s1445_s1 + $0x48] sm:$0xff]   ;;  %v1085_v28 = vld [vmem:[%s1445_s1 + $0x40] sm:$0xff]   ;;  %v24_v34 = vld [vmem:[%s1446_s0 + $0x18] sm:$0xff] }
   0xa   :  { %964 = vmatprep.subr.bf16.mxu1 %v1066_v9  ;;  %v1082_v25 = vld [vmem:[%s1445_s1 + $0xc8] sm:$0xff]   ;;  %v1086_v29 = vld [vmem:[%s1445_s1 + $0xc0] sm:$0xff]   ;;  %v32_v36 = vld [vmem:[%s1446_s0 + $0x58] sm:$0xff] }
   0xb   :  { %v1083_v26 = vld [vmem:[%s1445_s1 + $0x8] sm:$0xff]   ;;  %v1087_v30 = vld [vmem:[%s1445_s1] sm:$0xff]   ;;  %v168_v39 = vpack.c.bf16 %v32_v36, %v24_v34  ;;  %v23_v41 = vld [vmem:[%s1446_s0 + $0x10] sm:$0xff] }
   0xc   :  { %943 = vmatpush3.bf16.msra.mxu0 %v1067_v10  ;;  %v1084_v27 = vld [vmem:[%s1445_s1 + $0x88] sm:$0xff]   ;;  %v1088_v31 = vld [vmem:[%s1445_s1 + $0x80] sm:$0xff]   ;;  %v31_v42 = vld [vmem:[%s1446_s0 + $0x50] sm:$0xff] }
   0xd   :  { %965 = vmatpush3.bf16.msra.mxu1 %v1068_v11  ;;  %944 = vmatprep.subr.bf16.mxu0 %v1069_v12  ;;  %v22_v32 = vld [vmem:[%s1446_s0 + $0x8] sm:$0xff]  ;;  %v21_v37 = vld [vmem:[%s1446_s0] sm:$0xff]  ;;  %v167_v43 = vpack.c.bf16 %v31_v42, %v23_v41  ;;  %v1089_v44 = vld [vmem:[%s1445_s1 + $0x178] sm:$0xff]  }
   0xe   :  { %966 = vmatprep.subr.bf16.mxu1 %v1070_v13  ;;  %v30_v33 = vld [vmem:[%s1446_s0 + $0x48] sm:$0xff]  ;;  %v29_v38 = vld [vmem:[%s1446_s0 + $0x40] sm:$0xff]  ;;  %637 = vmatprep.mubr.bf16.mxu1 %v168_v39  ;;  %v1090_v45 = vld [vmem:[%s1445_s1 + $0x1f8] sm:$0xff]  }
   0xf   :  { %v166_v35 = vpack.c.bf16 %v30_v33, %v22_v32  ;;  %v165_v40 = vpack.c.bf16 %v29_v38, %v21_v37  ;;  %v1091_v46 = vld [vmem:[%s1445_s1 + $0x138] sm:$0xff]   ;;  %v1093_v48 = vld [vmem:[%s1445_s1 + $0x170] sm:$0xff]   ;;  %v1097_v52 = vld [vmem:[%s1445_s1 + $0x168] sm:$0xff]  }
  0x10   :  { %945 = vmatpush3.bf16.msra.mxu0 %v1071_v14  ;;  %v1092_v47 = vld [vmem:[%s1445_s1 + $0x1b8] sm:$0xff]   ;;  %v1094_v49 = vld [vmem:[%s1445_s1 + $0x1f0] sm:$0xff]   ;;  %v1098_v53 = vld [vmem:[%s1445_s1 + $0x1e8] sm:$0xff]  }
  0x11   :  { %967 = vmatpush3.bf16.msra.mxu1 %v1072_v15  ;;  %946 = vmatprep.subr.bf16.mxu0 %v1073_v16  ;;  %v1095_v50 = vld [vmem:[%s1445_s1 + $0x130] sm:$0xff]   ;;  %v1099_v54 = vld [vmem:[%s1445_s1 + $0x128] sm:$0xff]   ;;  %v1101_v56 = vld [vmem:[%s1445_s1 + $0x160] sm:$0xff]  }
  0x12   :  { %968 = vmatprep.subr.bf16.mxu1 %v1074_v17  ;;  %596 = vmatprep.mubr.bf16.mxu0 %v166_v35  ;;  %v1096_v51 = vld [vmem:[%s1445_s1 + $0x1b0] sm:$0xff]   ;;  %v1100_v55 = vld [vmem:[%s1445_s1 + $0x1a8] sm:$0xff]   ;;  %v1102_v57 = vld [vmem:[%s1445_s1 + $0x1e0] sm:$0xff]  }
  0x13   :  { %v1103_v58 = vld [vmem:[%s1445_s1 + $0x120] sm:$0xff]   ;;  %v1105_v60 = vld [vmem:[%s1445_s1 + $0x158] sm:$0xff]   ;;  %v1109_v0 = vld [vmem:[%s1445_s1 + $0x150] sm:$0xff]  }
  0x14   :  { %947 = vmatpush3.bf16.msra.mxu0 %v1075_v18  ;;  %v1104_v59 = vld [vmem:[%s1445_s1 + $0x1a0] sm:$0xff]   ;;  %v1106_v61 = vld [vmem:[%s1445_s1 + $0x1d8] sm:$0xff]   ;;  %v1110_v1 = vld [vmem:[%s1445_s1 + $0x1d0] sm:$0xff]  }
  0x15   :  { %969 = vmatpush3.bf16.msra.mxu1 %v1076_v19  ;;  %948 = vmatprep.subr.bf16.mxu0 %v1077_v20  ;;  %v1107_v62 = vld [vmem:[%s1445_s1 + $0x118] sm:$0xff]   ;;  %v1111_v2 = vld [vmem:[%s1445_s1 + $0x110] sm:$0xff]   ;;  %v1113_v4 = vld [vmem:[%s1445_s1 + $0x148] sm:$0xff]  }
  0x16   :  { %970 = vmatprep.subr.bf16.mxu1 %v1078_v21  ;;  %v1108_v63 = vld [vmem:[%s1445_s1 + $0x198] sm:$0xff]   ;;  %v1112_v3 = vld [vmem:[%s1445_s1 + $0x190] sm:$0xff]   ;;  %v1114_v5 = vld [vmem:[%s1445_s1 + $0x1c8] sm:$0xff]  }
  0x17   :  { %v1115_v6 = vld [vmem:[%s1445_s1 + $0x108] sm:$0xff]   ;;  %v1117_v8 = vld [vmem:[%s1445_s1 + $0x140] sm:$0xff]   ;;  %v28_v14 = vld [vmem:[%s1446_s0 + $0x38] sm:$0xff] }
  0x18   :  { %949 = vmatpush3.bf16.msra.mxu0 %v1079_v22  ;;  %v1116_v7 = vld [vmem:[%s1445_s1 + $0x188] sm:$0xff]   ;;  %v1118_v9 = vld [vmem:[%s1445_s1 + $0x1c0] sm:$0xff]   ;;  %v36_v15 = vld [vmem:[%s1446_s0 + $0x78] sm:$0xff] }
  0x19   :  { %971 = vmatpush3.bf16.msra.mxu1 %v1080_v23  ;;  %950 = vmatprep.subr.bf16.mxu0 %v1081_v24  ;;  %v1119_v10 = vld [vmem:[%s1445_s1 + $0x100] sm:$0xff]   ;;  %v26_v12 = vld [vmem:[%s1446_s0 + $0x28] sm:$0xff]  ;;  %v172_v17 = vpack.c.bf16 %v36_v15, %v28_v14  ;;  %v27_v20 = vld [vmem:[%s1446_s0 + $0x30] sm:$0xff] }
  0x1a   :  { %972 = vmatprep.subr.bf16.mxu1 %v1082_v25  ;;  %v1120_v11 = vld [vmem:[%s1445_s1 + $0x180] sm:$0xff]   ;;  %v34_v13 = vld [vmem:[%s1446_s0 + $0x68] sm:$0xff]  ;;  %v35_v22 = vld [vmem:[%s1446_s0 + $0x70] sm:$0xff]  ;;  %v1137_v25 = vmov 0.0  }
  0x1b   :  { %v170_v16 = vpack.c.bf16 %v34_v13, %v26_v12  ;;  %v25_v18 = vld [vmem:[%s1446_s0 + $0x20] sm:$0xff]  ;;  %v171_v23 = vpack.c.bf16 %v35_v22, %v27_v20  ;;  %v1121_v24 = vld [vmem:[%s1447_s3 + $0x38] sm:$0xff]  }
  0x1c   :  { %951 = vmatpush3.bf16.msra.mxu0 %v1083_v26  ;;  %v33_v19 = vld [vmem:[%s1446_s0 + $0x60] sm:$0xff]  ;;  %v1122_v26 = vld [vmem:[%s1447_s3 + $0x30] sm:$0xff]  }
  0x1d   :  { %973 = vmatpush3.bf16.msra.mxu1 %v1084_v27  ;;  %952 = vmatprep.subr.bf16.mxu0 %v1085_v28  ;;  %v169_v21 = vpack.c.bf16 %v33_v19, %v25_v18  ;;  %v1123_v27 = vld [vmem:[%s1447_s3 + $0x28] sm:$0xff]   ;;  %v1124_v28 = vld [vmem:[%s1447_s3 + $0x20] sm:$0xff]  }
  0x1e   :  { %974 = vmatprep.subr.bf16.mxu1 %v1086_v29  ;;  %v1125_v29 = vld [vmem:[%s1447_s3 + $0x18] sm:$0xff]   ;;  %v1128_v32 = vld [vmem:[%s1447_s3] sm:$0xff]  }
  0x1f   :  { %v929_v13 = vld [vmem:[%s1449_s4] ss:$0 sm:$0xff] }
  0x20   :  { %953 = vmatpush3.bf16.msra.mxu0 %v1087_v30  ;;  %v1126_v30 = vld [vmem:[%s1447_s3 + $0x10] sm:$0xff]  }
  0x21   :  { %975 = vmatpush3.bf16.msra.mxu1 %v1088_v31  ;;  %982 = vmatprep.subr.bf16.mxu0 %v1089_v44  ;;  %v1127_v31 = vld [vmem:[%s1447_s3 + $0x8] sm:$0xff]  }
  0x22   :  { %1004 = vmatprep.subr.bf16.mxu1 %v1090_v45 }
  0x23   :  { %597 = vmatmul.mubr.bf16.vlgmr.msra.gmra.mxu0 %v165_v40  ;;  %v862_v40 = vld [vmem:[%s1448_s2] ss:$0 sm:$0xff] }
  0x24   :  { %638 = vmatmul.mubr.bf16.vlgmr.msra.gmra.mxu1 %v167_v43  ;;  %983 = vmatpush3.bf16.msra.mxu0 %v1091_v46 }
  0x25   :  { %1005 = vmatpush3.bf16.msra.mxu1 %v1092_v47  ;;  %984 = vmatprep.subr.bf16.mxu0 %v1093_v48 }
  0x26   :  { %1006 = vmatprep.subr.bf16.mxu1 %v1094_v49  ;;  %678 = vmatprep.mubr.bf16.mxu0 %v170_v16 }
  0x27   :  { %719 = vmatprep.mubr.bf16.mxu1 %v172_v17 }
  0x28   :  { %985 = vmatpush3.bf16.msra.mxu0 %v1095_v50 }
  0x29   :  { %1007 = vmatpush3.bf16.msra.mxu1 %v1096_v51  ;;  %986 = vmatprep.subr.bf16.mxu0 %v1097_v52 }
  0x2a   :  { %1008 = vmatprep.subr.bf16.mxu1 %v1098_v53 }
  0x2c   :  { %987 = vmatpush3.bf16.msra.mxu0 %v1099_v54 }
  0x2d   :  { %1009 = vmatpush3.bf16.msra.mxu1 %v1100_v55  ;;  %988 = vmatprep.subr.bf16.mxu0 %v1101_v56 }
  0x2e   :  { %1010 = vmatprep.subr.bf16.mxu1 %v1102_v57 }
  0x30   :  { %989 = vmatpush3.bf16.msra.mxu0 %v1103_v58 }
  0x31   :  { %1011 = vmatpush3.bf16.msra.mxu1 %v1104_v59  ;;  %990 = vmatprep.subr.bf16.mxu0 %v1105_v60 }
  0x32   :  { %1012 = vmatprep.subr.bf16.mxu1 %v1106_v61 }
  0x34   :  { %991 = vmatpush3.bf16.msra.mxu0 %v1107_v62 }
  0x35   :  { %1013 = vmatpush3.bf16.msra.mxu1 %v1108_v63  ;;  %992 = vmatprep.subr.bf16.mxu0 %v1109_v0 }
  0x36   :  { %1014 = vmatprep.subr.bf16.mxu1 %v1110_v1 }
  0x38   :  { %993 = vmatpush3.bf16.msra.mxu0 %v1111_v2 }
  0x39   :  { %1015 = vmatpush3.bf16.msra.mxu1 %v1112_v3  ;;  %994 = vmatprep.subr.bf16.mxu0 %v1113_v4 }
  0x3a   :  { %1016 = vmatprep.subr.bf16.mxu1 %v1114_v5 }
  0x3c   :  { %995 = vmatpush3.bf16.msra.mxu0 %v1115_v6 }
  0x3d   :  { %1017 = vmatpush3.bf16.msra.mxu1 %v1116_v7  ;;  %996 = vmatprep.subr.bf16.mxu0 %v1117_v8 }
  0x3e   :  { %1018 = vmatprep.subr.bf16.mxu1 %v1118_v9 }
  0x40   :  { %997 = vmatpush3.bf16.msra.mxu0 %v1119_v10 }
  0x41   :  { %1019 = vmatpush3.bf16.msra.mxu1 %v1120_v11  ;;  %1035 = vmatprep.subr.bf16.mxu0 %v1137_v25 }
  0x43   :  { %679 = vmatmul.mubr.bf16.vlgmr.msra.gmra.mxu0 %v169_v21 }
  0x44   :  { %720 = vmatmul.mubr.bf16.vlgmr.msra.gmra.mxu1 %v171_v23  ;;  %1036 = vmatpush3.bf16.msra.mxu0 %v1121_v24 }
  0x45   :  { %1037 = vmatprep.subr.bf16.mxu0 %v1137_v25  ;;  %1051 = vmatprep.mubr.msk.bf16.mxu0 %vm1138_vm0, %v1137_v25 }
  0x48   :  { %1038 = vmatpush3.bf16.msra.mxu0 %v1122_v26 }
  0x49   :  { %1039 = vmatprep.subr.bf16.mxu0 %v1137_v25 }
  0x4c   :  { %1040 = vmatpush3.bf16.msra.mxu0 %v1123_v27 }
  0x4d   :  { %1041 = vmatprep.subr.bf16.mxu0 %v1137_v25 }
  0x50   :  { %1042 = vmatpush3.bf16.msra.mxu0 %v1124_v28 }
  0x51   :  { %1043 = vmatprep.subr.bf16.mxu0 %v1137_v25 }
  0x54   :  { %1044 = vmatpush3.bf16.msra.mxu0 %v1125_v29 }
  0x55   :  { %1045 = vmatprep.subr.bf16.mxu0 %v1137_v25 }
  0x58   :  { %1046 = vmatpush3.bf16.msra.mxu0 %v1126_v30 }
  0x59   :  { %1047 = vmatprep.subr.bf16.mxu0 %v1137_v25 }
  0x5c   :  { %1048 = vmatpush3.bf16.msra.mxu0 %v1127_v31 }
  0x5d   :  { %1049 = vmatprep.subr.bf16.mxu0 %v1137_v25 }
  0x60   :  { %1050 = vmatpush3.bf16.msra.mxu0 %v1128_v32 }
  0xe3   :  { %v954_v33 = vpop.f32.mrf.mxu0 }
  0xe4   :  { %v976_v34 = vpop.f32.mrf.mxu1 }
  0xe5   :  { %v955_v35 = vpop.f32.mrf.mxu0 }
  0xe6   :  { %v977_v36 = vpop.f32.mrf.mxu1  ;;  %v956_v38 = vadd.f32 %v955_v35, %v954_v33 }
  0xe7   :  { %v957_v37 = vpop.f32.mrf.mxu0  ;;  %v978_v43 = vadd.f32 %v977_v36, %v976_v34 }
  0xe8   :  { %v979_v39 = vpop.f32.mrf.mxu1  ;;  %v599_v42 = vadd.f32 %v956_v38, %v862_v40 }
  0xe9   :  { %v958_v41 = vpop.f32.mrf.mxu0 }
  0xea   :  { %v959_v44 = vadd.f32 %v958_v41, %v957_v37  ;;  %v980_v45 = vpop.f32.mrf.mxu1  ;;  %v640_v49 = vadd.f32 %v978_v43, %v599_v42 }
  0xeb   :  { %v981_v54 = vadd.f32 %v980_v45, %v979_v39 }
  0xec   :  { %v602_v50 = vadd.f32 %v959_v44, %v862_v40 }
  0xee   :  { %v643_v59 = vadd.f32 %v981_v54, %v602_v50 }
 0x103   :  { %v998_v46 = vpop.f32.mrf.mxu0 }
 0x104   :  { %v1020_v47 = vpop.f32.mrf.mxu1 }
 0x105   :  { %v999_v48 = vpop.f32.mrf.mxu0 }
 0x106   :  { %v1000_v51 = vadd.f32 %v999_v48, %v998_v46  ;;  %v1021_v52 = vpop.f32.mrf.mxu1 }
 0x107   :  { %v1001_v53 = vpop.f32.mrf.mxu0  ;;  %v1022_v56 = vadd.f32 %v1021_v52, %v1020_v47 }
 0x108   :  { %v681_v55 = vadd.f32 %v1000_v51, %v640_v49  ;;  %v1023_v57 = vpop.f32.mrf.mxu1 }
 0x109   :  { %v1002_v58 = vpop.f32.mrf.mxu0 }
 0x10a   :  { %v722_v60 = vadd.f32 %v1022_v56, %v681_v55  ;;  %v1003_v61 = vadd.f32 %v1002_v58, %v1001_v53  ;;  %v1024_v62 = vpop.f32.mrf.mxu1 }
 0x10b   :  { %v1025_v1 = vadd.f32 %v1024_v62, %v1023_v57 }
 0x10c   :  { %v927_v63 = vmul.f32 -1.442695, %v722_v60  ;;  %v684_v0 = vadd.f32 %v1003_v61, %v643_v59 }
 0x10e   :  { %1129 = vpow2.f32 %v927_v63  ;;  %v725_v2 = vadd.f32 %v1025_v1, %v684_v0 }
 0x110   :  { %v928_v3 = vmul.f32 -1.442695, %v725_v2 }
 0x112   :  { %1131 = vpow2.f32 %v928_v3 }
 0x11b   :  { %v1130_v4 = vpop.eup %1129 }
 0x11c   :  { %v734_v5 = vadd.f32 1.0, %v1130_v4 }
 0x11e   :  { %1133 = vrcp.f32 %v734_v5 }
 0x11f   :  { %v1132_v6 = vpop.eup %1131 }
 0x120   :  { %v735_v7 = vadd.f32 1.0, %v1132_v6 }
 0x122   :  { %1135 = vrcp.f32 %v735_v7 }
 0x12b   :  { %v1134_v8 = vpop.eup %1133 }
 0x12c   :  { %v740_v10 = vmul.f32 %v1134_v8, %v722_v60 }
 0x12f   :  { %v1136_v9 = vpop.eup %1135 }
 0x130   :  { %v741_v11 = vmul.f32 %v1136_v9, %v725_v2 }
 0x132   :  { %v758_v12 = vpack.c.bf16 %v741_v11, %v740_v10 }
 0x134   :  { %1052 = vmatmul.mubr.bf16.vlgmr.msra.gmra.mxu0 %v758_v12 }
 0x1f4   :  { %v848_v14 = vpop.f32.mrf.mxu0 }
 0x1f5   :  { %v849_v15 = vadd.f32 %v929_v13, %v848_v14 }
 0x1f6   :  { %v1053_v16 = vpop.f32.mrf.mxu0 }
 0x1f7   :  { %856 = vst.msk [vmem:[%s1450_s5] sm:$0xff] %vm855_vm1, %v849_v15 }
 0x1f8   :  { %v851_v17 = vpop.f32.mrf.mxu0 }
 0x1f9   :  { %v852_v18 = vadd.f32 %v929_v13, %v851_v17 }
 0x1fa   :  { %v1054_v19 = vpop.f32.mrf.mxu0 }
 0x1fb   :  { %857 = vst.msk [vmem:[%s1450_s5 + $0x8] sm:$0xff] %vm855_vm1, %v852_v18 }

// kernel: branch_0_fun.6
= control target key start
LH: loop header
LB: loop body
LE: loop exit
PB: predicated region body
PF: predicated region fallthrough
CT: control target
= control target key end

     0   :  { %s2170_s24 = smov 0   ;;  %s2434_s0 = inlined_call_operand.vmem [shape: f32[2,8,32], index: 0, kind: input, shape index: {}]   ;;  %s2435_s1 = inlined_call_operand.vmem [shape: f32[2,1,32], index: 1, kind: input, shape index: {}]   ;;  %s2436_s2 = inlined_call_operand.vmem [shape: f32[2,1,32], index: 2, kind: input, shape index: {}]   ;;  %s2437_s3 = inlined_call_operand.vmem [shape: bf16[2,32,32], index: 3, kind: input, shape index: {}]   ;;  %s2438_s4 = inlined_call_operand.vmem [shape: f32[2,1,32], index: 4, kind: input, shape index: {}]   ;;  %s2439_s5 = inlined_call_operand.vmem [shape: bf16[2,32,32], index: 5, kind: input, shape index: {}]   ;;  %s2440_s6 = inlined_call_operand.vmem [shape: f32[2,1,32], index: 6, kind: input, shape index: {}]   ;;  %s2441_s7 = inlined_call_operand.vmem [shape: bf16[2,32,32], index: 7, kind: input, shape index: {}]   ;;  %s2442_s8 = inlined_call_operand.vmem [shape: f32[2,1,32], index: 8, kind: input, shape index: {}]   ;;  %s2443_s9 = inlined_call_operand.vmem [shape: bf16[2,32,32], index: 9, kind: input, shape index: {}]   ;;  %s2444_s10 = inlined_call_operand.vmem [shape: f32[2,1,32], index: 10, kind: input, shape index: {}]   ;;  %s2445_s11 = inlined_call_operand.vmem [shape: f32[2,1,32], index: 11, kind: input, shape index: {}]   ;;  %s2446_s12 = inlined_call_operand.vmem [shape: f32[2,1,32], index: 12, kind: input, shape index: {}]   ;;  %s2447_s13 = inlined_call_operand.vmem [shape: bf16[2,32,128], index: 13, kind: input, shape index: {}]   ;;  %s2448_s14 = inlined_call_operand.vmem [shape: f32[2,1,128], index: 14, kind: input, shape index: {}]   ;;  %s2449_s15 = inlined_call_operand.vmem [shape: bf16[2,128,32], index: 15, kind: input, shape index: {}]   ;;  %s2450_s16 = inlined_call_operand.vmem [shape: f32[2,1,32], index: 16, kind: input, shape index: {}]   ;;  %s2451_s17 = inlined_call_operand.vmem [shape: f32[2,8,32], index: 17, kind: output, shape index: {}]  }
   0x1   :  { %2456 = sst [smem:[#allocation3_spill]] %s2434_s0 }
   0x2   :  { %2457 = sst [smem:[#allocation4_spill]] %s2435_s1 }
   0x3   :  { %2458 = sst [smem:[#allocation5_spill]] %s2436_s2 }
   0x4   :  { %2459 = sst [smem:[#allocation6_spill]] %s2437_s3 }
   0x5   :  { %2460 = sst [smem:[#allocation7_spill]] %s2438_s4 }
   0x6   :  { %2461 = sst [smem:[#allocation8_spill]] %s2439_s5 }
   0x7   :  { %2462 = sst [smem:[#allocation9_spill]] %s2441_s7 }
   0x8   :  { %2463 = sst [smem:[#allocation10_spill]] %s2443_s9 }
   0x9   :  { %2464 = sst [smem:[#allocation11_spill]] %s2450_s16 }
   0xa   :  { %2465 = sst [smem:[#allocation12_spill]] %s2451_s17 }
   0xb LB: > { %2466 = sst [smem:[#allocation2_spill]] %s2076_s24  ;;  %s1840_s25 = sadd.s32 4294967295, %s2076_s24   ;;  %s2076_s24 = sphi %s2170_s24, %s27_s24  }
   0xc   : > { %p1843_p0 = scmp.ge.s32.totalorder %s2076_s24, 1  ;;  %p612_p1 = scmp.lt.s32.totalorder %s2076_s24, 3 }
   0xe   : > { %p613_p2 = pnand %p1843_p0, %p612_p1 }
   0xf   : > { %p714_p3 = scmp.lt.s32.totalorder (!%p613_p2), %s1840_s25, 1  ;;  %s2470_s3 = sld [smem:[#allocation6_spill]] (!%p613_p2) }
  0x10   : > { %616 = sbr.rel (%p613_p2) target bundleno = 2216 (0x8a8), region = 88  ;;  %s2471_s5 = sld [smem:[#allocation8_spill]] (!%p613_p2) }
  0x11   : > { %s2472_s7 = sld [smem:[#allocation9_spill]] (!%p613_p2)  ;;  %p1856_p4 = scmp.ne.s32.totalorder (!%p613_p2), %s1840_s25, 0 }
  0x12   : > { %s2473_s9 = sld [smem:[#allocation10_spill]] (!%p613_p2) }
  0x13   : > { %s2474_s30 = sld [smem:[#allocation11_spill]] (!%p613_p2) }
  0x15   : > { %s2178_s26 = scalar_select %p714_p3, %s1840_s25, 1 }
  0x16   : > { %s2476_s17 = sld [smem:[#allocation12_spill]] (!%p1856_p4) }
  0x17   : > { %s1900_s1 = sshll.u32 %s2178_s26, 4 }
  0x18   : > { %s2196_s28 = scalar_lea.vmem %s2470_s3, %s1900_s1  ;;  %s2201_s16 = scalar_lea.vmem %s2471_s5, %s1900_s1 }
  0x19   : > { %s2210_s2 = scalar_lea.vmem %s2472_s7, %s1900_s1  ;;  %s2219_s3 = scalar_lea.vmem %s2473_s9, %s1900_s1 }
  0x1a   : > { %s757_s7 = scalar_lea.vmem %s2446_s12, %s2178_s26  ;;  %s2236_s21 = scalar_lea.vmem %s2447_s13, %s1900_s1 }
  0x1b   : > { %s1905_s9 = sshll.u32 %s2178_s26, 6  ;;  %s773_s19 = scalar_lea.vmem %s2474_s30, %s2178_s26 }
  0x1c   : > { %s2246_s5 = scalar_lea.vmem %s2449_s15, %s1905_s9  ;;  %778 = sbr.rel (%p1856_p4) target bundleno = 37 (0x25), region = 92 }
  0x1d   : > { %s2475_s1 = sld [smem:[#allocation3_spill]] (!%p1856_p4) }
  0x21   : > { %vm781_vm0 = vcmask 261120  }
  0x23   : > { %v779_v0 = vld [vmem:[%s2475_s1] sm:$0xff]  ;;  %v780_v1 = vld [vmem:[%s2475_s1 + $0x8] sm:$0xff] }
  0x24   : > { %782 = vst.msk [vmem:[%s2476_s17] sm:$0xff] %vm781_vm0, %v779_v0  ;;  %783 = vst.msk [vmem:[%s2476_s17 + $0x8] sm:$0xff] %vm781_vm0, %v780_v1 }
  0x25 PF: > { %s2477_s0 = sld [smem:[#allocation12_spill]]  ;;  %vm788_vm1 = vcmask 261120   ;;  %v2028_v16 = vld [vmem:[%s2196_s28 + $0x8] sm:$0xff]   ;;  %v2078_v17 = vmov 0.0   ;;  %vm2079_vm2 = vmmov 0   ;;  %v2029_v18 = vld [vmem:[%s2196_s28] sm:$0xff]   ;;  %s2482_s24 = scalar_lea.vmem %s2440_s6, %s2178_s26 }
  0x26   : > { %1938 = vmatprep.subr.bf16.mxu1 %v2078_v17  ;;  %1942 = vmatprep.mubr.msk.bf16.mxu1 %vm2079_vm2, %v2078_v17  ;;  %s2478_s4 = sld [smem:[#allocation4_spill]]  ;;  %v2030_v35 = vld [vmem:[%s2201_s16 + $0x8] sm:$0xff]   ;;  %v2031_v37 = vld [vmem:[%s2201_s16] sm:$0xff]   ;;  %vm1180_vm3 = vcmask 64512   ;;  %s2486_s27 = scalar_lea.vmem %s2444_s10, %s2178_s26 }
  0x27   : > { %1939 = vmatpush3.bf16.msra.mxu1 %v2028_v16  ;;  %1972 = vmatprep.subr.mxu0 %v2078_v17  ;;  %s2480_s17 = sld [smem:[#allocation5_spill]]  ;;  %v2032_v38 = vld [vmem:[%s2210_s2 + $0x8] sm:$0xff]   ;;  %v2033_v39 = vld [vmem:[%s2210_s2] sm:$0xff]  }
  0x28   : > { %1940 = vmatprep.subr.bf16.mxu1 %v2078_v17  ;;  %1974 = vmatprep.mubr.msk.f32.mxu0 %vm2079_vm2, %v2078_v17  ;;  %v1863_v44 = vld [vmem:[%s2482_s24] ss:$0 sm:$0xff]  ;;  %s2483_s29 = sld [smem:[#allocation7_spill]]  ;;  %s2488_s24 = scalar_lea.vmem %s2448_s14, %s2178_s26 }
  0x2b   : > { %v2267_v2 = vld [vmem:[%s2477_s0] sm:$0xff]  ;;  %v2272_v3 = vld [vmem:[%s2477_s0 + $0x8] sm:$0xff]  ;;  %1941 = vmatpush3.bf16.msra.mxu1 %v2029_v18 }
  0x2c   : > { %v789_v4 = vsel %vm788_vm1, %v2267_v2, 0.0  ;;  %v792_v5 = vsel %vm788_vm1, %v2272_v3, 0.0  ;;  %1946 = vmatprep.subr.bf16.mxu1 %v2078_v17  ;;  %s2479_s20 = scalar_lea.vmem %s2478_s4, %s2178_s26  ;;  %s2485_s4 = scalar_lea.vmem %s2442_s8, %s2178_s26 }
  0x2d   : > { %790 = vadd.xlane.f32.xlu0 %v789_v4  ;;  %v1857_v27 = vld [vmem:[%s2479_s20] ss:$0 sm:$0xff]  ;;  %s2481_s9 = scalar_lea.vmem %s2480_s17, %s2178_s26 }
  0x2e   : > { %v1858_v31 = vld [vmem:[%s2481_s9] ss:$0 sm:$0xff]  ;;  %s2484_s18 = scalar_lea.vmem %s2483_s29, %s2178_s26 }
  0x2f   : > { %v1859_v46 = vld [vmem:[%s2484_s18] ss:$0 sm:$0xff] }
  0x30   : > { %v1867_v53 = vld [vmem:[%s2485_s4] ss:$0 sm:$0xff] }
  0x31   : > { %793 = vadd.xlane.f32.xlu0 %v792_v5 }
  0xb6   : > { %v791_v6 = vpop.xlane.xlu0 %790 }
  0xb7   : > { %v796_v7 = vmul.f32 0.03125, %v791_v6 }
  0xb9   : > { %v798_v8 = vsub.f32 %v2267_v2, %v796_v7 }
  0xba   : > { %v794_v9 = vpop.xlane.xlu0 %793 }
  0xbb   : > { %v797_v10 = vmul.f32 0.03125, %v794_v9  ;;  %v800_v11 = vmul.f32 %v798_v8, %v798_v8 }
  0xbd   : > { %v799_v12 = vsub.f32 %v2272_v3, %v797_v10  ;;  %v802_v13 = vsel %vm788_vm1, %v800_v11, 0.0 }
  0xbe   : > { %803 = vadd.xlane.f32.xlu1 %v802_v13 }
  0xbf   : > { %v801_v14 = vmul.f32 %v799_v12, %v799_v12 }
  0xc1   : > { %v805_v15 = vsel %vm788_vm1, %v801_v14, 0.0 }
  0xc2   : > { %806 = vadd.xlane.f32.xlu1 %v805_v15 }
 0x147   : > { %v804_v19 = vpop.xlane.xlu1 %803 }
 0x148   : > { %v808_v20 = vmul.f32 0.03125, %v804_v19 }
 0x14a   : > { %v810_v21 = vadd.f32 1e-05, %v808_v20 }
 0x14b   : > { %v807_v22 = vpop.xlane.xlu1 %806 }
 0x14c   : > { %2046 = vrsqrt.f32 %v810_v21  ;;  %v809_v23 = vmul.f32 0.03125, %v807_v22  ;;  %v2034_v22 = vld [vmem:[%s2219_s3 + $0x8] sm:$0xff]  }
 0x14e   : > { %v811_v24 = vadd.f32 1e-05, %v809_v23  ;;  %v2035_v23 = vld [vmem:[%s2219_s3] sm:$0xff]  }
 0x150   : > { %2048 = vrsqrt.f32 %v811_v24 }
 0x159   : > { %v2047_v25 = vpop.eup %2046 }
 0x15a   : > { %v814_v26 = vmul.f32 %v2047_v25, %v798_v8 }
 0x15c   : > { %v822_v30 = vmul.f32 %v1857_v27, %v814_v26 }
 0x15d   : > { %v2049_v28 = vpop.eup %2048 }
 0x15e   : > { %v815_v29 = vmul.f32 %v2049_v28, %v799_v12  ;;  %v830_v33 = vadd.f32 %v1858_v31, %v822_v30 }
 0x160   : > { %v823_v32 = vmul.f32 %v1857_v27, %v815_v29  ;;  %v1877_v29 = vld [vmem:[%s2486_s27] ss:$0 sm:$0xff] }
 0x162   : > { %v831_v34 = vadd.f32 %v1858_v31, %v823_v32 }
 0x164   : > { %v836_v36 = vpack.c.bf16 %v831_v34, %v830_v33 }
 0x166   : > { %1943 = vmatmul.mubr.msk.bf16.vlgmr.msra.gmra.mxu1 %vm788_vm1, %v836_v36 }
 0x167   : > { %1947 = vmatpush3.bf16.msra.mxu1 %v2030_v35  ;;  %1950 = vmatprep.mubr.msk.bf16.mxu1 %vm2079_vm2, %v2078_v17 }
 0x168   : > { %1948 = vmatprep.subr.bf16.mxu1 %v2078_v17 }
 0x16b   : > { %1949 = vmatpush3.bf16.msra.mxu1 %v2031_v37 }
 0x16c   : > { %1954 = vmatprep.subr.bf16.mxu1 %v2078_v17 }
 0x16e   : > { %1951 = vmatmul.mubr.msk.bf16.vlgmr.msra.gmra.mxu1 %vm788_vm1, %v836_v36 }
 0x16f   : > { %1955 = vmatpush3.bf16.msra.mxu1 %v2032_v38  ;;  %1958 = vmatprep.mubr.msk.bf16.mxu1 %vm2079_vm2, %v2078_v17 }
 0x170   : > { %1956 = vmatprep.subr.bf16.mxu1 %v2078_v17 }
 0x173   : > { %1957 = vmatpush3.bf16.msra.mxu1 %v2033_v39 }
 0x174   : > { %1962 = vmatprep.subr.mxu1 %v2078_v17 }
 0x176   : > { %1959 = vmatmul.mubr.msk.bf16.vlgmr.msra.gmra.mxu1 %vm788_vm1, %v836_v36 }
 0x177   : > { %1964 = vmatprep.mubr.msk.f32.mxu1 %vm2079_vm2, %v2078_v17 }
 0x226   : > { %v893_v40 = vpop.f32.mrf.mxu1 }
 0x227   : > { %v894_v49 = vadd.f32 %v1859_v46, %v893_v40 }
 0x228   : > { %v1944_v41 = vpop.f32.mrf.mxu1 }
 0x22a   : > { %v896_v42 = vpop.f32.mrf.mxu1 }
 0x22b   : > { %v897_v54 = vadd.f32 %v1859_v46, %v896_v42 }
 0x22c   : > { %v1945_v43 = vpop.f32.mrf.mxu1 }
 0x22e   : > { %v957_v45 = vpop.f32.mrf.mxu1 }
 0x22f   : > { %v958_v47 = vadd.f32 %v1863_v44, %v957_v45 }
 0x230   : > { %v1952_v48 = vpop.f32.mrf.mxu1 }
 0x231   : > { %1963 = vmatpush3.xpose.msk.msra.mxu1 %vm788_vm1, %v958_v47  ;;  %v2036_v48 = vld [vmem:[%s2236_s21 + $0x8] sm:$0xff]  }
 0x232   : > { %v960_v50 = vpop.f32.mrf.mxu1  ;;  %1967 = vmatprep.subr.mxu1 %v2078_v17 }
 0x233   : > { %v961_v51 = vadd.f32 %v1863_v44, %v960_v50 }
 0x234   : > { %v1953_v52 = vpop.f32.mrf.mxu1  ;;  %1965 = vmatmul.mubr.msk.f32.vlgmr.msra.gmra.mxu1 %vm788_vm1, %v894_v49  ;;  %v2037_v49 = vld [vmem:[%s2236_s21] sm:$0xff]   ;;  %s2487_s21 = scalar_lea.vmem %s2445_s11, %s2178_s26 }
 0x235   : > { %1968 = vmatpush3.xpose.msk.msra.mxu1 %vm788_vm1, %v961_v51  ;;  %1969 = vmatprep.mubr.msk.f32.mxu1 %vm2079_vm2, %v2078_v17 }
 0x236   : > { %v1021_v55 = vpop.f32.mrf.mxu1  ;;  %1990 = vmatprep.subr.bf16.mxu1 %v2078_v17 }
 0x237   : > { %v1022_v56 = vadd.f32 %v1867_v53, %v1021_v55 }
 0x238   : > { %v1960_v57 = vpop.f32.mrf.mxu1  ;;  %1970 = vmatmul.mubr.msk.f32.vlgmr.msra.gmra.mxu1 %vm788_vm1, %v897_v54 }
 0x239   : > { %1973 = vmatpush3.msra.mxu0 %v1022_v56  ;;  %1994 = vmatprep.mubr.msk.bf16.mxu1 %vm2079_vm2, %v2078_v17 }
 0x23a   : > { %v1024_v58 = vpop.f32.mrf.mxu1  ;;  %1977 = vmatprep.subr.mxu0 %v2078_v17  ;;  %1991 = vmatpush3.bf16.msra.mxu1 %v2036_v48 }
 0x23b   : > { %v1025_v59 = vadd.f32 %v1867_v53, %v1024_v58  ;;  %1992 = vmatprep.subr.bf16.mxu1 %v2078_v17  ;;  %v1881_v58 = vld [vmem:[%s2487_s21] ss:$0 sm:$0xff] }
 0x23c   : > { %v1961_v60 = vpop.f32.mrf.mxu1 }
 0x23e   : > { %1993 = vmatpush3.bf16.msra.mxu1 %v2037_v49 }
 0x2f4   : > { %v1100_v61 = vpop.f32.mrf.mxu1 }
 0x2f5   : > { %v1181_v62 = vsel %vm1180_vm3, %v1100_v61, -inf }
 0x2f6   : > { %1182 = vmax.xlane.f32.xlu0 %v1181_v62  ;;  %v1966_v63 = vpop.f32.mrf.mxu1  ;;  %v1882_v62 = vld [vmem:[%s757_s7] ss:$0 sm:$0xff] }
 0x2f8   : > { %v1176_v0 = vpop.f32.mrf.mxu1 }
 0x2f9   : > { %v1184_v1 = vsel %vm1180_vm3, %v1176_v0, -inf }
 0x2fa   : > { %1185 = vmax.xlane.f32.xlu1 %v1184_v1  ;;  %v1971_v4 = vpop.f32.mrf.mxu1 }
 0x37f   : > { %v1183_v5 = vpop.xlane.xlu0 %1182 }
 0x380   : > { %v1187_v6 = vsub.f32 %v1100_v61, %v1183_v5  ;;  %v2038_v5 = vld [vmem:[%s2246_s5 + $0x38] sm:$0xff]  }
 0x382   : > { %v1189_v7 = vmul.f32 1.442695, %v1187_v6  ;;  %v2039_v6 = vld [vmem:[%s2246_s5 + $0x30] sm:$0xff]  }
 0x383   : > { %v1186_v8 = vpop.xlane.xlu1 %1185 }
 0x384   : > { %2050 = vpow2.f32 %v1189_v7  ;;  %v1188_v9 = vsub.f32 %v1176_v0, %v1186_v8  ;;  %v2040_v7 = vld [vmem:[%s2246_s5 + $0x28] sm:$0xff]   ;;  %v2041_v8 = vld [vmem:[%s2246_s5 + $0x20] sm:$0xff]  }
 0x386   : > { %v1191_v10 = vmul.f32 1.442695, %v1188_v9  ;;  %v2042_v9 = vld [vmem:[%s2246_s5 + $0x18] sm:$0xff]  }
 0x388   : > { %2052 = vpow2.f32 %v1191_v10  ;;  %v2043_v10 = vld [vmem:[%s2246_s5 + $0x10] sm:$0xff]  }
 0x391   : > { %v2051_v11 = vpop.eup %2050 }
 0x392   : > { %v1193_v12 = vsel %vm1180_vm3, %v2051_v11, 0.0 }
 0x393   : > { %1194 = vadd.xlane.f32.xlu0 %v1193_v12  ;;  %v2045_v12 = vld [vmem:[%s2246_s5] sm:$0xff]  }
 0x395   : > { %v2053_v13 = vpop.eup %2052 }
 0x396   : > { %v1196_v14 = vsel %vm1180_vm3, %v2053_v13, 0.0 }
 0x397   : > { %1197 = vadd.xlane.f32.xlu1 %v1196_v14 }
 0x41c   : > { %v1195_v15 = vpop.xlane.xlu0 %1194 }
 0x41d   : > { %2054 = vrcp.f32 %v1195_v15 }
 0x420   : > { %v1198_v16 = vpop.xlane.xlu1 %1197 }
 0x421   : > { %2056 = vrcp.f32 %v1198_v16 }
 0x42a   : > { %v2055_v18 = vpop.eup %2054 }
 0x42b   : > { %v1201_v19 = vmul.f32 %v2055_v18, %v2051_v11  ;;  %v2044_v11 = vld [vmem:[%s2246_s5 + $0x8] sm:$0xff]  }
 0x42d   : > { %1975 = vmatmul.mubr.msk.f32.vlgmr.msra.gmra.mxu0 %vm1180_vm3, %v1201_v19 }
 0x42e   : > { %v2057_v20 = vpop.eup %2056  ;;  %1978 = vmatpush3.msra.mxu0 %v1025_v59  ;;  %1979 = vmatprep.mubr.msk.f32.mxu0 %vm2079_vm2, %v2078_v17 }
 0x42f   : > { %v1202_v21 = vmul.f32 %v2057_v20, %v2053_v13  ;;  %1982 = vmatprep.subr.bf16.mxu0 %v2078_v17  ;;  %v1883_v13 = vld [vmem:[%s2488_s24] ss:$0 sm:$0xff] }
 0x431   : > { %1980 = vmatmul.mubr.msk.f32.vlgmr.msra.gmra.mxu0 %vm1180_vm3, %v1202_v21 }
 0x432   : > { %1986 = vmatprep.mubr.msk.bf16.mxu0 %vm2079_vm2, %v2078_v17  ;;  %1983 = vmatpush3.bf16.msra.mxu0 %v2034_v22 }
 0x433   : > { %1984 = vmatprep.subr.bf16.mxu0 %v2078_v17 }
 0x436   : > { %1985 = vmatpush3.bf16.msra.mxu0 %v2035_v23 }
 0x437   : > { %1998 = vmatprep.subr.bf16.mxu0 %v2078_v17 }
 0x4ed   : > { %v1272_v24 = vpop.f32.mrf.mxu0 }
 0x4ef   : > { %v1976_v25 = vpop.f32.mrf.mxu0 }
 0x4f1   : > { %v1345_v26 = vpop.f32.mrf.mxu0 }
 0x4f2   : > { %v1353_v27 = vpack.c.bf16 %v1345_v26, %v1272_v24 }
 0x4f3   : > { %v1981_v28 = vpop.f32.mrf.mxu0 }
 0x4f4   : > { %1987 = vmatmul.mubr.msk.bf16.vlgmr.msra.gmra.mxu0 %vm788_vm1, %v1353_v27 }
 0x4f5   : > { %2014 = vmatprep.mubr.msk.bf16.mxu0 %vm2079_vm2, %v2078_v17  ;;  %1999 = vmatpush3.bf16.msra.mxu0 %v2038_v5 }
 0x4f6   : > { %2000 = vmatprep.subr.bf16.mxu0 %v2078_v17 }
 0x4f9   : > { %2001 = vmatpush3.bf16.msra.mxu0 %v2039_v6 }
 0x4fa   : > { %2002 = vmatprep.subr.bf16.mxu0 %v2078_v17 }
 0x4fd   : > { %2003 = vmatpush3.bf16.msra.mxu0 %v2040_v7 }
 0x4fe   : > { %2004 = vmatprep.subr.bf16.mxu0 %v2078_v17 }
 0x501   : > { %2005 = vmatpush3.bf16.msra.mxu0 %v2041_v8 }
 0x502   : > { %2006 = vmatprep.subr.bf16.mxu0 %v2078_v17 }
 0x505   : > { %2007 = vmatpush3.bf16.msra.mxu0 %v2042_v9 }
 0x506   : > { %2008 = vmatprep.subr.bf16.mxu0 %v2078_v17 }
 0x509   : > { %2009 = vmatpush3.bf16.msra.mxu0 %v2043_v10 }
 0x50a   : > { %2010 = vmatprep.subr.bf16.mxu0 %v2078_v17 }
 0x50d   : > { %2011 = vmatpush3.bf16.msra.mxu0 %v2044_v11 }
 0x50e   : > { %2012 = vmatprep.subr.bf16.mxu0 %v2078_v17 }
 0x511   : > { %2013 = vmatpush3.bf16.msra.mxu0 %v2045_v12 }
 0x5b4   : > { %v1410_v30 = vpop.f32.mrf.mxu0 }
 0x5b5   : > { %v1411_v31 = vadd.f32 %v1877_v29, %v1410_v30 }
 0x5b6   : > { %v1988_v32 = vpop.f32.mrf.mxu0 }
 0x5b7   : > { %v2369_v33 = vadd.f32 %v1411_v31, %v2267_v2  ;;  %v1889_v31 = vld [vmem:[%s773_s19] ss:$0 sm:$0xff] }
 0x5b8   : > { %v1413_v34 = vpop.f32.mrf.mxu0 }
 0x5b9   : > { %v1414_v35 = vadd.f32 %v1877_v29, %v1413_v34  ;;  %v1421_v36 = vsel %vm788_vm1, %v2369_v33, 0.0 }
 0x5ba   : > { %1422 = vadd.xlane.f32.xlu0 %v1421_v36  ;;  %v1989_v37 = vpop.f32.mrf.mxu0 }
 0x5bb   : > { %v2374_v38 = vadd.f32 %v1414_v35, %v2272_v3 }
 0x5bd   : > { %v1424_v39 = vsel %vm788_vm1, %v2374_v38, 0.0 }
 0x5be   : > { %1425 = vadd.xlane.f32.xlu1 %v1424_v39 }
 0x643   : > { %v1423_v40 = vpop.xlane.xlu0 %1422 }
 0x644   : > { %v1427_v41 = vmul.f32 0.03125, %v1423_v40 }
 0x646   : > { %v1429_v2 = vsub.f32 %v2369_v33, %v1427_v41 }
 0x647   : > { %v1426_v42 = vpop.xlane.xlu1 %1425 }
 0x648   : > { %v1428_v43 = vmul.f32 0.03125, %v1426_v42  ;;  %v1431_v44 = vmul.f32 %v1429_v2, %v1429_v2 }
 0x64a   : > { %v1430_v45 = vsub.f32 %v2374_v38, %v1428_v43  ;;  %v1433_v46 = vsel %vm788_vm1, %v1431_v44, 0.0 }
 0x64b   : > { %1434 = vadd.xlane.f32.xlu0 %v1433_v46 }
 0x64c   : > { %v1432_v47 = vmul.f32 %v1430_v45, %v1430_v45 }
 0x64e   : > { %v1436_v3 = vsel %vm788_vm1, %v1432_v47, 0.0 }
 0x64f   : > { %1437 = vadd.xlane.f32.xlu1 %v1436_v3 }
 0x6d4   : > { %v1435_v50 = vpop.xlane.xlu0 %1434 }
 0x6d5   : > { %v1439_v51 = vmul.f32 0.03125, %v1435_v50 }
 0x6d7   : > { %v1441_v52 = vadd.f32 1e-05, %v1439_v51 }
 0x6d8   : > { %v1438_v53 = vpop.xlane.xlu1 %1437 }
 0x6d9   : > { %2058 = vrsqrt.f32 %v1441_v52  ;;  %v1440_v54 = vmul.f32 0.03125, %v1438_v53 }
 0x6db   : > { %v1442_v55 = vadd.f32 1e-05, %v1440_v54 }
 0x6dd   : > { %2060 = vrsqrt.f32 %v1442_v55 }
 0x6e6   : > { %v2059_v56 = vpop.eup %2058 }
 0x6e7   : > { %v1445_v57 = vmul.f32 %v2059_v56, %v1429_v2 }
 0x6e9   : > { %v1453_v61 = vmul.f32 %v1881_v58, %v1445_v57 }
 0x6ea   : > { %v2061_v59 = vpop.eup %2060 }
 0x6eb   : > { %v1446_v60 = vmul.f32 %v2061_v59, %v1430_v45  ;;  %v1461_v0 = vadd.f32 %v1882_v62, %v1453_v61 }
 0x6ed   : > { %v1454_v63 = vmul.f32 %v1881_v58, %v1446_v60 }
 0x6ef   : > { %v1462_v1 = vadd.f32 %v1882_v62, %v1454_v63 }
 0x6f1   : > { %v1467_v4 = vpack.c.bf16 %v1462_v1, %v1461_v0 }
 0x6f3   : > { %1995 = vmatmul.mubr.msk.bf16.vlgmr.msra.gmra.mxu1 %vm788_vm1, %v1467_v4 }
 0x7b3   : > { %v1524_v14 = vpop.f32.mrf.mxu1 }
 0x7b4   : > { %v1525_v15 = vadd.f32 %v1883_v13, %v1524_v14 }
 0x7b5   : > { %v1996_v16 = vpop.f32.mrf.mxu1 }
 0x7b6   : > { %v1887_v18 = vmul.f32 -1.442695, %v1525_v15 }
 0x7b7   : > { %v1527_v19 = vpop.f32.mrf.mxu1 }
 0x7b8   : > { %2062 = vpow2.f32 %v1887_v18  ;;  %v1528_v20 = vadd.f32 %v1883_v13, %v1527_v19 }
 0x7b9   : > { %v1997_v21 = vpop.f32.mrf.mxu1 }
 0x7ba   : > { %v1888_v22 = vmul.f32 -1.442695, %v1528_v20 }
 0x7bc   : > { %2064 = vpow2.f32 %v1888_v22 }
 0x7c5   : > { %v2063_v23 = vpop.eup %2062 }
 0x7c6   : > { %v1537_v17 = vadd.f32 1.0, %v2063_v23 }
 0x7c8   : > { %2066 = vrcp.f32 %v1537_v17 }
 0x7c9   : > { %v2065_v24 = vpop.eup %2064 }
 0x7ca   : > { %v1538_v25 = vadd.f32 1.0, %v2065_v24 }
 0x7cc   : > { %2068 = vrcp.f32 %v1538_v25 }
 0x7d5   : > { %v2067_v26 = vpop.eup %2066 }
 0x7d6   : > { %v1543_v28 = vmul.f32 %v2067_v26, %v1525_v15 }
 0x7d9   : > { %v2069_v27 = vpop.eup %2068 }
 0x7da   : > { %v1544_v29 = vmul.f32 %v2069_v27, %v1528_v20 }
 0x7dc   : > { %v1561_v30 = vpack.c.bf16 %v1544_v29, %v1543_v28 }
 0x7de   : > { %2015 = vmatmul.mubr.bf16.vlgmr.msra.gmra.mxu0 %v1561_v30 }
 0x89e   : > { %v1651_v32 = vpop.f32.mrf.mxu0 }
 0x89f   : > { %v1652_v34 = vadd.f32 %v1889_v31, %v1651_v32 }
 0x8a0   : > { %v2016_v35 = vpop.f32.mrf.mxu0 }
 0x8a1   : > { %v1658_v36 = vadd.f32 %v1652_v34, %v2369_v33 }
 0x8a2   : > { %v1654_v37 = vpop.f32.mrf.mxu0 }
 0x8a3   : > { %1660 = vst.msk [vmem:[%s2477_s0] sm:$0xff] %vm788_vm1, %v1658_v36  ;;  %v1655_v39 = vadd.f32 %v1889_v31, %v1654_v37 }
 0x8a4   : > { %v2017_v40 = vpop.f32.mrf.mxu0 }
 0x8a5   : > { %v1659_v41 = vadd.f32 %v1655_v39, %v2374_v38 }
 0x8a7   : > { %1661 = vst.msk [vmem:[%s2477_s0 + $0x8] sm:$0xff] %vm788_vm1, %v1659_v41 }
 0x8a8 PF: > { %s2490_s26 = sld [smem:[#allocation2_spill]] }
 0x8ae   : > { %s27_s24 = sadd.s32 1, %s2490_s26  }
 0x8af   : > { %p24_p5 = scmp.ge.s32.totalorder %s27_s24, 4  }
 0x8b1   :  { %26 = sbr.rel (!%p24_p5) target bundleno = 11 (0xb), region = 163 }

// kernel: motion_context_encoder_forward.1
= control target key start
LH: loop header
LB: loop body
LE: loop exit
PB: predicated region body
PF: predicated region fallthrough
CT: control target
= control target key end

     0   :  { %14 = vsyncpa [#allocation3], 0  ;;  %s777_s0 = inlined_call_operand.vmem [shape: f32[8,2], index: 0, kind: input, shape index: {}]   ;;  %s778_s1 = inlined_call_operand.vmem [shape: f32[2,64], index: 1, kind: input, shape index: {}]   ;;  %s779_s2 = inlined_call_operand.vmem [shape: f32[1,64], index: 2, kind: input, shape index: {}]   ;;  %s780_s3 = inlined_call_operand.vmem [shape: bf16[64,64], index: 3, kind: input, shape index: {}]   ;;  %s781_s4 = inlined_call_operand.hbm [shape: f32[1,64], index: 4, kind: input, shape index: {}]   ;;  %s782_s5 = inlined_call_operand.hbm [shape: bf16[64,64], index: 5, kind: input, shape index: {}]   ;;  %s783_s6 = inlined_call_operand.hbm [shape: f32[1,64], index: 6, kind: input, shape index: {}]   ;;  %s784_s7 = inlined_call_operand.hbm [shape: bf16[64,64], index: 7, kind: input, shape index: {}]   ;;  %s785_s8 = inlined_call_operand.hbm [shape: f32[1,64], index: 8, kind: input, shape index: {}]   ;;  %s786_s9 = inlined_call_operand.hbm [shape: f32[8,64], index: 9, kind: output, shape index: {}]  }
   0x1   :  { %15 = vsyncpa [#allocation6], 0 }
   0x2   :  { %16 = vsyncpa [#allocation9], 0 }
   0x3   :  { %17 = vsyncpa [#allocation4], 0  ;;  %s654_s30 = smov [#allocation5]  }
   0x4   :  { %s41_s10 = sshll.u32 %s654_s30, 4  ;;  %s42_s10 = int_to_ptr.vmem [resolvable:$true] %s41_s10 }
   0x5   :  { %s534_s11 = scalar_lea.vmem %s42_s10, 512  ;;  %p539_p1 = scmp.lt.s32.totalorder %s42_s10, %s42_s10 }
   0x6   :  { %p535_p0 = scmp.ne.s32.totalorder %s42_s10, %s534_s11  ;;  %p540_p2 = scmp.lt.s32.totalorder %s534_s11, %s534_s11 }
   0x8   :  { %p541_p3 = por %p540_p2, %p539_p1 }
   0xa   :  { %p542_p4 = pnand %p541_p3, %p535_p0 }
   0xc   :  { %545 = shalt.err (!%p542_p4)
}
   0xd   :  { %s655_s12 = smov 64   ;;  %s656_s13 = smov 4  }
   0xe   :  { %47 = dma.hbm_to_vmem [thread:$0]  %s782_s5, 512, %s42_s10, [#allocation6], %s655_s12, %s655_s12, %s656_s13  }
   0xf   :  { %s657_s16 = smov [#allocation8]   ;;  %s658_s18 = smov [#allocation2]  }
  0x10   :  { %s63_s17 = sshll.u32 %s657_s16, 4  ;;  %s32_s19 = sshll.u32 %s658_s18, 4  ;;  %s64_s17 = int_to_ptr.vmem [resolvable:$true] %s63_s17  ;;  %s33_s19 = int_to_ptr.vmem [resolvable:$true] %s32_s19 }
  0x11   :  { %s554_s20 = scalar_lea.vmem %s64_s17, 512  ;;  %p559_p6 = scmp.lt.s32.totalorder %s64_s17, %s64_s17 }
  0x12   :  { %p555_p5 = scmp.ne.s32.totalorder %s64_s17, %s554_s20  ;;  %p560_p7 = scmp.lt.s32.totalorder %s554_s20, %s554_s20 }
  0x14   :  { %p561_p8 = por %p560_p7, %p559_p6 }
  0x16   :  { %p562_p9 = pnand %p561_p8, %p555_p5 }
  0x18   :  { %565 = shalt.err (!%p562_p9)
}
  0x19   :  { %69 = dma.hbm_to_vmem [thread:$0]  %s784_s7, 512, %s64_s17, [#allocation9], %s655_s12, %s655_s12, %s656_s13  }
  0x1a   :  { %s574_s23 = scalar_lea.vmem %s33_s19, 16  ;;  %s578_s5 = scalar_lea.vmem %s33_s19, 32 }
  0x1b   :  { %p575_p10 = scmp.ne.s32.totalorder %s33_s19, %s574_s23  ;;  %p579_p11 = scmp.lt.s32.totalorder %s33_s19, %s33_s19 }
  0x1c   :  { %p580_p12 = scmp.lt.s32.totalorder %s578_s5, %s574_s23 }
  0x1e   :  { %p581_p13 = por %p580_p12, %p579_p11 }
  0x20   :  { %p582_p0 = pnand %p581_p13, %p575_p10 }
  0x22   :  { %585 = shalt.err (!%p582_p0)
}
  0x23   :  { %35 = dma.hbm_to_vmem [thread:$0]  %s781_s4, 16, %s33_s19, [#allocation3]  }
  0x24   :  { %s659_s26 = smov [#allocation7]   ;;  %s660_s28 = smov [#allocation10]  }
  0x25   :  { %s54_s27 = sshll.u32 %s659_s26, 4  ;;  %s76_s29 = sshll.u32 %s660_s28, 4  ;;  %s55_s27 = int_to_ptr.vmem [resolvable:$true] %s54_s27  ;;  %s77_s29 = int_to_ptr.vmem [resolvable:$true] %s76_s29 }
  0x26   :  { %s594_s30 = scalar_lea.vmem %s55_s27, 16  ;;  %s598_s7 = scalar_lea.vmem %s55_s27, 32 }
  0x27   :  { %p595_p1 = scmp.ne.s32.totalorder %s55_s27, %s594_s30  ;;  %p599_p2 = scmp.lt.s32.totalorder %s55_s27, %s55_s27 }
  0x28   :  { %p600_p3 = scmp.lt.s32.totalorder %s598_s7, %s594_s30 }
  0x2a   :  { %p601_p4 = por %p600_p3, %p599_p2 }
  0x2c   :  { %p602_p5 = pnand %p601_p4, %p595_p1 }
  0x2e   :  { %605 = shalt.err (!%p602_p5)
}
  0x2f   :  { %57 = dma.hbm_to_vmem [thread:$0]  %s783_s6, 16, %s55_s27, [#allocation6]  }
  0x30   :  { %s614_s12 = scalar_lea.vmem %s77_s29, 16  ;;  %s618_s4 = scalar_lea.vmem %s77_s29, 32 }
  0x31   :  { %p615_p6 = scmp.ne.s32.totalorder %s77_s29, %s614_s12  ;;  %p619_p7 = scmp.lt.s32.totalorder %s77_s29, %s77_s29 }
  0x32   :  { %p620_p8 = scmp.lt.s32.totalorder %s618_s4, %s614_s12 }
  0x34   :  { %p621_p9 = por %p620_p8, %p619_p7 }
  0x36   :  { %p622_p10 = pnand %p621_p9, %p615_p6 }
  0x38   :  { %625 = shalt.err (!%p622_p10)
}
  0x39   :  { %79 = dma.hbm_to_vmem [thread:$0]  %s785_s8, 16, %s77_s29, [#allocation9]  }
  0x3a   :  { %646 = dma.done.wait [#allocation3], 16  }
  0x3b   :  { %647 = vsyncadd [#allocation3], 4294967280 }
  0x3c   :  { %648 = dma.done.wait [#allocation6], 528  }
  0x3d   :  { %649 = vsyncadd [#allocation6], 4294966768 }
  0x3e   :  { %650 = dma.done.wait [#allocation9], 528  }
  0x3f   :  { %651 = vsyncadd [#allocation9], 4294966768  ;;  %v661_v0 = vmov 0   ;;  %v96_v1 = vld [vmem:[%s777_s0] sm:$0xff]  ;;  %v662_v2 = vmov 1   ;;  %v502_v3 = vld [vmem:[%s780_s3 + $0x18] sm:$0xff]   ;;  %v103_v8 = vlaneseq }
  0x40   :  { %500 = vset.pattern.permute.xlu0 %v661_v0  ;;  %v663_v4 = vmov 0.0   ;;  %v503_v5 = vld [vmem:[%s780_s3 + $0x10] sm:$0xff]   ;;  %v504_v6 = vld [vmem:[%s780_s3 + $0x8] sm:$0xff]   ;;  %v505_v7 = vld [vmem:[%s780_s3] sm:$0xff]   ;;  %vm664_vm0 = vmmov 0   ;;  %vm173_vm1 = vcmask 523264  }
  0x41   :  { %100 = vperm.xlu0 %500, %v96_v1   ;;  %452 = vmatprep.subr.bf16.mxu0 %v663_v4  ;;  %v104_v9 = vshrl.u32 %v103_v8, 7  ;;  %v97_v12 = vld [vmem:[%s778_s1] sm:$0x3]  ;;  %v507_v29 = vld [vmem:[#allocation5 + $0x10] sm:$0xff]   ;;  %v508_v30 = vld [vmem:[#allocation5 + $0x8] sm:$0xff]   ;;  %s665_s1 = smov [#allocation11]  }
  0x42   :  { %464 = vmatprep.subr.bf16.mxu1 %v663_v4  ;;  %453 = vmatpush3.bf16.msra.mxu0 %v502_v3  ;;  %v415_v19 = vld [vmem:[%s779_s2] ss:$0 sm:$0xff]  ;;  %v509_v31 = vld [vmem:[#allocation5] sm:$0xff]   ;;  %v511_v45 = vld [vmem:[#allocation8 + $0x10] sm:$0xff]   ;;  %s404_s2 = sshll.u32 %s665_s1, 4  ;;  %s405_s2 = int_to_ptr.vmem [resolvable:$true] %s404_s2 }
  0x43   :  { %454 = vmatprep.subr.bf16.mxu0 %v663_v4  ;;  %460 = vmatprep.mubr.msk.bf16.mxu0 %vm664_vm0, %v663_v4  ;;  %v105_v10 = vsub.s32 0, %v104_v9  ;;  %v114_v11 = vsub.s32 1, %v104_v9  ;;  %v506_v28 = vld [vmem:[#allocation5 + $0x18] sm:$0xff]   ;;  %v512_v46 = vld [vmem:[#allocation8 + $0x8] sm:$0xff]   ;;  %v513_v47 = vld [vmem:[#allocation8] sm:$0xff]   ;;  %s626_s24 = scalar_lea.vmem %s405_s2, 128  ;;  %p631_p12 = scmp.lt.s32.totalorder %s405_s2, %s405_s2 }
  0x44   :  { %472 = vmatprep.mubr.msk.bf16.mxu1 %vm664_vm0, %v663_v4  ;;  %465 = vmatpush3.bf16.msra.mxu1 %v506_v28  ;;  %v417_v32 = vld [vmem:[#allocation2] ss:$0 sm:$0xff]  ;;  %v424_v48 = vld [vmem:[#allocation7] ss:$0 sm:$0xff]  ;;  %v431_v60 = vld [vmem:[#allocation10] ss:$0 sm:$0xff]  ;;  %p627_p11 = scmp.ne.s32.totalorder %s405_s2, %s626_s24  ;;  %p632_p13 = scmp.lt.s32.totalorder %s626_s24, %s626_s24 }
  0x45   :  { %501 = vset.pattern.permute.xlu0 %v662_v2  ;;  %v106_v14 = vrot.slane %v97_v12, %v105_v10  ;;  %v115_v15 = vrot.slane %v97_v12, %v114_v11  ;;  %466 = vmatprep.subr.bf16.mxu1 %v663_v4  ;;  %v510_v44 = vld [vmem:[#allocation8 + $0x18] sm:$0xff]  }
  0x46   :  { %109 = vperm.xlu0 %501, %v96_v1   ;;  %455 = vmatpush3.bf16.msra.mxu0 %v503_v5  ;;  %p633_p0 = por %p632_p13, %p631_p12 }
  0x47   :  { %456 = vmatprep.subr.bf16.mxu0 %v663_v4 }
  0x48   :  { %467 = vmatpush3.bf16.msra.mxu1 %v507_v29  ;;  %p634_p1 = pnand %p633_p0, %p627_p11 }
  0x49   :  { %468 = vmatprep.subr.bf16.mxu1 %v663_v4 }
  0x4a   :  { %457 = vmatpush3.bf16.msra.mxu0 %v504_v6 }
  0x4b   :  { %458 = vmatprep.subr.bf16.mxu0 %v663_v4 }
  0x4c   :  { %469 = vmatpush3.bf16.msra.mxu1 %v508_v30 }
  0x4d   :  { %470 = vmatprep.subr.bf16.mxu1 %v663_v4 }
  0x4e   :  { %459 = vmatpush3.bf16.msra.mxu0 %v505_v7 }
  0x4f   :  { %476 = vmatprep.subr.bf16.mxu0 %v663_v4 }
  0x50   :  { %471 = vmatpush3.bf16.msra.mxu1 %v509_v31 }
  0xbc   :  { %v101_v13 = vpop.permute.xlu0 %100 }
  0xbd   :  { %v107_v17 = vmul.f32 %v106_v14, %v101_v13 }
  0xc1   :  { %v110_v16 = vpop.permute.xlu0 %109 }
  0xc2   :  { %v116_v18 = vmul.f32 %v115_v15, %v110_v16 }
  0xc4   :  { %v117_v20 = vadd.f32 %v116_v18, %v107_v17 }
  0xc6   :  { %v125_v21 = vadd.f32 %v415_v19, %v117_v20 }
  0xc8   :  { %v416_v22 = vmul.f32 -1.442695, %v125_v21 }
  0xca   :  { %514 = vpow2.f32 %v416_v22 }
  0xd7   :  { %v515_v23 = vpop.eup %514 }
  0xd8   :  { %v129_v24 = vadd.f32 1.0, %v515_v23 }
  0xda   :  { %516 = vrcp.f32 %v129_v24 }
  0xe7   :  { %v517_v25 = vpop.eup %516 }
  0xe8   :  { %v132_v26 = vmul.f32 %v517_v25, %v125_v21 }
  0xea   :  { %v141_v27 = vpack.c.bf16 %v132_v26, %v132_v26 }
  0xec   :  { %461 = vmatmul.mubr.msk.bf16.vlgmr.msra.gmra.mxu0 %vm173_vm1, %v141_v27 }
  0xed   :  { %484 = vmatprep.mubr.msk.bf16.mxu0 %vm664_vm0, %v663_v4  ;;  %477 = vmatpush3.bf16.msra.mxu0 %v510_v44 }
  0xee   :  { %478 = vmatprep.subr.bf16.mxu0 %v663_v4 }
  0xf1   :  { %479 = vmatpush3.bf16.msra.mxu0 %v511_v45 }
  0xf2   :  { %480 = vmatprep.subr.bf16.mxu0 %v663_v4 }
  0xf5   :  { %481 = vmatpush3.bf16.msra.mxu0 %v512_v46 }
  0xf6   :  { %482 = vmatprep.subr.bf16.mxu0 %v663_v4 }
  0xf9   :  { %483 = vmatpush3.bf16.msra.mxu0 %v513_v47 }
 0x1ac   :  { %v211_v33 = vpop.f32.mrf.mxu0 }
 0x1ad   :  { %v212_v34 = vadd.f32 %v417_v32, %v211_v33 }
 0x1ae   :  { %v462_v35 = vpop.f32.mrf.mxu0 }
 0x1af   :  { %v423_v36 = vmul.f32 -1.442695, %v212_v34 }
 0x1b0   :  { %v214_v37 = vpop.f32.mrf.mxu0 }
 0x1b1   :  { %518 = vpow2.f32 %v423_v36 }
 0x1b2   :  { %v463_v38 = vpop.f32.mrf.mxu0 }
 0x1be   :  { %v519_v39 = vpop.eup %518 }
 0x1bf   :  { %v220_v40 = vadd.f32 1.0, %v519_v39 }
 0x1c1   :  { %520 = vrcp.f32 %v220_v40 }
 0x1ce   :  { %v521_v41 = vpop.eup %520 }
 0x1cf   :  { %v223_v42 = vmul.f32 %v521_v41, %v212_v34 }
 0x1d1   :  { %v232_v43 = vpack.c.bf16 %v223_v42, %v223_v42 }
 0x1d3   :  { %473 = vmatmul.mubr.msk.bf16.vlgmr.msra.gmra.mxu1 %vm173_vm1, %v232_v43 }
 0x293   :  { %v301_v49 = vpop.f32.mrf.mxu1 }
 0x294   :  { %v302_v50 = vadd.f32 %v424_v48, %v301_v49 }
 0x295   :  { %v474_v51 = vpop.f32.mrf.mxu1 }
 0x296   :  { %v430_v52 = vmul.f32 -1.442695, %v302_v50 }
 0x297   :  { %v304_v53 = vpop.f32.mrf.mxu1 }
 0x298   :  { %522 = vpow2.f32 %v430_v52 }
 0x299   :  { %v475_v54 = vpop.f32.mrf.mxu1 }
 0x2a5   :  { %v523_v55 = vpop.eup %522 }
 0x2a6   :  { %v310_v56 = vadd.f32 1.0, %v523_v55 }
 0x2a8   :  { %524 = vrcp.f32 %v310_v56 }
 0x2b5   :  { %v525_v57 = vpop.eup %524 }
 0x2b6   :  { %v313_v58 = vmul.f32 %v525_v57, %v302_v50 }
 0x2b8   :  { %v322_v59 = vpack.c.bf16 %v313_v58, %v313_v58 }
 0x2ba   :  { %485 = vmatmul.mubr.msk.bf16.vlgmr.msra.gmra.mxu0 %vm173_vm1, %v322_v59 }
 0x37a   :  { %v391_v61 = vpop.f32.mrf.mxu0 }
 0x37b   :  { %v392_v62 = vadd.f32 %v431_v60, %v391_v61 }
 0x37c   :  { %v486_v63 = vpop.f32.mrf.mxu0 }
 0x37d   :  { %397 = vst.msk [vmem:[#allocation11] sm:$0xff] %vm173_vm1, %v392_v62 }
 0x37e   :  { %v394_v0 = vpop.f32.mrf.mxu0 }
 0x37f   :  { %637 = shalt.err (!%p634_p1)
}
 0x380   :  { %407 = dma.vmem_to_hbm [thread:$0]  %s405_s2, 128, %s786_s9, [#allocation4]   ;;  %v487_v1 = vpop.f32.mrf.mxu0 }
 0x381   :  { %652 = dma.done.wait [#allocation4], 128  }
 0x382   :  { %653 = vsyncadd [#allocation4], 4294967168 }
 0x383   :  { %411 = vsyncpa [#allocation3], 1 }
 0x384   :  { %412 = vsyncpa [#allocation6], 1 }
 0x385   :  { %413 = vsyncpa [#allocation9], 1 }
 0x386   :  { %414 = vsyncpa [#allocation4], 1 }

// kernel: branch_0_fun.7
= control target key start
LH: loop header
LB: loop body
LE: loop exit
PB: predicated region body
PF: predicated region fallthrough
CT: control target
= control target key end

     0   :  { %v970_v1 = vmov 0   ;;  %vm83_vm0 = vcmask 261120   ;;  %v53_v24 = vlaneseq  ;;  %vm349_vm1 = vcmask 523264   ;;  %s1249_s2 = inlined_call_operand.vmem [shape: bf16[32,256], index: 2, kind: input, shape index: {}]   ;;  %s1250_s0 = inlined_call_operand.vmem [shape: f32[2,8,32], index: 0, kind: input, shape index: {}]   ;;  %s1251_s4 = inlined_call_operand.vmem [shape: bf16[256,64], index: 4, kind: input, shape index: {}]   ;;  %s1252_s3 = inlined_call_operand.vmem [shape: f32[1,256], index: 3, kind: input, shape index: {}]   ;;  %s1253_s7 = inlined_call_operand.<no memory space> [shape: f32[1,1], index: 7, kind: input, shape index: {}]   ;;  %s1254_s5 = inlined_call_operand.vmem [shape: f32[1,64], index: 5, kind: input, shape index: {}]   ;;  %s1255_s1 = inlined_call_operand.vmem [shape: f32[2,8,64], index: 1, kind: input, shape index: {}]   ;;  %s1256_s6 = inlined_call_operand.vmem [shape: f32[1,64], index: 6, kind: input, shape index: {}]   ;;  %s1257_s8 = inlined_call_operand.vmem [shape: bf16[64,256], index: 8, kind: input, shape index: {}]   ;;  %s1258_s10 = inlined_call_operand.vmem [shape: bf16[256,64], index: 10, kind: input, shape index: {}]   ;;  %s1259_s9 = inlined_call_operand.vmem [shape: f32[1,256], index: 9, kind: input, shape index: {}]   ;;  %s1260_s11 = inlined_call_operand.vmem [shape: f32[1,64], index: 11, kind: input, shape index: {}]   ;;  %s1261_s12 = inlined_call_operand.vmem [shape: f32[2,64], index: 12, kind: output, shape index: {}]  }
   0x1   :  { %v890_v0 = vld [vmem:[%s1249_s2 + $0x14] ss:$8 sps:$4 sm:$0xff]   ;;  %119 = vmatprep.mubr.bf16.mxu1 %v970_v1  ;;  %888 = vset.pattern.permute.xlu1 %v970_v1  ;;  %v892_v2 = vld [vmem:[%s1249_s2 + $0x10] ss:$8 sps:$4 sm:$0xff]   ;;  %v893_v3 = vld [vmem:[%s1249_s2 + $0x4] ss:$8 sps:$4 sm:$0xff]   ;;  %v17_v61 = vstv %s1253_s7 }
   0x2   :  { %889 = vset.pattern.permute.xlu0 %v970_v1  ;;  %568 = vmatprep.mubr.bf16.mxu0 %v970_v1  ;;  %v895_v4 = vld [vmem:[%s1249_s2] ss:$8 sps:$4 sm:$0xff]   ;;  %v896_v8 = vld [vmem:[%s1251_s4 + $0x78] sm:$0xff]   ;;  %v898_v10 = vld [vmem:[%s1251_s4 + $0x70] sm:$0xff]   ;;  %v1103_v25 = vshrl.u32 %v53_v24, 7  ;;  %vm380_vm2 = vcmask 1041409  }
   0x3   :  { %99 = vmatprep.subr.bf16.mxu1 %v890_v0  ;;  %v44_v5 = vld [vmem:[%s1250_s0] sm:$0xff]  ;;  %v45_v6 = vld [vmem:[%s1250_s0 + $0x8] sm:$0xff]  ;;  %v897_v9 = vld [vmem:[%s1251_s4 + $0x38] sm:$0xff]   ;;  %18 = vst [vmem:[#allocation2] sm:$0x1] %v17_v61  ;;  %vm383_vm3 = vcmask 58368  }
   0x4   :  { %100 = vmatpush1.bf16.msra.mxu1 %v892_v2  ;;  %v50_v7 = vpack.c.bf16 %v45_v6, %v44_v5  ;;  %v899_v11 = vld [vmem:[%s1251_s4 + $0x30] sm:$0xff]   ;;  %v900_v12 = vld [vmem:[%s1251_s4 + $0x68] sm:$0xff]   ;;  %v902_v14 = vld [vmem:[%s1251_s4 + $0x60] sm:$0xff]   ;;  %v1106_v26 = vsub.s32 0, %v1103_v25  ;;  %v1112_v28 = vsub.s32 1, %v1103_v25  ;;  %vm781_vm4 = vcmask 517120  }
   0x5   :  { %101 = vmatprep.subr.bf16.mxu1 %v893_v3  ;;  %v901_v13 = vld [vmem:[%s1251_s4 + $0x28] sm:$0xff]   ;;  %v903_v15 = vld [vmem:[%s1251_s4 + $0x20] sm:$0xff]   ;;  %v904_v16 = vld [vmem:[%s1251_s4 + $0x58] sm:$0xff]  }
   0x6   :  { %v905_v17 = vld [vmem:[%s1251_s4 + $0x18] sm:$0xff]   ;;  %v906_v18 = vld [vmem:[%s1251_s4 + $0x50] sm:$0xff]   ;;  %v908_v20 = vld [vmem:[%s1251_s4 + $0x48] sm:$0xff]  }
   0x7   :  { %v907_v19 = vld [vmem:[%s1251_s4 + $0x10] sm:$0xff]   ;;  %v909_v21 = vld [vmem:[%s1251_s4 + $0x8] sm:$0xff]   ;;  %v910_v22 = vld [vmem:[%s1251_s4 + $0x40] sm:$0xff]  }
   0x8   :  { %102 = vmatpush1.bf16.msra.mxu1 %v895_v4  ;;  %v911_v23 = vld [vmem:[%s1251_s4] sm:$0xff]  }
   0x9   :  { %843 = vmatprep.subr.bf16.mxu1 %v896_v8  ;;  %v51_v27 = vld [vmem:[%s1252_s3] sm:$0x3] }
   0xa   :  { %v56_v29 = vrot.slane %v51_v27, %v1106_v26  ;;  %v60_v30 = vrot.slane %v51_v27, %v1112_v28  ;;  %v814_v62 = vld [vmem:[#allocation2] ss:$0 sm:$0xff] }
   0xb   :  { %791 = vmatmul.mubr.msk.bf16.vlgmr.msra.gmra.mxu1 %vm83_vm0, %v50_v7  ;;  %363 = vperm.xlu1 %888, %v814_v62   ;;  %v796_v0 = vld [vmem:[%s1254_s5] ss:$0 sm:$0xff] }
   0xc   :  { %844 = vmatpush3.bf16.msra.mxu1 %v897_v9  ;;  %v336_v4 = vld [vmem:[%s1255_s1] sm:$0xff] }
   0xd   :  { %845 = vmatprep.subr.bf16.mxu1 %v898_v10  ;;  %v813_v7 = vld [vmem:[%s1256_s6] ss:$0 sm:$0xff]  ;;  %v337_v10 = vld [vmem:[%s1255_s1 + $0x8] sm:$0xff] }
  0x10   :  { %846 = vmatpush3.bf16.msra.mxu1 %v899_v11 }
  0x11   :  { %847 = vmatprep.subr.bf16.mxu1 %v900_v12 }
  0x14   :  { %848 = vmatpush3.bf16.msra.mxu1 %v901_v13 }
  0x15   :  { %849 = vmatprep.subr.bf16.mxu1 %v902_v14 }
  0x18   :  { %850 = vmatpush3.bf16.msra.mxu1 %v903_v15 }
  0x19   :  { %851 = vmatprep.subr.bf16.mxu1 %v904_v16 }
  0x1c   :  { %852 = vmatpush3.bf16.msra.mxu1 %v905_v17  ;;  %v371_v17 = vand.u32 127, %v53_v24 }
  0x1d   :  { %853 = vmatprep.subr.bf16.mxu1 %v906_v18 }
  0x20   :  { %854 = vmatpush3.bf16.msra.mxu1 %v907_v19 }
  0x21   :  { %855 = vmatprep.subr.bf16.mxu1 %v908_v20  ;;  %v374_v20 = vsub.s32 %v371_v17, %v1103_v25 }
  0x24   :  { %856 = vmatpush3.bf16.msra.mxu1 %v909_v21 }
  0x25   :  { %857 = vmatprep.subr.bf16.mxu1 %v910_v22 }
  0x28   :  { %858 = vmatpush3.bf16.msra.mxu1 %v911_v23 }
  0x86   :  { %v364_v18 = vpop.permute.xlu1 %363 }
  0xcb   :  { %v121_v31 = vpop.f32.mrf.mxu1 }
  0xcc   :  { %v122_v32 = vadd.f32 %v121_v31, %v56_v29 }
  0xcd   :  { %v123_v33 = vpop.f32.mrf.mxu1 }
  0xce   :  { %v792_v34 = vmul.f32 -1.442695, %v122_v32  ;;  %v124_v35 = vadd.f32 %v123_v33, %v60_v30 }
  0xcf   :  { %v125_v36 = vpop.f32.mrf.mxu1 }
  0xd0   :  { %v793_v37 = vmul.f32 -1.442695, %v124_v35  ;;  %v126_v38 = vadd.f32 %v125_v36, %v56_v29  ;;  %940 = vpow2.f32 %v792_v34 }
  0xd1   :  { %v127_v39 = vpop.f32.mrf.mxu1 }
  0xd2   :  { %942 = vpow2.f32 %v793_v37  ;;  %v794_v40 = vmul.f32 -1.442695, %v126_v38  ;;  %v128_v41 = vadd.f32 %v127_v39, %v60_v30 }
  0xd4   :  { %944 = vpow2.f32 %v794_v40  ;;  %v795_v42 = vmul.f32 -1.442695, %v128_v41 }
  0xd6   :  { %946 = vpow2.f32 %v795_v42 }
  0xdd   :  { %v941_v43 = vpop.eup %940 }
  0xde   :  { %v142_v47 = vadd.f32 1.0, %v941_v43 }
  0xdf   :  { %v943_v44 = vpop.eup %942 }
  0xe0   :  { %v143_v45 = vadd.f32 1.0, %v943_v44 }
  0xe1   :  { %v945_v46 = vpop.eup %944 }
  0xe2   :  { %v144_v48 = vadd.f32 1.0, %v945_v46  ;;  %948 = vrcp.f32 %v143_v45 }
  0xe3   :  { %v947_v49 = vpop.eup %946 }
  0xe4   :  { %950 = vrcp.f32 %v144_v48  ;;  %v145_v50 = vadd.f32 1.0, %v947_v49 }
  0xe5   :  { %952 = vrcp.f32 %v142_v47 }
  0xe6   :  { %954 = vrcp.f32 %v145_v50 }
  0xef   :  { %v949_v51 = vpop.eup %948 }
  0xf0   :  { %v155_v56 = vmul.f32 %v949_v51, %v124_v35  ;;  %v912_v51 = vld [vmem:[%s1257_s8 + $0x34] ss:$8 sps:$4 sm:$0xff]  }
  0xf1   :  { %v951_v52 = vpop.eup %950  ;;  %544 = vmatprep.subr.bf16.mxu0 %v912_v51 }
  0xf2   :  { %v953_v53 = vpop.eup %952  ;;  %v156_v55 = vmul.f32 %v951_v52, %v126_v38  ;;  %v914_v52 = vld [vmem:[%s1257_s8 + $0x30] ss:$8 sps:$4 sm:$0xff]  }
  0xf3   :  { %v955_v54 = vpop.eup %954  ;;  %v154_v58 = vmul.f32 %v953_v53, %v122_v32  ;;  %545 = vmatpush1.bf16.msra.mxu0 %v914_v52  ;;  %v915_v53 = vld [vmem:[%s1257_s8 + $0x24] ss:$8 sps:$4 sm:$0xff]  }
  0xf4   :  { %v157_v57 = vmul.f32 %v955_v54, %v128_v41  ;;  %v917_v54 = vld [vmem:[%s1257_s8 + $0x20] ss:$8 sps:$4 sm:$0xff]   ;;  %546 = vmatprep.subr.bf16.mxu0 %v915_v53 }
  0xf5   :  { %v190_v60 = vpack.c.bf16 %v156_v55, %v154_v58  ;;  %v918_v55 = vld [vmem:[%s1257_s8 + $0x14] ss:$8 sps:$4 sm:$0xff]   ;;  %v923_v58 = vld [vmem:[%s1257_s8] ss:$8 sps:$4 sm:$0xff]  }
  0xf6   :  { %v191_v59 = vpack.c.bf16 %v157_v57, %v155_v56  ;;  %v920_v56 = vld [vmem:[%s1257_s8 + $0x10] ss:$8 sps:$4 sm:$0xff]   ;;  %v921_v57 = vld [vmem:[%s1257_s8 + $0x4] ss:$8 sps:$4 sm:$0xff]  }
  0xf7   :  { %547 = vmatpush1.bf16.msra.mxu0 %v917_v54 }
  0xf8   :  { %327 = vmatprep.mubr.bf16.mxu1 %v191_v59  ;;  %548 = vmatprep.subr.bf16.mxu0 %v918_v55 }
  0xf9   :  { %328 = vmatmul.mubr.bf16.vlgmr.msra.gmra.mxu1 %v190_v60 }
  0xfb   :  { %549 = vmatpush1.bf16.msra.mxu0 %v920_v56 }
  0xfc   :  { %550 = vmatprep.subr.bf16.mxu0 %v921_v57 }
  0xff   :  { %551 = vmatpush1.bf16.msra.mxu0 %v923_v58 }
 0x1b9   :  { %v859_v63 = vpop.f32.mrf.mxu1 }
 0x1bb   :  { %v860_v1 = vpop.f32.mrf.mxu1 }
 0x1bc   :  { %v861_v2 = vadd.f32 %v860_v1, %v859_v63 }
 0x1bd   :  { %v862_v3 = vpop.f32.mrf.mxu1 }
 0x1be   :  { %v330_v5 = vadd.f32 %v861_v2, %v796_v0 }
 0x1bf   :  { %v863_v6 = vpop.f32.mrf.mxu1 }
 0x1c0   :  { %v864_v8 = vadd.f32 %v863_v6, %v862_v3  ;;  %v1128_v9 = vadd.f32 %v336_v4, %v330_v5 }
 0x1c2   :  { %v333_v11 = vadd.f32 %v864_v8, %v796_v0  ;;  %v347_v12 = vmul.f32 %v813_v7, %v1128_v9 }
 0x1c4   :  { %v350_v13 = vsel %vm349_vm1, %v347_v12, 0.0  ;;  %v1135_v14 = vadd.f32 %v337_v10, %v333_v11 }
 0x1c5   :  { %351 = vadd.xlane.f32.xlu0 %v350_v13 }
 0x1c6   :  { %v348_v15 = vmul.f32 %v813_v7, %v1135_v14 }
 0x1c8   :  { %v353_v16 = vsel %vm349_vm1, %v348_v15, 0.0 }
 0x1c9   :  { %354 = vadd.xlane.f32.xlu0 %v353_v16 }
 0x24e   :  { %v352_v19 = vpop.xlane.xlu0 %351 }
 0x24f   :  { %v366_v21 = vadd.f32 %v364_v18, %v352_v19  ;;  %v924_v19 = vld [vmem:[%s1258_s10 + $0x78] sm:$0xff]  }
 0x250   :  { %865 = vmatprep.subr.bf16.mxu0 %v924_v19 }
 0x251   :  { %v375_v27 = vrot.slane %v366_v21, %v374_v20 }
 0x252   :  { %v355_v22 = vpop.xlane.xlu0 %354 }
 0x253   :  { %v367_v23 = vadd.f32 %v364_v18, %v355_v22  ;;  %v927_v22 = vld [vmem:[%s1258_s10 + $0x30] sm:$0xff]  }
 0x255   :  { %v379_v29 = vrot.slane %v367_v23, %v374_v20 }
 0x257   :  { %v381_v30 = vsel %vm380_vm2, %v379_v29, %v375_v27  ;;  %v929_v27 = vld [vmem:[%s1258_s10 + $0x28] sm:$0xff]   ;;  %v930_v29 = vld [vmem:[%s1258_s10 + $0x60] sm:$0xff]  }
 0x258   :  { %v384_v31 = vsel %vm383_vm3, %v381_v30, -inf  ;;  %v931_v30 = vld [vmem:[%s1258_s10 + $0x20] sm:$0xff]  }
 0x259   :  { %385 = vmax.xlane.f32.xlu1 %v384_v31  ;;  %v932_v31 = vld [vmem:[%s1258_s10 + $0x58] sm:$0xff]  }
 0x2e2   :  { %v386_v32 = vpop.xlane.xlu1 %385 }
 0x2e3   :  { %v391_v33 = vrot.slane %v386_v32, %v1106_v26  ;;  %v395_v24 = vrot.slane %v386_v32, %v1112_v28  ;;  %v933_v32 = vld [vmem:[%s1258_s10 + $0x18] sm:$0xff]  }
 0x2e5   :  { %v398_v34 = vsub.f32 %v366_v21, %v391_v33  ;;  %v399_v35 = vsub.f32 %v367_v23, %v395_v24  ;;  %v926_v21 = vld [vmem:[%s1258_s10 + $0x70] sm:$0xff]   ;;  %v928_v23 = vld [vmem:[%s1258_s10 + $0x68] sm:$0xff]  }
 0x2e6   :  { %v934_v33 = vld [vmem:[%s1258_s10 + $0x50] sm:$0xff]  }
 0x2e7   :  { %v400_v25 = vmul.f32 1.442695, %v398_v34  ;;  %v402_v36 = vmul.f32 1.442695, %v399_v35  ;;  %v935_v24 = vld [vmem:[%s1258_s10 + $0x10] sm:$0xff]   ;;  %v936_v34 = vld [vmem:[%s1258_s10 + $0x48] sm:$0xff]  }
 0x2e8   :  { %v937_v35 = vld [vmem:[%s1258_s10 + $0x8] sm:$0xff]  }
 0x2e9   :  { %956 = vpow2.f32 %v400_v25  ;;  %v938_v25 = vld [vmem:[%s1258_s10 + $0x40] sm:$0xff]  }
 0x2ea   :  { %958 = vpow2.f32 %v402_v36  ;;  %v939_v36 = vld [vmem:[%s1258_s10] sm:$0xff]  }
 0x2f6   :  { %v957_v37 = vpop.eup %956 }
 0x2f7   :  { %v959_v38 = vpop.eup %958  ;;  %407 = vperm.xlu0 %889, %v957_v37  }
 0x2f8   :  { %410 = vperm.xlu1 %888, %v959_v38  }
 0x372   :  { %v408_v39 = vpop.permute.xlu0 %407 }
 0x373   :  { %v411_v40 = vpop.permute.xlu1 %410  ;;  %v415_v41 = vrot.slane %v408_v39, %v374_v20 }
 0x374   :  { %v419_v42 = vrot.slane %v411_v40, %v374_v20  ;;  %v925_v20 = vld [vmem:[%s1258_s10 + $0x38] sm:$0xff]  }
 0x376   :  { %v420_v43 = vsel %vm380_vm2, %v419_v42, %v415_v41 }
 0x377   :  { %v422_v44 = vsel %vm383_vm3, %v420_v43, 0.0 }
 0x378   :  { %423 = vadd.xlane.f32.xlu0 %v422_v44 }
 0x401   :  { %v424_v45 = vpop.xlane.xlu0 %423 }
 0x402   :  { %960 = vrcp.f32 %v424_v45 }
 0x40f   :  { %v961_v46 = vpop.eup %960 }
 0x410   :  { %v430_v47 = vrot.slane %v961_v46, %v1106_v26  ;;  %v434_v49 = vrot.slane %v961_v46, %v1112_v28 }
 0x412   :  { %v437_v48 = vmul.f32 %v957_v37, %v430_v47  ;;  %v438_v50 = vmul.f32 %v959_v38, %v434_v49  ;;  %v475_v37 = vld [vmem:[%s1259_s9] sm:$0x3] }
 0x413   :  { %v480_v38 = vrot.slane %v475_v37, %v1106_v26  ;;  %v484_v39 = vrot.slane %v475_v37, %v1112_v28 }
 0x414   :  { %441 = vperm.xlu1 %888, %v437_v48  }
 0x418   :  { %446 = vperm.xlu1 %888, %v438_v50  }
 0x48f   :  { %v442_v59 = vpop.permute.xlu1 %441 }
 0x490   :  { %v449_v60 = vmul.f32 %v442_v59, %v1128_v9 }
 0x492   :  { %v451_v61 = vsel %vm349_vm1, %v449_v60, 0.0 }
 0x493   :  { %v452_v62 = vrot.slane %v451_v61, 4  ;;  %v447_v63 = vpop.permute.xlu1 %446 }
 0x494   :  { %v450_v0 = vmul.f32 %v447_v63, %v1135_v14 }
 0x495   :  { %v453_v1 = vadd.f32 %v452_v62, %v451_v61 }
 0x496   :  { %v458_v2 = vsel %vm349_vm1, %v450_v0, 0.0  ;;  %v842_v0 = vld [vmem:[%s1260_s11] ss:$0 sm:$0xff] }
 0x497   :  { %v454_v3 = vrot.slane %v453_v1, 2  ;;  %v459_v4 = vrot.slane %v458_v2, 4 }
 0x499   :  { %v455_v5 = vadd.f32 %v454_v3, %v453_v1  ;;  %v460_v6 = vadd.f32 %v459_v4, %v458_v2 }
 0x49b   :  { %v456_v7 = vrot.slane %v455_v5, 1  ;;  %v461_v8 = vrot.slane %v460_v6, 2 }
 0x49d   :  { %v1177_v10 = vadd.f32 %v456_v7, %v455_v5  ;;  %v462_v11 = vadd.f32 %v461_v8, %v460_v6 }
 0x49f   :  { %v463_v12 = vrot.slane %v462_v11, 1  ;;  %v473_v9 = vpack.c.bf16 %v1177_v10, %v1177_v10 }
 0x4a1   :  { %v1181_v13 = vadd.f32 %v463_v12, %v462_v11  ;;  %v489_v15 = vunpack.c.l.b16 %v473_v9 }
 0x4a3   :  { %v474_v14 = vpack.c.bf16 %v1181_v13, %v1181_v13 }
 0x4a5   :  { %v490_v16 = vunpack.c.l.b16 %v474_v14 }
 0x4a7   :  { %v491_v17 = vsel %vm380_vm2, %v490_v16, %v489_v15 }
 0x4a8   :  { %v492_v18 = vpack.c.b16 %v491_v17, %v491_v17 }
 0x4aa   :  { %823 = vmatmul.mubr.msk.bf16.vlgmr.msra.gmra.mxu0 %vm349_vm1, %v492_v18 }
 0x4ab   :  { %866 = vmatpush3.bf16.msra.mxu0 %v925_v20 }
 0x4ac   :  { %867 = vmatprep.subr.bf16.mxu0 %v926_v21 }
 0x4af   :  { %868 = vmatpush3.bf16.msra.mxu0 %v927_v22 }
 0x4b0   :  { %869 = vmatprep.subr.bf16.mxu0 %v928_v23 }
 0x4b3   :  { %870 = vmatpush3.bf16.msra.mxu0 %v929_v27 }
 0x4b4   :  { %871 = vmatprep.subr.bf16.mxu0 %v930_v29 }
 0x4b7   :  { %872 = vmatpush3.bf16.msra.mxu0 %v931_v30 }
 0x4b8   :  { %873 = vmatprep.subr.bf16.mxu0 %v932_v31 }
 0x4bb   :  { %874 = vmatpush3.bf16.msra.mxu0 %v933_v32 }
 0x4bc   :  { %875 = vmatprep.subr.bf16.mxu0 %v934_v33 }
 0x4bf   :  { %876 = vmatpush3.bf16.msra.mxu0 %v935_v24 }
 0x4c0   :  { %877 = vmatprep.subr.bf16.mxu0 %v936_v34 }
 0x4c3   :  { %878 = vmatpush3.bf16.msra.mxu0 %v937_v35 }
 0x4c4   :  { %879 = vmatprep.subr.bf16.mxu0 %v938_v25 }
 0x4c7   :  { %880 = vmatpush3.bf16.msra.mxu0 %v939_v36 }
 0x56a   :  { %v570_v40 = vpop.f32.mrf.mxu0 }
 0x56b   :  { %v571_v41 = vadd.f32 %v570_v40, %v480_v38 }
 0x56c   :  { %v572_v42 = vpop.f32.mrf.mxu0 }
 0x56d   :  { %v824_v43 = vmul.f32 -1.442695, %v571_v41  ;;  %v573_v44 = vadd.f32 %v572_v42, %v484_v39 }
 0x56e   :  { %v574_v45 = vpop.f32.mrf.mxu0 }
 0x56f   :  { %962 = vpow2.f32 %v824_v43  ;;  %v825_v46 = vmul.f32 -1.442695, %v573_v44 }
 0x570   :  { %v575_v47 = vpop.f32.mrf.mxu0 }
 0x571   :  { %964 = vpow2.f32 %v825_v46 }
 0x57c   :  { %v963_v48 = vpop.eup %962 }
 0x57d   :  { %v583_v49 = vadd.f32 1.0, %v963_v48 }
 0x57e   :  { %v965_v50 = vpop.eup %964 }
 0x57f   :  { %966 = vrcp.f32 %v583_v49  ;;  %v584_v51 = vadd.f32 1.0, %v965_v50 }
 0x581   :  { %968 = vrcp.f32 %v584_v51 }
 0x58c   :  { %v967_v52 = vpop.eup %966 }
 0x58d   :  { %v589_v53 = vmul.f32 %v967_v52, %v571_v41 }
 0x58e   :  { %v969_v26 = vpop.eup %968 }
 0x58f   :  { %v590_v28 = vmul.f32 %v969_v26, %v573_v44  ;;  %v623_v55 = vpack.c.bf16 %v589_v53, %v589_v53 }
 0x591   :  { %v624_v54 = vpack.c.bf16 %v590_v28, %v590_v28 }
 0x593   :  { %753 = vmatprep.mubr.bf16.mxu0 %v624_v54 }
 0x594   :  { %754 = vmatmul.mubr.bf16.vlgmr.msra.gmra.mxu0 %v623_v55 }
 0x654   :  { %v881_v56 = vpop.f32.mrf.mxu0 }
 0x656   :  { %v882_v57 = vpop.f32.mrf.mxu0 }
 0x657   :  { %v883_v58 = vadd.f32 %v882_v57, %v881_v56 }
 0x658   :  { %v884_v59 = vpop.f32.mrf.mxu0 }
 0x659   :  { %v762_v60 = vrot.slane %v883_v58, 1  ;;  %v765_v62 = vadd.f32 %v883_v58, %v1177_v10 }
 0x65a   :  { %v885_v61 = vpop.f32.mrf.mxu0 }
 0x65b   :  { %v766_v63 = vadd.f32 %v762_v60, %v1181_v13  ;;  %v774_v2 = vadd.f32 %v842_v0, %v765_v62 }
 0x65d   :  { %v775_v1 = vadd.f32 %v842_v0, %v766_v63 }
 0x65f   :  { %v778_v3 = vrot.slane %v775_v1, 7 }
 0x661   :  { %v779_v4 = vsel %vm380_vm2, %v778_v3, %v774_v2 }
 0x662   :  { %782 = vst.msk [vmem:[%s1261_s12] sm:$0x3] %vm781_vm4, %v779_v4 }

</bundles_post_ra>
